<compile_context>
chip_gen: v7x
topology: tpu7x:2x2x1
jax: 0.10.0
libtpu: 0.0.40
codegen_flags: <defaults>
</compile_context>

<pallas_src>
import jax
import jax.numpy as jnp
from jax import lax
from jax.experimental import pallas as pl
from jax.experimental.pallas import tpu as pltpu

# ----------------------------- configuration -------------------------------
BATCH = 2
T_IN = 12                    # raw input time steps (padded to T_STEPS)
FREQ = 16                    # feature (frequency) dimension
IN_CHANNELS = 4              # CNN input channels (spectrogram is replicated)
T_STEPS = 16                 # normalized time length
CONV_CH = 8                  # conv output channels
INPUT_DIM_ENCODER = CONV_CH * FREQ   # 128, FC input dim of encoder
OUTPUT_DIM_ENCODER = 32      # FC output dim of encoder == decoder seq length
OUTPUT_DIM_H_DECODER = 32    # GRU hidden size
NB_CLASSES = 10
DROPOUT_P_DECODER = 0.25     # inference mode -> identity
MAX_OUT_T_STEPS = 22         # stored by the module, unused in forward()
LANE_PAD = 128               # lane-dense classifier width (sliced to NB_CLASSES)

_VMEM = pltpu.MemorySpace.VMEM


# ------------------------------ fused kernel --------------------------------
def fused_dcase_kernel(patches_ref, wconv_ref, bconv_ref, mpool_ref,
                       fcw_ref, fcb_ref, wih_ref, bih_ref,
                       whh_ref, bhh_ref, wc_ref, bc_ref,
                       o_ref, gx_ref):
    """Entire BaselineDCASE forward for the whole (tiny) batch.

    patches_ref: (3*(F+2), B*T)    im2col'd, channel-collapsed conv input (f32)
    wconv_ref  : (C_out*F, 3*(F+2)) conv taps folded into one matmul weight
    bconv_ref  : (C_out*F, 1)      conv bias (repeated per frequency bin)
    mpool_ref  : (B*T, B)          per-batch time-mean pooling matrix (1/T blocks)
    fcw_ref    : (L, C_out*F)      encoder FC weight, fcb_ref: (L, 1)
    wih_ref    : (1, 1, 3H)        GRU input weight (input_size == 1)
    bih_ref    : (1, 1, 3H)        GRU input bias
    whh_ref    : (H, 3H)  bf16     GRU recurrent weight (pre-transposed)
    bhh_ref    : (1, 3H)  f32      GRU recurrent bias
    wc_ref     : (H, 128) f32      classifier weight (transposed, zero-padded)
    bc_ref     : (1, 128) f32      classifier bias (zero-padded)
    o_ref      : (L, B, 128)       per-step logits (lane-dense; sliced outside)
    gx_ref     : (L, B, 3H) VMEM scratch — input gate pre-activations
    """
    B, L, H = BATCH, OUTPUT_DIM_ENCODER, OUTPUT_DIM_H_DECODER

    # ---- Encoder: conv3x3(SAME) + bias + ReLU, FC, time-mean (reassociated),
    #      bias + ReLU.  (fcw @ mean_t(relu(conv)) == (fcw @ relu(conv)) @ mpool)
    d = jnp.maximum(
        jnp.dot(wconv_ref[...], patches_ref[...],
                preferred_element_type=jnp.float32) + bconv_ref[...],
        0.0)                                                      # (C_out*F, B*T)
    e = jnp.dot(fcw_ref[...], d, preferred_element_type=jnp.float32)   # (L, B*T)
    pooled = jnp.dot(e, mpool_ref[...],
                     preferred_element_type=jnp.float32)          # (L, B)
    h_enc = jnp.maximum(pooled + fcb_ref[...], 0.0)               # (L, B)

    # ---- GRU input projection for ALL steps at once (input_size == 1):
    #      gx[l, b, :] = h_enc[l, b] * w_ih + b_ih   (PyTorch gate order r,z,n)
    gx_ref[...] = h_enc[:, :, None] * wih_ref[...] + bih_ref[...]  # (L, B, 3H)

    # Loop-invariant weights loaded once (bf16 recurrent weight: single MXU pass).
    whh = whh_ref[...]        # (H, 3H) bf16
    bhh = bhh_ref[...]        # (1, 3H) f32
    wc = wc_ref[...]          # (H, 128) f32
    bc = bc_ref[...]          # (1, 128) f32

    # ---- GRU recurrence, fully unrolled; h lives in vregs (no VMEM round trip).
    h = jnp.zeros((B, H), jnp.float32)
    for t in range(L):
        gx_t = gx_ref[t]                                          # (B, 3H), 1 load
        gh = jnp.dot(h.astype(jnp.bfloat16), whh,
                     preferred_element_type=jnp.float32) + bhh    # (B, 3H)
        r = jax.nn.sigmoid(gx_t[:, :H] + gh[:, :H])
        z = jax.nn.sigmoid(gx_t[:, H:2 * H] + gh[:, H:2 * H])
        n = jnp.tanh(gx_t[:, 2 * H:] + r * gh[:, 2 * H:])         # b_hn inside r*(.)
        h = (1.0 - z) * n + z * h                                 # (B, H)

        # TODO(synk): Dropout(p=0.25) before the classifier is an inference no-op.
        # Classifier fused per step: tiny dot + lane-dense tile store, both off
        # the serial dependence chain (free filler under the recurrence latency).
        o_ref[t] = jnp.dot(h, wc, preferred_element_type=jnp.float32) + bc


# ------------------------------ parameters ----------------------------------
def init_params(key):
    H = OUTPUT_DIM_H_DECODER
    ks = jax.random.split(key, 10)
    return {
        # Encoder
        "conv_w": jax.random.normal(ks[0], (CONV_CH, IN_CHANNELS, 3, 3), jnp.float32) * 0.1,
        "conv_b": jax.random.normal(ks[1], (CONV_CH,), jnp.float32) * 0.1,
        "fc_w": jax.random.normal(ks[2], (OUTPUT_DIM_ENCODER, INPUT_DIM_ENCODER), jnp.float32) * 0.1,
        "fc_b": jax.random.normal(ks[3], (OUTPUT_DIM_ENCODER,), jnp.float32) * 0.1,
        # Decoder GRU (PyTorch gate order r, z, n)
        "w_ih": jax.random.normal(ks[4], (3 * H, 1), jnp.float32) * 0.3,
        "b_ih": jax.random.normal(ks[5], (3 * H,), jnp.float32) * 0.1,
        "w_hh": jax.random.normal(ks[6], (3 * H, H), jnp.float32) * 0.1,
        "b_hh": jax.random.normal(ks[7], (3 * H,), jnp.float32) * 0.1,
        # Classifier
        "wc": jax.random.normal(ks[8], (NB_CLASSES, H), jnp.float32) * 0.3,
        "bc": jax.random.normal(ks[9], (NB_CLASSES,), jnp.float32) * 0.1,
    }


def prepare_params(p):
    """One-time, parameter-only packing (hoisted out of the per-call path)."""
    H, F, T, B = OUTPUT_DIM_H_DECODER, FREQ, T_STEPS, BATCH

    # Conv weights pre-summed over C_in (exact: input is replicated across
    # channels), then folded into an im2col matmul weight:
    #   w_big[co*F+f, kh*(F+2)+j] = sum_kw w_sum[co,kh,kw] * (j == f+kw)
    w_sum = p["conv_w"].sum(axis=1)                               # (C_out, 3, 3)
    jj = jnp.arange(F + 2)[None, :, None]
    ff = jnp.arange(F)[None, None, :]
    kk = jnp.arange(3)[:, None, None]
    tap = (jj == ff + kk).astype(jnp.float32)                     # (3, F+2, F)
    w_big = jnp.einsum("chw,wjf->cfhj", w_sum, tap).reshape(CONV_CH * F, 3 * (F + 2))
    b_big = jnp.repeat(p["conv_b"], F)[:, None]                   # (C_out*F, 1)

    # Per-batch time-mean pooling matrix: m_pool[b*T+t, b'] = (b==b')/T
    m_pool = jnp.repeat(jnp.eye(B, dtype=jnp.float32), T, axis=0) / T   # (B*T, B)

    # Classifier, lane-dense (zero-padded to 128 output lanes).
    wc_pad = jnp.zeros((H, LANE_PAD), jnp.float32).at[:, :NB_CLASSES].set(p["wc"].T)
    bc_pad = jnp.zeros((1, LANE_PAD), jnp.float32).at[:, :NB_CLASSES].set(p["bc"])

    return {
        "w_big": w_big, "b_big": b_big, "m_pool": m_pool,
        "fc_w": p["fc_w"], "fc_b": p["fc_b"][:, None],
        "w_ih": p["w_ih"].reshape(1, 1, 3 * H),
        "b_ih": p["b_ih"].reshape(1, 1, 3 * H),
        "w_hh_t": p["w_hh"].T.astype(jnp.bfloat16),               # serial-path dot in bf16
        "b_hh": p["b_hh"][None, :],
        "wc_pad": wc_pad, "bc_pad": bc_pad,
    }


# ------------------------------ forward (glue) -------------------------------
def baseline_dcase_forward(x, w):
    """x: (B, T_in, F) float32  ->  (B, output_dim_encoder, nb_classes)."""
    B, T_in, F = x.shape
    T, H, L = T_STEPS, OUTPUT_DIM_H_DECODER, OUTPUT_DIM_ENCODER

    # torch.cat((x, zeros), dim=1): pad time to t_steps; plus a 1-halo on both
    # spatial dims for the 3x3 'same' conv.
    x_pad = jnp.pad(x, ((0, 0), (1, T - T_in + 1), (1, 1)))       # (B, T+2, F+2)

    # im2col (time-shifted rows), transposed so the kernel's conv is one matmul:
    # patches_t[kh*(F+2)+j, b*T+t] = x_pad[b, t+kh, j]
    blocks = jnp.stack([x_pad[:, kh:kh + T, :] for kh in range(3)], axis=0)  # (3,B,T,F+2)
    patches_t = blocks.transpose(0, 3, 1, 2).reshape(3 * (F + 2), B * T)

    args = (
        patches_t, w["w_big"], w["b_big"], w["m_pool"],
        w["fc_w"], w["fc_b"], w["w_ih"], w["b_ih"],
        w["w_hh_t"], w["b_hh"], w["wc_pad"], w["bc_pad"],
    )

    out = pl.pallas_call(
        fused_dcase_kernel,
        out_shape=jax.ShapeDtypeStruct((L, B, LANE_PAD), jnp.float32),
        in_specs=[pl.BlockSpec(memory_space=_VMEM)] * len(args),
        out_specs=pl.BlockSpec(memory_space=_VMEM),
        scratch_shapes=[
            pltpu.VMEM((L, B, 3 * H), jnp.float32),   # gx: input gate pre-acts
        ],
    )(*args)

    # (L, B, 128) -> (B, L, nb_classes): cheap XLA-side layout fixup.
    return jnp.transpose(out, (1, 0, 2))[:, :, :NB_CLASSES]


# --------------------------- pure-JAX reference -----------------------------
def reference_forward(x, p):
    B, T_in, F = x.shape
    H = OUTPUT_DIM_H_DECODER
    xp = jnp.pad(x, ((0, 0), (0, T_STEPS - T_in), (0, 0)))
    xc = jnp.broadcast_to(xp[:, None], (B, IN_CHANNELS, T_STEPS, F))
    conv = lax.conv_general_dilated(xc, p["conv_w"], (1, 1), "SAME",
                                    dimension_numbers=("NCHW", "OIHW", "NCHW"))
    conv = jnp.maximum(conv + p["conv_b"][None, :, None, None], 0.0)
    pooled = conv.mean(axis=2)                       # (B, C_out, F)
    h = jnp.maximum(pooled.reshape(B, -1) @ p["fc_w"].T + p["fc_b"], 0.0)  # (B, L)
    xs = jnp.swapaxes(h[..., None], 0, 1)            # (L, B, 1)

    def gru_step(hprev, xt):
        gi = xt @ p["w_ih"].T + p["b_ih"]
        gh = hprev @ p["w_hh"].T + p["b_hh"]
        r = jax.nn.sigmoid(gi[:, :H] + gh[:, :H])
        z = jax.nn.sigmoid(gi[:, H:2 * H] + gh[:, H:2 * H])
        n = jnp.tanh(gi[:, 2 * H:] + r * gh[:, 2 * H:])
        hn = (1.0 - z) * n + z * hprev
        return hn, hn

    _, hs = lax.scan(gru_step, jnp.zeros((B, H), jnp.float32), xs)  # (L, B, H)
    hs = jnp.swapaxes(hs, 0, 1)                                     # (B, L, H)
    return hs @ p["wc"].T + p["bc"]


# ---------------------------------- main -------------------------------------
if __name__ == "__main__":
    key = jax.random.PRNGKey(0)
    kx, kp = jax.random.split(key)
    x = jax.random.normal(kx, (BATCH, T_IN, FREQ), jnp.float32)
    params = init_params(kp)
    packed = prepare_params(params)       # one-time weight packing (not per call)

    fwd = jax.jit(lambda inp: baseline_dcase_forward(inp, packed))
    out = jax.block_until_ready(fwd(x))

    assert out.shape == (BATCH, OUTPUT_DIM_ENCODER, NB_CLASSES), out.shape
    assert bool(jnp.all(jnp.isfinite(out)))

    ref = reference_forward(x, params)
    max_err = float(jnp.max(jnp.abs(out - ref)))
    # bf16 recurrent-gate matmul (32 serial steps) -> allow a small numeric slack.
    assert max_err < 2e-2, f"mismatch vs reference: {max_err}"

    print("KERNEL_OK")
</pallas_src>

<mosaic_0001>
module attributes {stable_mosaic.version = 11 : i64} {
  func.func @fused_dcase_kernel(%arg0: memref<54x32xf32, #tpu.memory_space<vmem>>, %arg1: memref<128x54xf32, #tpu.memory_space<vmem>>, %arg2: memref<128x1xf32, #tpu.memory_space<vmem>>, %arg3: memref<32x2xf32, #tpu.memory_space<vmem>>, %arg4: memref<32x128xf32, #tpu.memory_space<vmem>>, %arg5: memref<32x1xf32, #tpu.memory_space<vmem>>, %arg6: memref<1x1x96xf32, #tpu.memory_space<vmem>>, %arg7: memref<1x1x96xf32, #tpu.memory_space<vmem>>, %arg8: memref<32x96xbf16, #tpu.memory_space<vmem>>, %arg9: memref<1x96xf32, #tpu.memory_space<vmem>>, %arg10: memref<32x128xf32, #tpu.memory_space<vmem>>, %arg11: memref<1x128xf32, #tpu.memory_space<vmem>>, %arg12: memref<32x2x128xf32, #tpu.memory_space<vmem>>, %arg13: memref<32x2x96xf32, #tpu.memory_space<vmem>>) attributes {dimension_semantics = [], scalar_prefetch = 0 : i64, scratch_operands = 1 : i64, tpu.core_type = #tpu.core_type<tc>} {
    %c0 = arith.constant 0 : index
    %c0_0 = arith.constant 0 : index
    %0 = vector.load %arg1[%c0, %c0_0] : memref<128x54xf32, #tpu.memory_space<vmem>>, vector<128x54xf32>
    %c0_1 = arith.constant 0 : index
    %c0_2 = arith.constant 0 : index
    %1 = vector.load %arg0[%c0_1, %c0_2] : memref<54x32xf32, #tpu.memory_space<vmem>>, vector<54x32xf32>
    %cst = arith.constant dense<0.000000e+00> : vector<128x32xf32>
    %2 = tpu.matmul %0, %1, %cst {dimension_numbers = #tpu.dot_dimension_numbers<[1], [0], [0], [1], [0, 0, 1, 1], [], []>} : vector<128x54xf32>, vector<54x32xf32>, vector<128x32xf32> -> vector<128x32xf32>
    %c0_3 = arith.constant 0 : index
    %c0_4 = arith.constant 0 : index
    %3 = vector.load %arg2[%c0_3, %c0_4] : memref<128x1xf32, #tpu.memory_space<vmem>>, vector<128x1xf32>
    %4 = vector.broadcast %3 : vector<128x1xf32> to vector<128x32xf32>
    %5 = arith.addf %2, %4 : vector<128x32xf32>
    %cst_5 = arith.constant 0.000000e+00 : f32
    %6 = vector.broadcast %cst_5 : f32 to vector<128x32xf32>
    %7 = arith.maximumf %5, %6 : vector<128x32xf32>
    %c0_6 = arith.constant 0 : index
    %c0_7 = arith.constant 0 : index
    %8 = vector.load %arg4[%c0_6, %c0_7] : memref<32x128xf32, #tpu.memory_space<vmem>>, vector<32x128xf32>
    %cst_8 = arith.constant dense<0.000000e+00> : vector<32x32xf32>
    %9 = tpu.matmul %8, %7, %cst_8 {dimension_numbers = #tpu.dot_dimension_numbers<[1], [0], [0], [1], [0, 0, 1, 1], [], []>} : vector<32x128xf32>, vector<128x32xf32>, vector<32x32xf32> -> vector<32x32xf32>
    %c0_9 = arith.constant 0 : index
    %c0_10 = arith.constant 0 : index
    %10 = vector.load %arg3[%c0_9, %c0_10] : memref<32x2xf32, #tpu.memory_space<vmem>>, vector<32x2xf32>
    %cst_11 = arith.constant dense<0.000000e+00> : vector<32x2xf32>
    %11 = tpu.matmul %9, %10, %cst_11 {dimension_numbers = #tpu.dot_dimension_numbers<[1], [0], [0], [1], [0, 0, 1, 1], [], []>} : vector<32x32xf32>, vector<32x2xf32>, vector<32x2xf32> -> vector<32x2xf32>
    %c0_12 = arith.constant 0 : index
    %c0_13 = arith.constant 0 : index
    %12 = vector.load %arg5[%c0_12, %c0_13] : memref<32x1xf32, #tpu.memory_space<vmem>>, vector<32x1xf32>
    %13 = vector.broadcast %12 : vector<32x1xf32> to vector<32x2xf32>
    %14 = arith.addf %11, %13 : vector<32x2xf32>
    %cst_14 = arith.constant 0.000000e+00 : f32
    %15 = vector.broadcast %cst_14 : f32 to vector<32x2xf32>
    %16 = arith.maximumf %14, %15 : vector<32x2xf32>
    %17 = vector.shape_cast %16 : vector<32x2xf32> to vector<32x2x1xf32>
    %c0_15 = arith.constant 0 : index
    %c0_16 = arith.constant 0 : index
    %c0_17 = arith.constant 0 : index
    %18 = vector.load %arg6[%c0_15, %c0_16, %c0_17] : memref<1x1x96xf32, #tpu.memory_space<vmem>>, vector<1x1x96xf32>
    %19 = vector.broadcast %17 : vector<32x2x1xf32> to vector<32x2x96xf32>
    %20 = vector.broadcast %18 : vector<1x1x96xf32> to vector<32x2x96xf32>
    %21 = arith.mulf %19, %20 : vector<32x2x96xf32>
    %c0_18 = arith.constant 0 : index
    %c0_19 = arith.constant 0 : index
    %c0_20 = arith.constant 0 : index
    %22 = vector.load %arg7[%c0_18, %c0_19, %c0_20] : memref<1x1x96xf32, #tpu.memory_space<vmem>>, vector<1x1x96xf32>
    %23 = vector.broadcast %22 : vector<1x1x96xf32> to vector<32x2x96xf32>
    %24 = arith.addf %21, %23 : vector<32x2x96xf32>
    %c0_21 = arith.constant 0 : index
    %c0_22 = arith.constant 0 : index
    %c0_23 = arith.constant 0 : index
    %25 = vector.load %arg13[%c0_21, %c0_22, %c0_23] : memref<32x2x96xf32, #tpu.memory_space<vmem>>, vector<32x2x96xf32>
    tpu.vector_store %arg13[%c0_21, %c0_22, %c0_23], %24 {strides = array<i32>} : memref<32x2x96xf32, #tpu.memory_space<vmem>>, vector<32x2x96xf32>,
    %c0_24 = arith.constant 0 : index
    %c0_25 = arith.constant 0 : index
    %26 = vector.load %arg8[%c0_24, %c0_25] : memref<32x96xbf16, #tpu.memory_space<vmem>>, vector<32x96xbf16>
    %c0_26 = arith.constant 0 : index
    %c0_27 = arith.constant 0 : index
    %27 = vector.load %arg9[%c0_26, %c0_27] : memref<1x96xf32, #tpu.memory_space<vmem>>, vector<1x96xf32>
    %c0_28 = arith.constant 0 : index
    %c0_29 = arith.constant 0 : index
    %28 = vector.load %arg10[%c0_28, %c0_29] : memref<32x128xf32, #tpu.memory_space<vmem>>, vector<32x128xf32>
    %c0_30 = arith.constant 0 : index
    %c0_31 = arith.constant 0 : index
    %29 = vector.load %arg11[%c0_30, %c0_31] : memref<1x128xf32, #tpu.memory_space<vmem>>, vector<1x128xf32>
    %cst_32 = arith.constant 0.000000e+00 : f32
    %30 = vector.broadcast %cst_32 : f32 to vector<2x32xf32>
    %c0_33 = arith.constant 0 : index
    %c0_34 = arith.constant 0 : index
    %c0_35 = arith.constant 0 : index
    %31 = vector.load %arg13[%c0_33, %c0_34, %c0_35] : memref<32x2x96xf32, #tpu.memory_space<vmem>>, vector<1x2x96xf32>
    %32 = vector.shape_cast %31 : vector<1x2x96xf32> to vector<2x96xf32>
    %33 = arith.truncf %30 : vector<2x32xf32> to vector<2x32xbf16>
    %cst_36 = arith.constant dense<0.000000e+00> : vector<2x96xf32>
    %34 = tpu.matmul %33, %26, %cst_36 {dimension_numbers = #tpu.dot_dimension_numbers<[1], [0], [0], [1], [0, 0, 1, 1], [], []>} : vector<2x32xbf16>, vector<32x96xbf16>, vector<2x96xf32> -> vector<2x96xf32>
    %35 = vector.broadcast %27 : vector<1x96xf32> to vector<2x96xf32>
    %36 = arith.addf %34, %35 : vector<2x96xf32>
    %37 = vector.extract_strided_slice %32 {offsets = [0, 0], sizes = [2, 32], strides = [1, 1]} : vector<2x96xf32> to vector<2x32xf32>
    %38 = vector.extract_strided_slice %36 {offsets = [0, 0], sizes = [2, 32], strides = [1, 1]} : vector<2x96xf32> to vector<2x32xf32>
    %39 = arith.addf %37, %38 : vector<2x32xf32>
    %40 = arith.negf %39 : vector<2x32xf32>
    %41 = math.exp %40 : vector<2x32xf32>
    %cst_37 = arith.constant 1.000000e+00 : f32
    %42 = vector.broadcast %cst_37 : f32 to vector<2x32xf32>
    %43 = arith.addf %42, %41 : vector<2x32xf32>
    %44 = arith.divf %42, %43 : vector<2x32xf32>
    %45 = vector.extract_strided_slice %32 {offsets = [0, 32], sizes = [2, 32], strides = [1, 1]} : vector<2x96xf32> to vector<2x32xf32>
    %46 = vector.extract_strided_slice %36 {offsets = [0, 32], sizes = [2, 32], strides = [1, 1]} : vector<2x96xf32> to vector<2x32xf32>
    %47 = arith.addf %45, %46 : vector<2x32xf32>
    %48 = arith.negf %47 : vector<2x32xf32>
    %49 = math.exp %48 : vector<2x32xf32>
    %cst_38 = arith.constant 1.000000e+00 : f32
    %50 = vector.broadcast %cst_38 : f32 to vector<2x32xf32>
    %51 = arith.addf %50, %49 : vector<2x32xf32>
    %52 = arith.divf %50, %51 : vector<2x32xf32>
    %53 = vector.extract_strided_slice %32 {offsets = [0, 64], sizes = [2, 32], strides = [1, 1]} : vector<2x96xf32> to vector<2x32xf32>
    %54 = vector.extract_strided_slice %36 {offsets = [0, 64], sizes = [2, 32], strides = [1, 1]} : vector<2x96xf32> to vector<2x32xf32>
    %55 = arith.mulf %44, %54 : vector<2x32xf32>
    %56 = arith.addf %53, %55 : vector<2x32xf32>
    %57 = math.tanh %56 : vector<2x32xf32>
    %cst_39 = arith.constant 1.000000e+00 : f32
    %58 = vector.broadcast %cst_39 : f32 to vector<2x32xf32>
    %59 = arith.subf %58, %52 : vector<2x32xf32>
    %60 = arith.mulf %59, %57 : vector<2x32xf32>
    %61 = arith.mulf %52, %30 : vector<2x32xf32>
    %62 = arith.addf %60, %61 : vector<2x32xf32>
    %cst_40 = arith.constant dense<0.000000e+00> : vector<2x128xf32>
    %63 = tpu.matmul %62, %28, %cst_40 {dimension_numbers = #tpu.dot_dimension_numbers<[1], [0], [0], [1], [0, 0, 1, 1], [], []>} : vector<2x32xf32>, vector<32x128xf32>, vector<2x128xf32> -> vector<2x128xf32>
    %64 = vector.broadcast %29 : vector<1x128xf32> to vector<2x128xf32>
    %65 = arith.addf %63, %64 : vector<2x128xf32>
    %c0_41 = arith.constant 0 : index
    %c0_42 = arith.constant 0 : index
    %c0_43 = arith.constant 0 : index
    %66 = vector.load %arg12[%c0_41, %c0_42, %c0_43] : memref<32x2x128xf32, #tpu.memory_space<vmem>>, vector<1x2x128xf32>
    %67 = vector.shape_cast %66 : vector<1x2x128xf32> to vector<2x128xf32>
    %68 = vector.shape_cast %65 : vector<2x128xf32> to vector<1x2x128xf32>
    tpu.vector_store %arg12[%c0_41, %c0_42, %c0_43], %68 {strides = array<i32>} : memref<32x2x128xf32, #tpu.memory_space<vmem>>, vector<1x2x128xf32>,
    %c1 = arith.constant 1 : index
    %c0_44 = arith.constant 0 : index
    %c0_45 = arith.constant 0 : index
    %69 = vector.load %arg13[%c1, %c0_44, %c0_45] : memref<32x2x96xf32, #tpu.memory_space<vmem>>, vector<1x2x96xf32>
    %70 = vector.shape_cast %69 : vector<1x2x96xf32> to vector<2x96xf32>
    %71 = arith.truncf %62 : vector<2x32xf32> to vector<2x32xbf16>
    %cst_46 = arith.constant dense<0.000000e+00> : vector<2x96xf32>
    %72 = tpu.matmul %71, %26, %cst_46 {dimension_numbers = #tpu.dot_dimension_numbers<[1], [0], [0], [1], [0, 0, 1, 1], [], []>} : vector<2x32xbf16>, vector<32x96xbf16>, vector<2x96xf32> -> vector<2x96xf32>
    %73 = vector.broadcast %27 : vector<1x96xf32> to vector<2x96xf32>
    %74 = arith.addf %72, %73 : vector<2x96xf32>
    %75 = vector.extract_strided_slice %70 {offsets = [0, 0], sizes = [2, 32], strides = [1, 1]} : vector<2x96xf32> to vector<2x32xf32>
    %76 = vector.extract_strided_slice %74 {offsets = [0, 0], sizes = [2, 32], strides = [1, 1]} : vector<2x96xf32> to vector<2x32xf32>
    %77 = arith.addf %75, %76 : vector<2x32xf32>
    %78 = arith.negf %77 : vector<2x32xf32>
    %79 = math.exp %78 : vector<2x32xf32>
    %cst_47 = arith.constant 1.000000e+00 : f32
    %80 = vector.broadcast %cst_47 : f32 to vector<2x32xf32>
    %81 = arith.addf %80, %79 : vector<2x32xf32>
    %82 = arith.divf %80, %81 : vector<2x32xf32>
    %83 = vector.extract_strided_slice %70 {offsets = [0, 32], sizes = [2, 32], strides = [1, 1]} : vector<2x96xf32> to vector<2x32xf32>
    %84 = vector.extract_strided_slice %74 {offsets = [0, 32], sizes = [2, 32], strides = [1, 1]} : vector<2x96xf32> to vector<2x32xf32>
    %85 = arith.addf %83, %84 : vector<2x32xf32>
    %86 = arith.negf %85 : vector<2x32xf32>
    %87 = math.exp %86 : vector<2x32xf32>
    %cst_48 = arith.constant 1.000000e+00 : f32
    %88 = vector.broadcast %cst_48 : f32 to vector<2x32xf32>
    %89 = arith.addf %88, %87 : vector<2x32xf32>
    %90 = arith.divf %88, %89 : vector<2x32xf32>
    %91 = vector.extract_strided_slice %70 {offsets = [0, 64], sizes = [2, 32], strides = [1, 1]} : vector<2x96xf32> to vector<2x32xf32>
    %92 = vector.extract_strided_slice %74 {offsets = [0, 64], sizes = [2, 32], strides = [1, 1]} : vector<2x96xf32> to vector<2x32xf32>
    %93 = arith.mulf %82, %92 : vector<2x32xf32>
    %94 = arith.addf %91, %93 : vector<2x32xf32>
    %95 = math.tanh %94 : vector<2x32xf32>
    %cst_49 = arith.constant 1.000000e+00 : f32
    %96 = vector.broadcast %cst_49 : f32 to vector<2x32xf32>
    %97 = arith.subf %96, %90 : vector<2x32xf32>
    %98 = arith.mulf %97, %95 : vector<2x32xf32>
    %99 = arith.mulf %90, %62 : vector<2x32xf32>
    %100 = arith.addf %98, %99 : vector<2x32xf32>
    %cst_50 = arith.constant dense<0.000000e+00> : vector<2x128xf32>
    %101 = tpu.matmul %100, %28, %cst_50 {dimension_numbers = #tpu.dot_dimension_numbers<[1], [0], [0], [1], [0, 0, 1, 1], [], []>} : vector<2x32xf32>, vector<32x128xf32>, vector<2x128xf32> -> vector<2x128xf32>
    %102 = vector.broadcast %29 : vector<1x128xf32> to vector<2x128xf32>
    %103 = arith.addf %101, %102 : vector<2x128xf32>
    %c1_51 = arith.constant 1 : index
    %c0_52 = arith.constant 0 : index
    %c0_53 = arith.constant 0 : index
    %104 = vector.load %arg12[%c1_51, %c0_52, %c0_53] : memref<32x2x128xf32, #tpu.memory_space<vmem>>, vector<1x2x128xf32>
    %105 = vector.shape_cast %104 : vector<1x2x128xf32> to vector<2x128xf32>
    %106 = vector.shape_cast %103 : vector<2x128xf32> to vector<1x2x128xf32>
    tpu.vector_store %arg12[%c1_51, %c0_52, %c0_53], %106 {strides = array<i32>} : memref<32x2x128xf32, #tpu.memory_space<vmem>>, vector<1x2x128xf32>,
    %c2 = arith.constant 2 : index
    %c0_54 = arith.constant 0 : index
    %c0_55 = arith.constant 0 : index
    %107 = vector.load %arg13[%c2, %c0_54, %c0_55] : memref<32x2x96xf32, #tpu.memory_space<vmem>>, vector<1x2x96xf32>
    %108 = vector.shape_cast %107 : vector<1x2x96xf32> to vector<2x96xf32>
    %109 = arith.truncf %100 : vector<2x32xf32> to vector<2x32xbf16>
    %cst_56 = arith.constant dense<0.000000e+00> : vector<2x96xf32>
    %110 = tpu.matmul %109, %26, %cst_56 {dimension_numbers = #tpu.dot_dimension_numbers<[1], [0], [0], [1], [0, 0, 1, 1], [], []>} : vector<2x32xbf16>, vector<32x96xbf16>, vector<2x96xf32> -> vector<2x96xf32>
    %111 = vector.broadcast %27 : vector<1x96xf32> to vector<2x96xf32>
    %112 = arith.addf %110, %111 : vector<2x96xf32>
    %113 = vector.extract_strided_slice %108 {offsets = [0, 0], sizes = [2, 32], strides = [1, 1]} : vector<2x96xf32> to vector<2x32xf32>
    %114 = vector.extract_strided_slice %112 {offsets = [0, 0], sizes = [2, 32], strides = [1, 1]} : vector<2x96xf32> to vector<2x32xf32>
    %115 = arith.addf %113, %114 : vector<2x32xf32>
    %116 = arith.negf %115 : vector<2x32xf32>
    %117 = math.exp %116 : vector<2x32xf32>
    %cst_57 = arith.constant 1.000000e+00 : f32
    %118 = vector.broadcast %cst_57 : f32 to vector<2x32xf32>
    %119 = arith.addf %118, %117 : vector<2x32xf32>
    %120 = arith.divf %118, %119 : vector<2x32xf32>
    %121 = vector.extract_strided_slice %108 {offsets = [0, 32], sizes = [2, 32], strides = [1, 1]} : vector<2x96xf32> to vector<2x32xf32>
    %122 = vector.extract_strided_slice %112 {offsets = [0, 32], sizes = [2, 32], strides = [1, 1]} : vector<2x96xf32> to vector<2x32xf32>
    %123 = arith.addf %121, %122 : vector<2x32xf32>
    %124 = arith.negf %123 : vector<2x32xf32>
    %125 = math.exp %124 : vector<2x32xf32>
    %cst_58 = arith.constant 1.000000e+00 : f32
    %126 = vector.broadcast %cst_58 : f32 to vector<2x32xf32>
    %127 = arith.addf %126, %125 : vector<2x32xf32>
    %128 = arith.divf %126, %127 : vector<2x32xf32>
    %129 = vector.extract_strided_slice %108 {offsets = [0, 64], sizes = [2, 32], strides = [1, 1]} : vector<2x96xf32> to vector<2x32xf32>
    %130 = vector.extract_strided_slice %112 {offsets = [0, 64], sizes = [2, 32], strides = [1, 1]} : vector<2x96xf32> to vector<2x32xf32>
    %131 = arith.mulf %120, %130 : vector<2x32xf32>
    %132 = arith.addf %129, %131 : vector<2x32xf32>
    %133 = math.tanh %132 : vector<2x32xf32>
    %cst_59 = arith.constant 1.000000e+00 : f32
    %134 = vector.broadcast %cst_59 : f32 to vector<2x32xf32>
    %135 = arith.subf %134, %128 : vector<2x32xf32>
    %136 = arith.mulf %135, %133 : vector<2x32xf32>
    %137 = arith.mulf %128, %100 : vector<2x32xf32>
    %138 = arith.addf %136, %137 : vector<2x32xf32>
    %cst_60 = arith.constant dense<0.000000e+00> : vector<2x128xf32>
    %139 = tpu.matmul %138, %28, %cst_60 {dimension_numbers = #tpu.dot_dimension_numbers<[1], [0], [0], [1], [0, 0, 1, 1], [], []>} : vector<2x32xf32>, vector<32x128xf32>, vector<2x128xf32> -> vector<2x128xf32>
    %140 = vector.broadcast %29 : vector<1x128xf32> to vector<2x128xf32>
    %141 = arith.addf %139, %140 : vector<2x128xf32>
    %c2_61 = arith.constant 2 : index
    %c0_62 = arith.constant 0 : index
    %c0_63 = arith.constant 0 : index
    %142 = vector.load %arg12[%c2_61, %c0_62, %c0_63] : memref<32x2x128xf32, #tpu.memory_space<vmem>>, vector<1x2x128xf32>
    %143 = vector.shape_cast %142 : vector<1x2x128xf32> to vector<2x128xf32>
    %144 = vector.shape_cast %141 : vector<2x128xf32> to vector<1x2x128xf32>
    tpu.vector_store %arg12[%c2_61, %c0_62, %c0_63], %144 {strides = array<i32>} : memref<32x2x128xf32, #tpu.memory_space<vmem>>, vector<1x2x128xf32>,
    %c3 = arith.constant 3 : index
    %c0_64 = arith.constant 0 : index
    %c0_65 = arith.constant 0 : index
    %145 = vector.load %arg13[%c3, %c0_64, %c0_65] : memref<32x2x96xf32, #tpu.memory_space<vmem>>, vector<1x2x96xf32>
    %146 = vector.shape_cast %145 : vector<1x2x96xf32> to vector<2x96xf32>
    %147 = arith.truncf %138 : vector<2x32xf32> to vector<2x32xbf16>
    %cst_66 = arith.constant dense<0.000000e+00> : vector<2x96xf32>
    %148 = tpu.matmul %147, %26, %cst_66 {dimension_numbers = #tpu.dot_dimension_numbers<[1], [0], [0], [1], [0, 0, 1, 1], [], []>} : vector<2x32xbf16>, vector<32x96xbf16>, vector<2x96xf32> -> vector<2x96xf32>
    %149 = vector.broadcast %27 : vector<1x96xf32> to vector<2x96xf32>
    %150 = arith.addf %148, %149 : vector<2x96xf32>
    %151 = vector.extract_strided_slice %146 {offsets = [0, 0], sizes = [2, 32], strides = [1, 1]} : vector<2x96xf32> to vector<2x32xf32>
    %152 = vector.extract_strided_slice %150 {offsets = [0, 0], sizes = [2, 32], strides = [1, 1]} : vector<2x96xf32> to vector<2x32xf32>
    %153 = arith.addf %151, %152 : vector<2x32xf32>
    %154 = arith.negf %153 : vector<2x32xf32>
    %155 = math.exp %154 : vector<2x32xf32>
    %cst_67 = arith.constant 1.000000e+00 : f32
    %156 = vector.broadcast %cst_67 : f32 to vector<2x32xf32>
    %157 = arith.addf %156, %155 : vector<2x32xf32>
    %158 = arith.divf %156, %157 : vector<2x32xf32>
    %159 = vector.extract_strided_slice %146 {offsets = [0, 32], sizes = [2, 32], strides = [1, 1]} : vector<2x96xf32> to vector<2x32xf32>
    %160 = vector.extract_strided_slice %150 {offsets = [0, 32], sizes = [2, 32], strides = [1, 1]} : vector<2x96xf32> to vector<2x32xf32>
    %161 = arith.addf %159, %160 : vector<2x32xf32>
    %162 = arith.negf %161 : vector<2x32xf32>
    %163 = math.exp %162 : vector<2x32xf32>
    %cst_68 = arith.constant 1.000000e+00 : f32
    %164 = vector.broadcast %cst_68 : f32 to vector<2x32xf32>
    %165 = arith.addf %164, %163 : vector<2x32xf32>
    %166 = arith.divf %164, %165 : vector<2x32xf32>
    %167 = vector.extract_strided_slice %146 {offsets = [0, 64], sizes = [2, 32], strides = [1, 1]} : vector<2x96xf32> to vector<2x32xf32>
    %168 = vector.extract_strided_slice %150 {offsets = [0, 64], sizes = [2, 32], strides = [1, 1]} : vector<2x96xf32> to vector<2x32xf32>
    %169 = arith.mulf %158, %168 : vector<2x32xf32>
    %170 = arith.addf %167, %169 : vector<2x32xf32>
    %171 = math.tanh %170 : vector<2x32xf32>
    %cst_69 = arith.constant 1.000000e+00 : f32
    %172 = vector.broadcast %cst_69 : f32 to vector<2x32xf32>
    %173 = arith.subf %172, %166 : vector<2x32xf32>
    %174 = arith.mulf %173, %171 : vector<2x32xf32>
    %175 = arith.mulf %166, %138 : vector<2x32xf32>
    %176 = arith.addf %174, %175 : vector<2x32xf32>
    %cst_70 = arith.constant dense<0.000000e+00> : vector<2x128xf32>
    %177 = tpu.matmul %176, %28, %cst_70 {dimension_numbers = #tpu.dot_dimension_numbers<[1], [0], [0], [1], [0, 0, 1, 1], [], []>} : vector<2x32xf32>, vector<32x128xf32>, vector<2x128xf32> -> vector<2x128xf32>
    %178 = vector.broadcast %29 : vector<1x128xf32> to vector<2x128xf32>
    %179 = arith.addf %177, %178 : vector<2x128xf32>
    %c3_71 = arith.constant 3 : index
    %c0_72 = arith.constant 0 : index
    %c0_73 = arith.constant 0 : index
    %180 = vector.load %arg12[%c3_71, %c0_72, %c0_73] : memref<32x2x128xf32, #tpu.memory_space<vmem>>, vector<1x2x128xf32>
    %181 = vector.shape_cast %180 : vector<1x2x128xf32> to vector<2x128xf32>
    %182 = vector.shape_cast %179 : vector<2x128xf32> to vector<1x2x128xf32>
    tpu.vector_store %arg12[%c3_71, %c0_72, %c0_73], %182 {strides = array<i32>} : memref<32x2x128xf32, #tpu.memory_space<vmem>>, vector<1x2x128xf32>,
    %c4 = arith.constant 4 : index
    %c0_74 = arith.constant 0 : index
    %c0_75 = arith.constant 0 : index
    %183 = vector.load %arg13[%c4, %c0_74, %c0_75] : memref<32x2x96xf32, #tpu.memory_space<vmem>>, vector<1x2x96xf32>
    %184 = vector.shape_cast %183 : vector<1x2x96xf32> to vector<2x96xf32>
    %185 = arith.truncf %176 : vector<2x32xf32> to vector<2x32xbf16>
    %cst_76 = arith.constant dense<0.000000e+00> : vector<2x96xf32>
    %186 = tpu.matmul %185, %26, %cst_76 {dimension_numbers = #tpu.dot_dimension_numbers<[1], [0], [0], [1], [0, 0, 1, 1], [], []>} : vector<2x32xbf16>, vector<32x96xbf16>, vector<2x96xf32> -> vector<2x96xf32>
    %187 = vector.broadcast %27 : vector<1x96xf32> to vector<2x96xf32>
    %188 = arith.addf %186, %187 : vector<2x96xf32>
    %189 = vector.extract_strided_slice %184 {offsets = [0, 0], sizes = [2, 32], strides = [1, 1]} : vector<2x96xf32> to vector<2x32xf32>
    %190 = vector.extract_strided_slice %188 {offsets = [0, 0], sizes = [2, 32], strides = [1, 1]} : vector<2x96xf32> to vector<2x32xf32>
    %191 = arith.addf %189, %190 : vector<2x32xf32>
    %192 = arith.negf %191 : vector<2x32xf32>
    %193 = math.exp %192 : vector<2x32xf32>
    %cst_77 = arith.constant 1.000000e+00 : f32
    %194 = vector.broadcast %cst_77 : f32 to vector<2x32xf32>
    %195 = arith.addf %194, %193 : vector<2x32xf32>
    %196 = arith.divf %194, %195 : vector<2x32xf32>
    %197 = vector.extract_strided_slice %184 {offsets = [0, 32], sizes = [2, 32], strides = [1, 1]} : vector<2x96xf32> to vector<2x32xf32>
    %198 = vector.extract_strided_slice %188 {offsets = [0, 32], sizes = [2, 32], strides = [1, 1]} : vector<2x96xf32> to vector<2x32xf32>
    %199 = arith.addf %197, %198 : vector<2x32xf32>
    %200 = arith.negf %199 : vector<2x32xf32>
    %201 = math.exp %200 : vector<2x32xf32>
    %cst_78 = arith.constant 1.000000e+00 : f32
    %202 = vector.broadcast %cst_78 : f32 to vector<2x32xf32>
    %203 = arith.addf %202, %201 : vector<2x32xf32>
    %204 = arith.divf %202, %203 : vector<2x32xf32>
    %205 = vector.extract_strided_slice %184 {offsets = [0, 64], sizes = [2, 32], strides = [1, 1]} : vector<2x96xf32> to vector<2x32xf32>
    %206 = vector.extract_strided_slice %188 {offsets = [0, 64], sizes = [2, 32], strides = [1, 1]} : vector<2x96xf32> to vector<2x32xf32>
    %207 = arith.mulf %196, %206 : vector<2x32xf32>
    %208 = arith.addf %205, %207 : vector<2x32xf32>
    %209 = math.tanh %208 : vector<2x32xf32>
    %cst_79 = arith.constant 1.000000e+00 : f32
    %210 = vector.broadcast %cst_79 : f32 to vector<2x32xf32>
    %211 = arith.subf %210, %204 : vector<2x32xf32>
    %212 = arith.mulf %211, %209 : vector<2x32xf32>
    %213 = arith.mulf %204, %176 : vector<2x32xf32>
    %214 = arith.addf %212, %213 : vector<2x32xf32>
    %cst_80 = arith.constant dense<0.000000e+00> : vector<2x128xf32>
    %215 = tpu.matmul %214, %28, %cst_80 {dimension_numbers = #tpu.dot_dimension_numbers<[1], [0], [0], [1], [0, 0, 1, 1], [], []>} : vector<2x32xf32>, vector<32x128xf32>, vector<2x128xf32> -> vector<2x128xf32>
    %216 = vector.broadcast %29 : vector<1x128xf32> to vector<2x128xf32>
    %217 = arith.addf %215, %216 : vector<2x128xf32>
    %c4_81 = arith.constant 4 : index
    %c0_82 = arith.constant 0 : index
    %c0_83 = arith.constant 0 : index
    %218 = vector.load %arg12[%c4_81, %c0_82, %c0_83] : memref<32x2x128xf32, #tpu.memory_space<vmem>>, vector<1x2x128xf32>
    %219 = vector.shape_cast %218 : vector<1x2x128xf32> to vector<2x128xf32>
    %220 = vector.shape_cast %217 : vector<2x128xf32> to vector<1x2x128xf32>
    tpu.vector_store %arg12[%c4_81, %c0_82, %c0_83], %220 {strides = array<i32>} : memref<32x2x128xf32, #tpu.memory_space<vmem>>, vector<1x2x128xf32>,
    %c5 = arith.constant 5 : index
    %c0_84 = arith.constant 0 : index
    %c0_85 = arith.constant 0 : index
    %221 = vector.load %arg13[%c5, %c0_84, %c0_85] : memref<32x2x96xf32, #tpu.memory_space<vmem>>, vector<1x2x96xf32>
    %222 = vector.shape_cast %221 : vector<1x2x96xf32> to vector<2x96xf32>
    %223 = arith.truncf %214 : vector<2x32xf32> to vector<2x32xbf16>
    %cst_86 = arith.constant dense<0.000000e+00> : vector<2x96xf32>
    %224 = tpu.matmul %223, %26, %cst_86 {dimension_numbers = #tpu.dot_dimension_numbers<[1], [0], [0], [1], [0, 0, 1, 1], [], []>} : vector<2x32xbf16>, vector<32x96xbf16>, vector<2x96xf32> -> vector<2x96xf32>
    %225 = vector.broadcast %27 : vector<1x96xf32> to vector<2x96xf32>
    %226 = arith.addf %224, %225 : vector<2x96xf32>
    %227 = vector.extract_strided_slice %222 {offsets = [0, 0], sizes = [2, 32], strides = [1, 1]} : vector<2x96xf32> to vector<2x32xf32>
    %228 = vector.extract_strided_slice %226 {offsets = [0, 0], sizes = [2, 32], strides = [1, 1]} : vector<2x96xf32> to vector<2x32xf32>
    %229 = arith.addf %227, %228 : vector<2x32xf32>
    %230 = arith.negf %229 : vector<2x32xf32>
    %231 = math.exp %230 : vector<2x32xf32>
    %cst_87 = arith.constant 1.000000e+00 : f32
    %232 = vector.broadcast %cst_87 : f32 to vector<2x32xf32>
    %233 = arith.addf %232, %231 : vector<2x32xf32>
    %234 = arith.divf %232, %233 : vector<2x32xf32>
    %235 = vector.extract_strided_slice %222 {offsets = [0, 32], sizes = [2, 32], strides = [1, 1]} : vector<2x96xf32> to vector<2x32xf32>
    %236 = vector.extract_strided_slice %226 {offsets = [0, 32], sizes = [2, 32], strides = [1, 1]} : vector<2x96xf32> to vector<2x32xf32>
    %237 = arith.addf %235, %236 : vector<2x32xf32>
    %238 = arith.negf %237 : vector<2x32xf32>
    %239 = math.exp %238 : vector<2x32xf32>
    %cst_88 = arith.constant 1.000000e+00 : f32
    %240 = vector.broadcast %cst_88 : f32 to vector<2x32xf32>
    %241 = arith.addf %240, %239 : vector<2x32xf32>
    %242 = arith.divf %240, %241 : vector<2x32xf32>
    %243 = vector.extract_strided_slice %222 {offsets = [0, 64], sizes = [2, 32], strides = [1, 1]} : vector<2x96xf32> to vector<2x32xf32>
    %244 = vector.extract_strided_slice %226 {offsets = [0, 64], sizes = [2, 32], strides = [1, 1]} : vector<2x96xf32> to vector<2x32xf32>
    %245 = arith.mulf %234, %244 : vector<2x32xf32>
    %246 = arith.addf %243, %245 : vector<2x32xf32>
    %247 = math.tanh %246 : vector<2x32xf32>
    %cst_89 = arith.constant 1.000000e+00 : f32
    %248 = vector.broadcast %cst_89 : f32 to vector<2x32xf32>
    %249 = arith.subf %248, %242 : vector<2x32xf32>
    %250 = arith.mulf %249, %247 : vector<2x32xf32>
    %251 = arith.mulf %242, %214 : vector<2x32xf32>
    %252 = arith.addf %250, %251 : vector<2x32xf32>
    %cst_90 = arith.constant dense<0.000000e+00> : vector<2x128xf32>
    %253 = tpu.matmul %252, %28, %cst_90 {dimension_numbers = #tpu.dot_dimension_numbers<[1], [0], [0], [1], [0, 0, 1, 1], [], []>} : vector<2x32xf32>, vector<32x128xf32>, vector<2x128xf32> -> vector<2x128xf32>
    %254 = vector.broadcast %29 : vector<1x128xf32> to vector<2x128xf32>
    %255 = arith.addf %253, %254 : vector<2x128xf32>
    %c5_91 = arith.constant 5 : index
    %c0_92 = arith.constant 0 : index
    %c0_93 = arith.constant 0 : index
    %256 = vector.load %arg12[%c5_91, %c0_92, %c0_93] : memref<32x2x128xf32, #tpu.memory_space<vmem>>, vector<1x2x128xf32>
    %257 = vector.shape_cast %256 : vector<1x2x128xf32> to vector<2x128xf32>
    %258 = vector.shape_cast %255 : vector<2x128xf32> to vector<1x2x128xf32>
    tpu.vector_store %arg12[%c5_91, %c0_92, %c0_93], %258 {strides = array<i32>} : memref<32x2x128xf32, #tpu.memory_space<vmem>>, vector<1x2x128xf32>,
    %c6 = arith.constant 6 : index
    %c0_94 = arith.constant 0 : index
    %c0_95 = arith.constant 0 : index
    %259 = vector.load %arg13[%c6, %c0_94, %c0_95] : memref<32x2x96xf32, #tpu.memory_space<vmem>>, vector<1x2x96xf32>
    %260 = vector.shape_cast %259 : vector<1x2x96xf32> to vector<2x96xf32>
    %261 = arith.truncf %252 : vector<2x32xf32> to vector<2x32xbf16>
    %cst_96 = arith.constant dense<0.000000e+00> : vector<2x96xf32>
    %262 = tpu.matmul %261, %26, %cst_96 {dimension_numbers = #tpu.dot_dimension_numbers<[1], [0], [0], [1], [0, 0, 1, 1], [], []>} : vector<2x32xbf16>, vector<32x96xbf16>, vector<2x96xf32> -> vector<2x96xf32>
    %263 = vector.broadcast %27 : vector<1x96xf32> to vector<2x96xf32>
    %264 = arith.addf %262, %263 : vector<2x96xf32>
    %265 = vector.extract_strided_slice %260 {offsets = [0, 0], sizes = [2, 32], strides = [1, 1]} : vector<2x96xf32> to vector<2x32xf32>
    %266 = vector.extract_strided_slice %264 {offsets = [0, 0], sizes = [2, 32], strides = [1, 1]} : vector<2x96xf32> to vector<2x32xf32>
    %267 = arith.addf %265, %266 : vector<2x32xf32>
    %268 = arith.negf %267 : vector<2x32xf32>
    %269 = math.exp %268 : vector<2x32xf32>
    %cst_97 = arith.constant 1.000000e+00 : f32
    %270 = vector.broadcast %cst_97 : f32 to vector<2x32xf32>
    %271 = arith.addf %270, %269 : vector<2x32xf32>
    %272 = arith.divf %270, %271 : vector<2x32xf32>
    %273 = vector.extract_strided_slice %260 {offsets = [0, 32], sizes = [2, 32], strides = [1, 1]} : vector<2x96xf32> to vector<2x32xf32>
    %274 = vector.extract_strided_slice %264 {offsets = [0, 32], sizes = [2, 32], strides = [1, 1]} : vector<2x96xf32> to vector<2x32xf32>
    %275 = arith.addf %273, %274 : vector<2x32xf32>
    %276 = arith.negf %275 : vector<2x32xf32>
    %277 = math.exp %276 : vector<2x32xf32>
    %cst_98 = arith.constant 1.000000e+00 : f32
    %278 = vector.broadcast %cst_98 : f32 to vector<2x32xf32>
    %279 = arith.addf %278, %277 : vector<2x32xf32>
    %280 = arith.divf %278, %279 : vector<2x32xf32>
    %281 = vector.extract_strided_slice %260 {offsets = [0, 64], sizes = [2, 32], strides = [1, 1]} : vector<2x96xf32> to vector<2x32xf32>
    %282 = vector.extract_strided_slice %264 {offsets = [0, 64], sizes = [2, 32], strides = [1, 1]} : vector<2x96xf32> to vector<2x32xf32>
    %283 = arith.mulf %272, %282 : vector<2x32xf32>
    %284 = arith.addf %281, %283 : vector<2x32xf32>
    %285 = math.tanh %284 : vector<2x32xf32>
    %cst_99 = arith.constant 1.000000e+00 : f32
    %286 = vector.broadcast %cst_99 : f32 to vector<2x32xf32>
    %287 = arith.subf %286, %280 : vector<2x32xf32>
    %288 = arith.mulf %287, %285 : vector<2x32xf32>
    %289 = arith.mulf %280, %252 : vector<2x32xf32>
    %290 = arith.addf %288, %289 : vector<2x32xf32>
    %cst_100 = arith.constant dense<0.000000e+00> : vector<2x128xf32>
    %291 = tpu.matmul %290, %28, %cst_100 {dimension_numbers = #tpu.dot_dimension_numbers<[1], [0], [0], [1], [0, 0, 1, 1], [], []>} : vector<2x32xf32>, vector<32x128xf32>, vector<2x128xf32> -> vector<2x128xf32>
    %292 = vector.broadcast %29 : vector<1x128xf32> to vector<2x128xf32>
    %293 = arith.addf %291, %292 : vector<2x128xf32>
    %c6_101 = arith.constant 6 : index
    %c0_102 = arith.constant 0 : index
    %c0_103 = arith.constant 0 : index
    %294 = vector.load %arg12[%c6_101, %c0_102, %c0_103] : memref<32x2x128xf32, #tpu.memory_space<vmem>>, vector<1x2x128xf32>
    %295 = vector.shape_cast %294 : vector<1x2x128xf32> to vector<2x128xf32>
    %296 = vector.shape_cast %293 : vector<2x128xf32> to vector<1x2x128xf32>
    tpu.vector_store %arg12[%c6_101, %c0_102, %c0_103], %296 {strides = array<i32>} : memref<32x2x128xf32, #tpu.memory_space<vmem>>, vector<1x2x128xf32>,
    %c7 = arith.constant 7 : index
    %c0_104 = arith.constant 0 : index
    %c0_105 = arith.constant 0 : index
    %297 = vector.load %arg13[%c7, %c0_104, %c0_105] : memref<32x2x96xf32, #tpu.memory_space<vmem>>, vector<1x2x96xf32>
    %298 = vector.shape_cast %297 : vector<1x2x96xf32> to vector<2x96xf32>
    %299 = arith.truncf %290 : vector<2x32xf32> to vector<2x32xbf16>
    %cst_106 = arith.constant dense<0.000000e+00> : vector<2x96xf32>
    %300 = tpu.matmul %299, %26, %cst_106 {dimension_numbers = #tpu.dot_dimension_numbers<[1], [0], [0], [1], [0, 0, 1, 1], [], []>} : vector<2x32xbf16>, vector<32x96xbf16>, vector<2x96xf32> -> vector<2x96xf32>
    %301 = vector.broadcast %27 : vector<1x96xf32> to vector<2x96xf32>
    %302 = arith.addf %300, %301 : vector<2x96xf32>
    %303 = vector.extract_strided_slice %298 {offsets = [0, 0], sizes = [2, 32], strides = [1, 1]} : vector<2x96xf32> to vector<2x32xf32>
    %304 = vector.extract_strided_slice %302 {offsets = [0, 0], sizes = [2, 32], strides = [1, 1]} : vector<2x96xf32> to vector<2x32xf32>
    %305 = arith.addf %303, %304 : vector<2x32xf32>
    %306 = arith.negf %305 : vector<2x32xf32>
    %307 = math.exp %306 : vector<2x32xf32>
    %cst_107 = arith.constant 1.000000e+00 : f32
    %308 = vector.broadcast %cst_107 : f32 to vector<2x32xf32>
    %309 = arith.addf %308, %307 : vector<2x32xf32>
    %310 = arith.divf %308, %309 : vector<2x32xf32>
    %311 = vector.extract_strided_slice %298 {offsets = [0, 32], sizes = [2, 32], strides = [1, 1]} : vector<2x96xf32> to vector<2x32xf32>
    %312 = vector.extract_strided_slice %302 {offsets = [0, 32], sizes = [2, 32], strides = [1, 1]} : vector<2x96xf32> to vector<2x32xf32>
    %313 = arith.addf %311, %312 : vector<2x32xf32>
    %314 = arith.negf %313 : vector<2x32xf32>
    %315 = math.exp %314 : vector<2x32xf32>
    %cst_108 = arith.constant 1.000000e+00 : f32
    %316 = vector.broadcast %cst_108 : f32 to vector<2x32xf32>
    %317 = arith.addf %316, %315 : vector<2x32xf32>
    %318 = arith.divf %316, %317 : vector<2x32xf32>
    %319 = vector.extract_strided_slice %298 {offsets = [0, 64], sizes = [2, 32], strides = [1, 1]} : vector<2x96xf32> to vector<2x32xf32>
    %320 = vector.extract_strided_slice %302 {offsets = [0, 64], sizes = [2, 32], strides = [1, 1]} : vector<2x96xf32> to vector<2x32xf32>
    %321 = arith.mulf %310, %320 : vector<2x32xf32>
    %322 = arith.addf %319, %321 : vector<2x32xf32>
    %323 = math.tanh %322 : vector<2x32xf32>
    %cst_109 = arith.constant 1.000000e+00 : f32
    %324 = vector.broadcast %cst_109 : f32 to vector<2x32xf32>
    %325 = arith.subf %324, %318 : vector<2x32xf32>
    %326 = arith.mulf %325, %323 : vector<2x32xf32>
    %327 = arith.mulf %318, %290 : vector<2x32xf32>
    %328 = arith.addf %326, %327 : vector<2x32xf32>
    %cst_110 = arith.constant dense<0.000000e+00> : vector<2x128xf32>
    %329 = tpu.matmul %328, %28, %cst_110 {dimension_numbers = #tpu.dot_dimension_numbers<[1], [0], [0], [1], [0, 0, 1, 1], [], []>} : vector<2x32xf32>, vector<32x128xf32>, vector<2x128xf32> -> vector<2x128xf32>
    %330 = vector.broadcast %29 : vector<1x128xf32> to vector<2x128xf32>
    %331 = arith.addf %329, %330 : vector<2x128xf32>
    %c7_111 = arith.constant 7 : index
    %c0_112 = arith.constant 0 : index
    %c0_113 = arith.constant 0 : index
    %332 = vector.load %arg12[%c7_111, %c0_112, %c0_113] : memref<32x2x128xf32, #tpu.memory_space<vmem>>, vector<1x2x128xf32>
    %333 = vector.shape_cast %332 : vector<1x2x128xf32> to vector<2x128xf32>
    %334 = vector.shape_cast %331 : vector<2x128xf32> to vector<1x2x128xf32>
    tpu.vector_store %arg12[%c7_111, %c0_112, %c0_113], %334 {strides = array<i32>} : memref<32x2x128xf32, #tpu.memory_space<vmem>>, vector<1x2x128xf32>,
    %c8 = arith.constant 8 : index
    %c0_114 = arith.constant 0 : index
    %c0_115 = arith.constant 0 : index
    %335 = vector.load %arg13[%c8, %c0_114, %c0_115] : memref<32x2x96xf32, #tpu.memory_space<vmem>>, vector<1x2x96xf32>
    %336 = vector.shape_cast %335 : vector<1x2x96xf32> to vector<2x96xf32>
    %337 = arith.truncf %328 : vector<2x32xf32> to vector<2x32xbf16>
    %cst_116 = arith.constant dense<0.000000e+00> : vector<2x96xf32>
    %338 = tpu.matmul %337, %26, %cst_116 {dimension_numbers = #tpu.dot_dimension_numbers<[1], [0], [0], [1], [0, 0, 1, 1], [], []>} : vector<2x32xbf16>, vector<32x96xbf16>, vector<2x96xf32> -> vector<2x96xf32>
    %339 = vector.broadcast %27 : vector<1x96xf32> to vector<2x96xf32>
    %340 = arith.addf %338, %339 : vector<2x96xf32>
    %341 = vector.extract_strided_slice %336 {offsets = [0, 0], sizes = [2, 32], strides = [1, 1]} : vector<2x96xf32> to vector<2x32xf32>
    %342 = vector.extract_strided_slice %340 {offsets = [0, 0], sizes = [2, 32], strides = [1, 1]} : vector<2x96xf32> to vector<2x32xf32>
    %343 = arith.addf %341, %342 : vector<2x32xf32>
    %344 = arith.negf %343 : vector<2x32xf32>
    %345 = math.exp %344 : vector<2x32xf32>
    %cst_117 = arith.constant 1.000000e+00 : f32
    %346 = vector.broadcast %cst_117 : f32 to vector<2x32xf32>
    %347 = arith.addf %346, %345 : vector<2x32xf32>
    %348 = arith.divf %346, %347 : vector<2x32xf32>
    %349 = vector.extract_strided_slice %336 {offsets = [0, 32], sizes = [2, 32], strides = [1, 1]} : vector<2x96xf32> to vector<2x32xf32>
    %350 = vector.extract_strided_slice %340 {offsets = [0, 32], sizes = [2, 32], strides = [1, 1]} : vector<2x96xf32> to vector<2x32xf32>
    %351 = arith.addf %349, %350 : vector<2x32xf32>
    %352 = arith.negf %351 : vector<2x32xf32>
    %353 = math.exp %352 : vector<2x32xf32>
    %cst_118 = arith.constant 1.000000e+00 : f32
    %354 = vector.broadcast %cst_118 : f32 to vector<2x32xf32>
    %355 = arith.addf %354, %353 : vector<2x32xf32>
    %356 = arith.divf %354, %355 : vector<2x32xf32>
    %357 = vector.extract_strided_slice %336 {offsets = [0, 64], sizes = [2, 32], strides = [1, 1]} : vector<2x96xf32> to vector<2x32xf32>
    %358 = vector.extract_strided_slice %340 {offsets = [0, 64], sizes = [2, 32], strides = [1, 1]} : vector<2x96xf32> to vector<2x32xf32>
    %359 = arith.mulf %348, %358 : vector<2x32xf32>
    %360 = arith.addf %357, %359 : vector<2x32xf32>
    %361 = math.tanh %360 : vector<2x32xf32>
    %cst_119 = arith.constant 1.000000e+00 : f32
    %362 = vector.broadcast %cst_119 : f32 to vector<2x32xf32>
    %363 = arith.subf %362, %356 : vector<2x32xf32>
    %364 = arith.mulf %363, %361 : vector<2x32xf32>
    %365 = arith.mulf %356, %328 : vector<2x32xf32>
    %366 = arith.addf %364, %365 : vector<2x32xf32>
    %cst_120 = arith.constant dense<0.000000e+00> : vector<2x128xf32>
    %367 = tpu.matmul %366, %28, %cst_120 {dimension_numbers = #tpu.dot_dimension_numbers<[1], [0], [0], [1], [0, 0, 1, 1], [], []>} : vector<2x32xf32>, vector<32x128xf32>, vector<2x128xf32> -> vector<2x128xf32>
    %368 = vector.broadcast %29 : vector<1x128xf32> to vector<2x128xf32>
    %369 = arith.addf %367, %368 : vector<2x128xf32>
    %c8_121 = arith.constant 8 : index
    %c0_122 = arith.constant 0 : index
    %c0_123 = arith.constant 0 : index
    %370 = vector.load %arg12[%c8_121, %c0_122, %c0_123] : memref<32x2x128xf32, #tpu.memory_space<vmem>>, vector<1x2x128xf32>
    %371 = vector.shape_cast %370 : vector<1x2x128xf32> to vector<2x128xf32>
    %372 = vector.shape_cast %369 : vector<2x128xf32> to vector<1x2x128xf32>
    tpu.vector_store %arg12[%c8_121, %c0_122, %c0_123], %372 {strides = array<i32>} : memref<32x2x128xf32, #tpu.memory_space<vmem>>, vector<1x2x128xf32>,
    %c9 = arith.constant 9 : index
    %c0_124 = arith.constant 0 : index
    %c0_125 = arith.constant 0 : index
    %373 = vector.load %arg13[%c9, %c0_124, %c0_125] : memref<32x2x96xf32, #tpu.memory_space<vmem>>, vector<1x2x96xf32>
    %374 = vector.shape_cast %373 : vector<1x2x96xf32> to vector<2x96xf32>
    %375 = arith.truncf %366 : vector<2x32xf32> to vector<2x32xbf16>
    %cst_126 = arith.constant dense<0.000000e+00> : vector<2x96xf32>
    %376 = tpu.matmul %375, %26, %cst_126 {dimension_numbers = #tpu.dot_dimension_numbers<[1], [0], [0], [1], [0, 0, 1, 1], [], []>} : vector<2x32xbf16>, vector<32x96xbf16>, vector<2x96xf32> -> vector<2x96xf32>
    %377 = vector.broadcast %27 : vector<1x96xf32> to vector<2x96xf32>
    %378 = arith.addf %376, %377 : vector<2x96xf32>
    %379 = vector.extract_strided_slice %374 {offsets = [0, 0], sizes = [2, 32], strides = [1, 1]} : vector<2x96xf32> to vector<2x32xf32>
    %380 = vector.extract_strided_slice %378 {offsets = [0, 0], sizes = [2, 32], strides = [1, 1]} : vector<2x96xf32> to vector<2x32xf32>
    %381 = arith.addf %379, %380 : vector<2x32xf32>
    %382 = arith.negf %381 : vector<2x32xf32>
    %383 = math.exp %382 : vector<2x32xf32>
    %cst_127 = arith.constant 1.000000e+00 : f32
    %384 = vector.broadcast %cst_127 : f32 to vector<2x32xf32>
    %385 = arith.addf %384, %383 : vector<2x32xf32>
    %386 = arith.divf %384, %385 : vector<2x32xf32>
    %387 = vector.extract_strided_slice %374 {offsets = [0, 32], sizes = [2, 32], strides = [1, 1]} : vector<2x96xf32> to vector<2x32xf32>
    %388 = vector.extract_strided_slice %378 {offsets = [0, 32], sizes = [2, 32], strides = [1, 1]} : vector<2x96xf32> to vector<2x32xf32>
    %389 = arith.addf %387, %388 : vector<2x32xf32>
    %390 = arith.negf %389 : vector<2x32xf32>
    %391 = math.exp %390 : vector<2x32xf32>
    %cst_128 = arith.constant 1.000000e+00 : f32
    %392 = vector.broadcast %cst_128 : f32 to vector<2x32xf32>
    %393 = arith.addf %392, %391 : vector<2x32xf32>
    %394 = arith.divf %392, %393 : vector<2x32xf32>
    %395 = vector.extract_strided_slice %374 {offsets = [0, 64], sizes = [2, 32], strides = [1, 1]} : vector<2x96xf32> to vector<2x32xf32>
    %396 = vector.extract_strided_slice %378 {offsets = [0, 64], sizes = [2, 32], strides = [1, 1]} : vector<2x96xf32> to vector<2x32xf32>
    %397 = arith.mulf %386, %396 : vector<2x32xf32>
    %398 = arith.addf %395, %397 : vector<2x32xf32>
    %399 = math.tanh %398 : vector<2x32xf32>
    %cst_129 = arith.constant 1.000000e+00 : f32
    %400 = vector.broadcast %cst_129 : f32 to vector<2x32xf32>
    %401 = arith.subf %400, %394 : vector<2x32xf32>
    %402 = arith.mulf %401, %399 : vector<2x32xf32>
    %403 = arith.mulf %394, %366 : vector<2x32xf32>
    %404 = arith.addf %402, %403 : vector<2x32xf32>
    %cst_130 = arith.constant dense<0.000000e+00> : vector<2x128xf32>
    %405 = tpu.matmul %404, %28, %cst_130 {dimension_numbers = #tpu.dot_dimension_numbers<[1], [0], [0], [1], [0, 0, 1, 1], [], []>} : vector<2x32xf32>, vector<32x128xf32>, vector<2x128xf32> -> vector<2x128xf32>
    %406 = vector.broadcast %29 : vector<1x128xf32> to vector<2x128xf32>
    %407 = arith.addf %405, %406 : vector<2x128xf32>
    %c9_131 = arith.constant 9 : index
    %c0_132 = arith.constant 0 : index
    %c0_133 = arith.constant 0 : index
    %408 = vector.load %arg12[%c9_131, %c0_132, %c0_133] : memref<32x2x128xf32, #tpu.memory_space<vmem>>, vector<1x2x128xf32>
    %409 = vector.shape_cast %408 : vector<1x2x128xf32> to vector<2x128xf32>
    %410 = vector.shape_cast %407 : vector<2x128xf32> to vector<1x2x128xf32>
    tpu.vector_store %arg12[%c9_131, %c0_132, %c0_133], %410 {strides = array<i32>} : memref<32x2x128xf32, #tpu.memory_space<vmem>>, vector<1x2x128xf32>,
    %c10 = arith.constant 10 : index
    %c0_134 = arith.constant 0 : index
    %c0_135 = arith.constant 0 : index
    %411 = vector.load %arg13[%c10, %c0_134, %c0_135] : memref<32x2x96xf32, #tpu.memory_space<vmem>>, vector<1x2x96xf32>
    %412 = vector.shape_cast %411 : vector<1x2x96xf32> to vector<2x96xf32>
    %413 = arith.truncf %404 : vector<2x32xf32> to vector<2x32xbf16>
    %cst_136 = arith.constant dense<0.000000e+00> : vector<2x96xf32>
    %414 = tpu.matmul %413, %26, %cst_136 {dimension_numbers = #tpu.dot_dimension_numbers<[1], [0], [0], [1], [0, 0, 1, 1], [], []>} : vector<2x32xbf16>, vector<32x96xbf16>, vector<2x96xf32> -> vector<2x96xf32>
    %415 = vector.broadcast %27 : vector<1x96xf32> to vector<2x96xf32>
    %416 = arith.addf %414, %415 : vector<2x96xf32>
    %417 = vector.extract_strided_slice %412 {offsets = [0, 0], sizes = [2, 32], strides = [1, 1]} : vector<2x96xf32> to vector<2x32xf32>
    %418 = vector.extract_strided_slice %416 {offsets = [0, 0], sizes = [2, 32], strides = [1, 1]} : vector<2x96xf32> to vector<2x32xf32>
    %419 = arith.addf %417, %418 : vector<2x32xf32>
    %420 = arith.negf %419 : vector<2x32xf32>
    %421 = math.exp %420 : vector<2x32xf32>
    %cst_137 = arith.constant 1.000000e+00 : f32
    %422 = vector.broadcast %cst_137 : f32 to vector<2x32xf32>
    %423 = arith.addf %422, %421 : vector<2x32xf32>
    %424 = arith.divf %422, %423 : vector<2x32xf32>
    %425 = vector.extract_strided_slice %412 {offsets = [0, 32], sizes = [2, 32], strides = [1, 1]} : vector<2x96xf32> to vector<2x32xf32>
    %426 = vector.extract_strided_slice %416 {offsets = [0, 32], sizes = [2, 32], strides = [1, 1]} : vector<2x96xf32> to vector<2x32xf32>
    %427 = arith.addf %425, %426 : vector<2x32xf32>
    %428 = arith.negf %427 : vector<2x32xf32>
    %429 = math.exp %428 : vector<2x32xf32>
    %cst_138 = arith.constant 1.000000e+00 : f32
    %430 = vector.broadcast %cst_138 : f32 to vector<2x32xf32>
    %431 = arith.addf %430, %429 : vector<2x32xf32>
    %432 = arith.divf %430, %431 : vector<2x32xf32>
    %433 = vector.extract_strided_slice %412 {offsets = [0, 64], sizes = [2, 32], strides = [1, 1]} : vector<2x96xf32> to vector<2x32xf32>
    %434 = vector.extract_strided_slice %416 {offsets = [0, 64], sizes = [2, 32], strides = [1, 1]} : vector<2x96xf32> to vector<2x32xf32>
    %435 = arith.mulf %424, %434 : vector<2x32xf32>
    %436 = arith.addf %433, %435 : vector<2x32xf32>
    %437 = math.tanh %436 : vector<2x32xf32>
    %cst_139 = arith.constant 1.000000e+00 : f32
    %438 = vector.broadcast %cst_139 : f32 to vector<2x32xf32>
    %439 = arith.subf %438, %432 : vector<2x32xf32>
    %440 = arith.mulf %439, %437 : vector<2x32xf32>
    %441 = arith.mulf %432, %404 : vector<2x32xf32>
    %442 = arith.addf %440, %441 : vector<2x32xf32>
    %cst_140 = arith.constant dense<0.000000e+00> : vector<2x128xf32>
    %443 = tpu.matmul %442, %28, %cst_140 {dimension_numbers = #tpu.dot_dimension_numbers<[1], [0], [0], [1], [0, 0, 1, 1], [], []>} : vector<2x32xf32>, vector<32x128xf32>, vector<2x128xf32> -> vector<2x128xf32>
    %444 = vector.broadcast %29 : vector<1x128xf32> to vector<2x128xf32>
    %445 = arith.addf %443, %444 : vector<2x128xf32>
    %c10_141 = arith.constant 10 : index
    %c0_142 = arith.constant 0 : index
    %c0_143 = arith.constant 0 : index
    %446 = vector.load %arg12[%c10_141, %c0_142, %c0_143] : memref<32x2x128xf32, #tpu.memory_space<vmem>>, vector<1x2x128xf32>
    %447 = vector.shape_cast %446 : vector<1x2x128xf32> to vector<2x128xf32>
    %448 = vector.shape_cast %445 : vector<2x128xf32> to vector<1x2x128xf32>
    tpu.vector_store %arg12[%c10_141, %c0_142, %c0_143], %448 {strides = array<i32>} : memref<32x2x128xf32, #tpu.memory_space<vmem>>, vector<1x2x128xf32>,
    %c11 = arith.constant 11 : index
    %c0_144 = arith.constant 0 : index
    %c0_145 = arith.constant 0 : index
    %449 = vector.load %arg13[%c11, %c0_144, %c0_145] : memref<32x2x96xf32, #tpu.memory_space<vmem>>, vector<1x2x96xf32>
    %450 = vector.shape_cast %449 : vector<1x2x96xf32> to vector<2x96xf32>
    %451 = arith.truncf %442 : vector<2x32xf32> to vector<2x32xbf16>
    %cst_146 = arith.constant dense<0.000000e+00> : vector<2x96xf32>
    %452 = tpu.matmul %451, %26, %cst_146 {dimension_numbers = #tpu.dot_dimension_numbers<[1], [0], [0], [1], [0, 0, 1, 1], [], []>} : vector<2x32xbf16>, vector<32x96xbf16>, vector<2x96xf32> -> vector<2x96xf32>
    %453 = vector.broadcast %27 : vector<1x96xf32> to vector<2x96xf32>
    %454 = arith.addf %452, %453 : vector<2x96xf32>
    %455 = vector.extract_strided_slice %450 {offsets = [0, 0], sizes = [2, 32], strides = [1, 1]} : vector<2x96xf32> to vector<2x32xf32>
    %456 = vector.extract_strided_slice %454 {offsets = [0, 0], sizes = [2, 32], strides = [1, 1]} : vector<2x96xf32> to vector<2x32xf32>
    %457 = arith.addf %455, %456 : vector<2x32xf32>
    %458 = arith.negf %457 : vector<2x32xf32>
    %459 = math.exp %458 : vector<2x32xf32>
    %cst_147 = arith.constant 1.000000e+00 : f32
    %460 = vector.broadcast %cst_147 : f32 to vector<2x32xf32>
    %461 = arith.addf %460, %459 : vector<2x32xf32>
    %462 = arith.divf %460, %461 : vector<2x32xf32>
    %463 = vector.extract_strided_slice %450 {offsets = [0, 32], sizes = [2, 32], strides = [1, 1]} : vector<2x96xf32> to vector<2x32xf32>
    %464 = vector.extract_strided_slice %454 {offsets = [0, 32], sizes = [2, 32], strides = [1, 1]} : vector<2x96xf32> to vector<2x32xf32>
    %465 = arith.addf %463, %464 : vector<2x32xf32>
    %466 = arith.negf %465 : vector<2x32xf32>
    %467 = math.exp %466 : vector<2x32xf32>
    %cst_148 = arith.constant 1.000000e+00 : f32
    %468 = vector.broadcast %cst_148 : f32 to vector<2x32xf32>
    %469 = arith.addf %468, %467 : vector<2x32xf32>
    %470 = arith.divf %468, %469 : vector<2x32xf32>
    %471 = vector.extract_strided_slice %450 {offsets = [0, 64], sizes = [2, 32], strides = [1, 1]} : vector<2x96xf32> to vector<2x32xf32>
    %472 = vector.extract_strided_slice %454 {offsets = [0, 64], sizes = [2, 32], strides = [1, 1]} : vector<2x96xf32> to vector<2x32xf32>
    %473 = arith.mulf %462, %472 : vector<2x32xf32>
    %474 = arith.addf %471, %473 : vector<2x32xf32>
    %475 = math.tanh %474 : vector<2x32xf32>
    %cst_149 = arith.constant 1.000000e+00 : f32
    %476 = vector.broadcast %cst_149 : f32 to vector<2x32xf32>
    %477 = arith.subf %476, %470 : vector<2x32xf32>
    %478 = arith.mulf %477, %475 : vector<2x32xf32>
    %479 = arith.mulf %470, %442 : vector<2x32xf32>
    %480 = arith.addf %478, %479 : vector<2x32xf32>
    %cst_150 = arith.constant dense<0.000000e+00> : vector<2x128xf32>
    %481 = tpu.matmul %480, %28, %cst_150 {dimension_numbers = #tpu.dot_dimension_numbers<[1], [0], [0], [1], [0, 0, 1, 1], [], []>} : vector<2x32xf32>, vector<32x128xf32>, vector<2x128xf32> -> vector<2x128xf32>
    %482 = vector.broadcast %29 : vector<1x128xf32> to vector<2x128xf32>
    %483 = arith.addf %481, %482 : vector<2x128xf32>
    %c11_151 = arith.constant 11 : index
    %c0_152 = arith.constant 0 : index
    %c0_153 = arith.constant 0 : index
    %484 = vector.load %arg12[%c11_151, %c0_152, %c0_153] : memref<32x2x128xf32, #tpu.memory_space<vmem>>, vector<1x2x128xf32>
    %485 = vector.shape_cast %484 : vector<1x2x128xf32> to vector<2x128xf32>
    %486 = vector.shape_cast %483 : vector<2x128xf32> to vector<1x2x128xf32>
    tpu.vector_store %arg12[%c11_151, %c0_152, %c0_153], %486 {strides = array<i32>} : memref<32x2x128xf32, #tpu.memory_space<vmem>>, vector<1x2x128xf32>,
    %c12 = arith.constant 12 : index
    %c0_154 = arith.constant 0 : index
    %c0_155 = arith.constant 0 : index
    %487 = vector.load %arg13[%c12, %c0_154, %c0_155] : memref<32x2x96xf32, #tpu.memory_space<vmem>>, vector<1x2x96xf32>
    %488 = vector.shape_cast %487 : vector<1x2x96xf32> to vector<2x96xf32>
    %489 = arith.truncf %480 : vector<2x32xf32> to vector<2x32xbf16>
    %cst_156 = arith.constant dense<0.000000e+00> : vector<2x96xf32>
    %490 = tpu.matmul %489, %26, %cst_156 {dimension_numbers = #tpu.dot_dimension_numbers<[1], [0], [0], [1], [0, 0, 1, 1], [], []>} : vector<2x32xbf16>, vector<32x96xbf16>, vector<2x96xf32> -> vector<2x96xf32>
    %491 = vector.broadcast %27 : vector<1x96xf32> to vector<2x96xf32>
    %492 = arith.addf %490, %491 : vector<2x96xf32>
    %493 = vector.extract_strided_slice %488 {offsets = [0, 0], sizes = [2, 32], strides = [1, 1]} : vector<2x96xf32> to vector<2x32xf32>
    %494 = vector.extract_strided_slice %492 {offsets = [0, 0], sizes = [2, 32], strides = [1, 1]} : vector<2x96xf32> to vector<2x32xf32>
    %495 = arith.addf %493, %494 : vector<2x32xf32>
    %496 = arith.negf %495 : vector<2x32xf32>
    %497 = math.exp %496 : vector<2x32xf32>
    %cst_157 = arith.constant 1.000000e+00 : f32
    %498 = vector.broadcast %cst_157 : f32 to vector<2x32xf32>
    %499 = arith.addf %498, %497 : vector<2x32xf32>
    %500 = arith.divf %498, %499 : vector<2x32xf32>
    %501 = vector.extract_strided_slice %488 {offsets = [0, 32], sizes = [2, 32], strides = [1, 1]} : vector<2x96xf32> to vector<2x32xf32>
    %502 = vector.extract_strided_slice %492 {offsets = [0, 32], sizes = [2, 32], strides = [1, 1]} : vector<2x96xf32> to vector<2x32xf32>
    %503 = arith.addf %501, %502 : vector<2x32xf32>
    %504 = arith.negf %503 : vector<2x32xf32>
    %505 = math.exp %504 : vector<2x32xf32>
    %cst_158 = arith.constant 1.000000e+00 : f32
    %506 = vector.broadcast %cst_158 : f32 to vector<2x32xf32>
    %507 = arith.addf %506, %505 : vector<2x32xf32>
    %508 = arith.divf %506, %507 : vector<2x32xf32>
    %509 = vector.extract_strided_slice %488 {offsets = [0, 64], sizes = [2, 32], strides = [1, 1]} : vector<2x96xf32> to vector<2x32xf32>
    %510 = vector.extract_strided_slice %492 {offsets = [0, 64], sizes = [2, 32], strides = [1, 1]} : vector<2x96xf32> to vector<2x32xf32>
    %511 = arith.mulf %500, %510 : vector<2x32xf32>
    %512 = arith.addf %509, %511 : vector<2x32xf32>
    %513 = math.tanh %512 : vector<2x32xf32>
    %cst_159 = arith.constant 1.000000e+00 : f32
    %514 = vector.broadcast %cst_159 : f32 to vector<2x32xf32>
    %515 = arith.subf %514, %508 : vector<2x32xf32>
    %516 = arith.mulf %515, %513 : vector<2x32xf32>
    %517 = arith.mulf %508, %480 : vector<2x32xf32>
    %518 = arith.addf %516, %517 : vector<2x32xf32>
    %cst_160 = arith.constant dense<0.000000e+00> : vector<2x128xf32>
    %519 = tpu.matmul %518, %28, %cst_160 {dimension_numbers = #tpu.dot_dimension_numbers<[1], [0], [0], [1], [0, 0, 1, 1], [], []>} : vector<2x32xf32>, vector<32x128xf32>, vector<2x128xf32> -> vector<2x128xf32>
    %520 = vector.broadcast %29 : vector<1x128xf32> to vector<2x128xf32>
    %521 = arith.addf %519, %520 : vector<2x128xf32>
    %c12_161 = arith.constant 12 : index
    %c0_162 = arith.constant 0 : index
    %c0_163 = arith.constant 0 : index
    %522 = vector.load %arg12[%c12_161, %c0_162, %c0_163] : memref<32x2x128xf32, #tpu.memory_space<vmem>>, vector<1x2x128xf32>
    %523 = vector.shape_cast %522 : vector<1x2x128xf32> to vector<2x128xf32>
    %524 = vector.shape_cast %521 : vector<2x128xf32> to vector<1x2x128xf32>
    tpu.vector_store %arg12[%c12_161, %c0_162, %c0_163], %524 {strides = array<i32>} : memref<32x2x128xf32, #tpu.memory_space<vmem>>, vector<1x2x128xf32>,
    %c13 = arith.constant 13 : index
    %c0_164 = arith.constant 0 : index
    %c0_165 = arith.constant 0 : index
    %525 = vector.load %arg13[%c13, %c0_164, %c0_165] : memref<32x2x96xf32, #tpu.memory_space<vmem>>, vector<1x2x96xf32>
    %526 = vector.shape_cast %525 : vector<1x2x96xf32> to vector<2x96xf32>
    %527 = arith.truncf %518 : vector<2x32xf32> to vector<2x32xbf16>
    %cst_166 = arith.constant dense<0.000000e+00> : vector<2x96xf32>
    %528 = tpu.matmul %527, %26, %cst_166 {dimension_numbers = #tpu.dot_dimension_numbers<[1], [0], [0], [1], [0, 0, 1, 1], [], []>} : vector<2x32xbf16>, vector<32x96xbf16>, vector<2x96xf32> -> vector<2x96xf32>
    %529 = vector.broadcast %27 : vector<1x96xf32> to vector<2x96xf32>
    %530 = arith.addf %528, %529 : vector<2x96xf32>
    %531 = vector.extract_strided_slice %526 {offsets = [0, 0], sizes = [2, 32], strides = [1, 1]} : vector<2x96xf32> to vector<2x32xf32>
    %532 = vector.extract_strided_slice %530 {offsets = [0, 0], sizes = [2, 32], strides = [1, 1]} : vector<2x96xf32> to vector<2x32xf32>
    %533 = arith.addf %531, %532 : vector<2x32xf32>
    %534 = arith.negf %533 : vector<2x32xf32>
    %535 = math.exp %534 : vector<2x32xf32>
    %cst_167 = arith.constant 1.000000e+00 : f32
    %536 = vector.broadcast %cst_167 : f32 to vector<2x32xf32>
    %537 = arith.addf %536, %535 : vector<2x32xf32>
    %538 = arith.divf %536, %537 : vector<2x32xf32>
    %539 = vector.extract_strided_slice %526 {offsets = [0, 32], sizes = [2, 32], strides = [1, 1]} : vector<2x96xf32> to vector<2x32xf32>
    %540 = vector.extract_strided_slice %530 {offsets = [0, 32], sizes = [2, 32], strides = [1, 1]} : vector<2x96xf32> to vector<2x32xf32>
    %541 = arith.addf %539, %540 : vector<2x32xf32>
    %542 = arith.negf %541 : vector<2x32xf32>
    %543 = math.exp %542 : vector<2x32xf32>
    %cst_168 = arith.constant 1.000000e+00 : f32
    %544 = vector.broadcast %cst_168 : f32 to vector<2x32xf32>
    %545 = arith.addf %544, %543 : vector<2x32xf32>
    %546 = arith.divf %544, %545 : vector<2x32xf32>
    %547 = vector.extract_strided_slice %526 {offsets = [0, 64], sizes = [2, 32], strides = [1, 1]} : vector<2x96xf32> to vector<2x32xf32>
    %548 = vector.extract_strided_slice %530 {offsets = [0, 64], sizes = [2, 32], strides = [1, 1]} : vector<2x96xf32> to vector<2x32xf32>
    %549 = arith.mulf %538, %548 : vector<2x32xf32>
    %550 = arith.addf %547, %549 : vector<2x32xf32>
    %551 = math.tanh %550 : vector<2x32xf32>
    %cst_169 = arith.constant 1.000000e+00 : f32
    %552 = vector.broadcast %cst_169 : f32 to vector<2x32xf32>
    %553 = arith.subf %552, %546 : vector<2x32xf32>
    %554 = arith.mulf %553, %551 : vector<2x32xf32>
    %555 = arith.mulf %546, %518 : vector<2x32xf32>
    %556 = arith.addf %554, %555 : vector<2x32xf32>
    %cst_170 = arith.constant dense<0.000000e+00> : vector<2x128xf32>
    %557 = tpu.matmul %556, %28, %cst_170 {dimension_numbers = #tpu.dot_dimension_numbers<[1], [0], [0], [1], [0, 0, 1, 1], [], []>} : vector<2x32xf32>, vector<32x128xf32>, vector<2x128xf32> -> vector<2x128xf32>
    %558 = vector.broadcast %29 : vector<1x128xf32> to vector<2x128xf32>
    %559 = arith.addf %557, %558 : vector<2x128xf32>
    %c13_171 = arith.constant 13 : index
    %c0_172 = arith.constant 0 : index
    %c0_173 = arith.constant 0 : index
    %560 = vector.load %arg12[%c13_171, %c0_172, %c0_173] : memref<32x2x128xf32, #tpu.memory_space<vmem>>, vector<1x2x128xf32>
    %561 = vector.shape_cast %560 : vector<1x2x128xf32> to vector<2x128xf32>
    %562 = vector.shape_cast %559 : vector<2x128xf32> to vector<1x2x128xf32>
    tpu.vector_store %arg12[%c13_171, %c0_172, %c0_173], %562 {strides = array<i32>} : memref<32x2x128xf32, #tpu.memory_space<vmem>>, vector<1x2x128xf32>,
    %c14 = arith.constant 14 : index
    %c0_174 = arith.constant 0 : index
    %c0_175 = arith.constant 0 : index
    %563 = vector.load %arg13[%c14, %c0_174, %c0_175] : memref<32x2x96xf32, #tpu.memory_space<vmem>>, vector<1x2x96xf32>
    %564 = vector.shape_cast %563 : vector<1x2x96xf32> to vector<2x96xf32>
    %565 = arith.truncf %556 : vector<2x32xf32> to vector<2x32xbf16>
    %cst_176 = arith.constant dense<0.000000e+00> : vector<2x96xf32>
    %566 = tpu.matmul %565, %26, %cst_176 {dimension_numbers = #tpu.dot_dimension_numbers<[1], [0], [0], [1], [0, 0, 1, 1], [], []>} : vector<2x32xbf16>, vector<32x96xbf16>, vector<2x96xf32> -> vector<2x96xf32>
    %567 = vector.broadcast %27 : vector<1x96xf32> to vector<2x96xf32>
    %568 = arith.addf %566, %567 : vector<2x96xf32>
    %569 = vector.extract_strided_slice %564 {offsets = [0, 0], sizes = [2, 32], strides = [1, 1]} : vector<2x96xf32> to vector<2x32xf32>
    %570 = vector.extract_strided_slice %568 {offsets = [0, 0], sizes = [2, 32], strides = [1, 1]} : vector<2x96xf32> to vector<2x32xf32>
    %571 = arith.addf %569, %570 : vector<2x32xf32>
    %572 = arith.negf %571 : vector<2x32xf32>
    %573 = math.exp %572 : vector<2x32xf32>
    %cst_177 = arith.constant 1.000000e+00 : f32
    %574 = vector.broadcast %cst_177 : f32 to vector<2x32xf32>
    %575 = arith.addf %574, %573 : vector<2x32xf32>
    %576 = arith.divf %574, %575 : vector<2x32xf32>
    %577 = vector.extract_strided_slice %564 {offsets = [0, 32], sizes = [2, 32], strides = [1, 1]} : vector<2x96xf32> to vector<2x32xf32>
    %578 = vector.extract_strided_slice %568 {offsets = [0, 32], sizes = [2, 32], strides = [1, 1]} : vector<2x96xf32> to vector<2x32xf32>
    %579 = arith.addf %577, %578 : vector<2x32xf32>
    %580 = arith.negf %579 : vector<2x32xf32>
    %581 = math.exp %580 : vector<2x32xf32>
    %cst_178 = arith.constant 1.000000e+00 : f32
    %582 = vector.broadcast %cst_178 : f32 to vector<2x32xf32>
    %583 = arith.addf %582, %581 : vector<2x32xf32>
    %584 = arith.divf %582, %583 : vector<2x32xf32>
    %585 = vector.extract_strided_slice %564 {offsets = [0, 64], sizes = [2, 32], strides = [1, 1]} : vector<2x96xf32> to vector<2x32xf32>
    %586 = vector.extract_strided_slice %568 {offsets = [0, 64], sizes = [2, 32], strides = [1, 1]} : vector<2x96xf32> to vector<2x32xf32>
    %587 = arith.mulf %576, %586 : vector<2x32xf32>
    %588 = arith.addf %585, %587 : vector<2x32xf32>
    %589 = math.tanh %588 : vector<2x32xf32>
    %cst_179 = arith.constant 1.000000e+00 : f32
    %590 = vector.broadcast %cst_179 : f32 to vector<2x32xf32>
    %591 = arith.subf %590, %584 : vector<2x32xf32>
    %592 = arith.mulf %591, %589 : vector<2x32xf32>
    %593 = arith.mulf %584, %556 : vector<2x32xf32>
    %594 = arith.addf %592, %593 : vector<2x32xf32>
    %cst_180 = arith.constant dense<0.000000e+00> : vector<2x128xf32>
    %595 = tpu.matmul %594, %28, %cst_180 {dimension_numbers = #tpu.dot_dimension_numbers<[1], [0], [0], [1], [0, 0, 1, 1], [], []>} : vector<2x32xf32>, vector<32x128xf32>, vector<2x128xf32> -> vector<2x128xf32>
    %596 = vector.broadcast %29 : vector<1x128xf32> to vector<2x128xf32>
    %597 = arith.addf %595, %596 : vector<2x128xf32>
    %c14_181 = arith.constant 14 : index
    %c0_182 = arith.constant 0 : index
    %c0_183 = arith.constant 0 : index
    %598 = vector.load %arg12[%c14_181, %c0_182, %c0_183] : memref<32x2x128xf32, #tpu.memory_space<vmem>>, vector<1x2x128xf32>
    %599 = vector.shape_cast %598 : vector<1x2x128xf32> to vector<2x128xf32>
    %600 = vector.shape_cast %597 : vector<2x128xf32> to vector<1x2x128xf32>
    tpu.vector_store %arg12[%c14_181, %c0_182, %c0_183], %600 {strides = array<i32>} : memref<32x2x128xf32, #tpu.memory_space<vmem>>, vector<1x2x128xf32>,
    %c15 = arith.constant 15 : index
    %c0_184 = arith.constant 0 : index
    %c0_185 = arith.constant 0 : index
    %601 = vector.load %arg13[%c15, %c0_184, %c0_185] : memref<32x2x96xf32, #tpu.memory_space<vmem>>, vector<1x2x96xf32>
    %602 = vector.shape_cast %601 : vector<1x2x96xf32> to vector<2x96xf32>
    %603 = arith.truncf %594 : vector<2x32xf32> to vector<2x32xbf16>
    %cst_186 = arith.constant dense<0.000000e+00> : vector<2x96xf32>
    %604 = tpu.matmul %603, %26, %cst_186 {dimension_numbers = #tpu.dot_dimension_numbers<[1], [0], [0], [1], [0, 0, 1, 1], [], []>} : vector<2x32xbf16>, vector<32x96xbf16>, vector<2x96xf32> -> vector<2x96xf32>
    %605 = vector.broadcast %27 : vector<1x96xf32> to vector<2x96xf32>
    %606 = arith.addf %604, %605 : vector<2x96xf32>
    %607 = vector.extract_strided_slice %602 {offsets = [0, 0], sizes = [2, 32], strides = [1, 1]} : vector<2x96xf32> to vector<2x32xf32>
    %608 = vector.extract_strided_slice %606 {offsets = [0, 0], sizes = [2, 32], strides = [1, 1]} : vector<2x96xf32> to vector<2x32xf32>
    %609 = arith.addf %607, %608 : vector<2x32xf32>
    %610 = arith.negf %609 : vector<2x32xf32>
    %611 = math.exp %610 : vector<2x32xf32>
    %cst_187 = arith.constant 1.000000e+00 : f32
    %612 = vector.broadcast %cst_187 : f32 to vector<2x32xf32>
    %613 = arith.addf %612, %611 : vector<2x32xf32>
    %614 = arith.divf %612, %613 : vector<2x32xf32>
    %615 = vector.extract_strided_slice %602 {offsets = [0, 32], sizes = [2, 32], strides = [1, 1]} : vector<2x96xf32> to vector<2x32xf32>
    %616 = vector.extract_strided_slice %606 {offsets = [0, 32], sizes = [2, 32], strides = [1, 1]} : vector<2x96xf32> to vector<2x32xf32>
    %617 = arith.addf %615, %616 : vector<2x32xf32>
    %618 = arith.negf %617 : vector<2x32xf32>
    %619 = math.exp %618 : vector<2x32xf32>
    %cst_188 = arith.constant 1.000000e+00 : f32
    %620 = vector.broadcast %cst_188 : f32 to vector<2x32xf32>
    %621 = arith.addf %620, %619 : vector<2x32xf32>
    %622 = arith.divf %620, %621 : vector<2x32xf32>
    %623 = vector.extract_strided_slice %602 {offsets = [0, 64], sizes = [2, 32], strides = [1, 1]} : vector<2x96xf32> to vector<2x32xf32>
    %624 = vector.extract_strided_slice %606 {offsets = [0, 64], sizes = [2, 32], strides = [1, 1]} : vector<2x96xf32> to vector<2x32xf32>
    %625 = arith.mulf %614, %624 : vector<2x32xf32>
    %626 = arith.addf %623, %625 : vector<2x32xf32>
    %627 = math.tanh %626 : vector<2x32xf32>
    %cst_189 = arith.constant 1.000000e+00 : f32
    %628 = vector.broadcast %cst_189 : f32 to vector<2x32xf32>
    %629 = arith.subf %628, %622 : vector<2x32xf32>
    %630 = arith.mulf %629, %627 : vector<2x32xf32>
    %631 = arith.mulf %622, %594 : vector<2x32xf32>
    %632 = arith.addf %630, %631 : vector<2x32xf32>
    %cst_190 = arith.constant dense<0.000000e+00> : vector<2x128xf32>
    %633 = tpu.matmul %632, %28, %cst_190 {dimension_numbers = #tpu.dot_dimension_numbers<[1], [0], [0], [1], [0, 0, 1, 1], [], []>} : vector<2x32xf32>, vector<32x128xf32>, vector<2x128xf32> -> vector<2x128xf32>
    %634 = vector.broadcast %29 : vector<1x128xf32> to vector<2x128xf32>
    %635 = arith.addf %633, %634 : vector<2x128xf32>
    %c15_191 = arith.constant 15 : index
    %c0_192 = arith.constant 0 : index
    %c0_193 = arith.constant 0 : index
    %636 = vector.load %arg12[%c15_191, %c0_192, %c0_193] : memref<32x2x128xf32, #tpu.memory_space<vmem>>, vector<1x2x128xf32>
    %637 = vector.shape_cast %636 : vector<1x2x128xf32> to vector<2x128xf32>
    %638 = vector.shape_cast %635 : vector<2x128xf32> to vector<1x2x128xf32>
    tpu.vector_store %arg12[%c15_191, %c0_192, %c0_193], %638 {strides = array<i32>} : memref<32x2x128xf32, #tpu.memory_space<vmem>>, vector<1x2x128xf32>,
    %c16 = arith.constant 16 : index
    %c0_194 = arith.constant 0 : index
    %c0_195 = arith.constant 0 : index
    %639 = vector.load %arg13[%c16, %c0_194, %c0_195] : memref<32x2x96xf32, #tpu.memory_space<vmem>>, vector<1x2x96xf32>
    %640 = vector.shape_cast %639 : vector<1x2x96xf32> to vector<2x96xf32>
    %641 = arith.truncf %632 : vector<2x32xf32> to vector<2x32xbf16>
    %cst_196 = arith.constant dense<0.000000e+00> : vector<2x96xf32>
    %642 = tpu.matmul %641, %26, %cst_196 {dimension_numbers = #tpu.dot_dimension_numbers<[1], [0], [0], [1], [0, 0, 1, 1], [], []>} : vector<2x32xbf16>, vector<32x96xbf16>, vector<2x96xf32> -> vector<2x96xf32>
    %643 = vector.broadcast %27 : vector<1x96xf32> to vector<2x96xf32>
    %644 = arith.addf %642, %643 : vector<2x96xf32>
    %645 = vector.extract_strided_slice %640 {offsets = [0, 0], sizes = [2, 32], strides = [1, 1]} : vector<2x96xf32> to vector<2x32xf32>
    %646 = vector.extract_strided_slice %644 {offsets = [0, 0], sizes = [2, 32], strides = [1, 1]} : vector<2x96xf32> to vector<2x32xf32>
    %647 = arith.addf %645, %646 : vector<2x32xf32>
    %648 = arith.negf %647 : vector<2x32xf32>
    %649 = math.exp %648 : vector<2x32xf32>
    %cst_197 = arith.constant 1.000000e+00 : f32
    %650 = vector.broadcast %cst_197 : f32 to vector<2x32xf32>
    %651 = arith.addf %650, %649 : vector<2x32xf32>
    %652 = arith.divf %650, %651 : vector<2x32xf32>
    %653 = vector.extract_strided_slice %640 {offsets = [0, 32], sizes = [2, 32], strides = [1, 1]} : vector<2x96xf32> to vector<2x32xf32>
    %654 = vector.extract_strided_slice %644 {offsets = [0, 32], sizes = [2, 32], strides = [1, 1]} : vector<2x96xf32> to vector<2x32xf32>
    %655 = arith.addf %653, %654 : vector<2x32xf32>
    %656 = arith.negf %655 : vector<2x32xf32>
    %657 = math.exp %656 : vector<2x32xf32>
    %cst_198 = arith.constant 1.000000e+00 : f32
    %658 = vector.broadcast %cst_198 : f32 to vector<2x32xf32>
    %659 = arith.addf %658, %657 : vector<2x32xf32>
    %660 = arith.divf %658, %659 : vector<2x32xf32>
    %661 = vector.extract_strided_slice %640 {offsets = [0, 64], sizes = [2, 32], strides = [1, 1]} : vector<2x96xf32> to vector<2x32xf32>
    %662 = vector.extract_strided_slice %644 {offsets = [0, 64], sizes = [2, 32], strides = [1, 1]} : vector<2x96xf32> to vector<2x32xf32>
    %663 = arith.mulf %652, %662 : vector<2x32xf32>
    %664 = arith.addf %661, %663 : vector<2x32xf32>
    %665 = math.tanh %664 : vector<2x32xf32>
    %cst_199 = arith.constant 1.000000e+00 : f32
    %666 = vector.broadcast %cst_199 : f32 to vector<2x32xf32>
    %667 = arith.subf %666, %660 : vector<2x32xf32>
    %668 = arith.mulf %667, %665 : vector<2x32xf32>
    %669 = arith.mulf %660, %632 : vector<2x32xf32>
    %670 = arith.addf %668, %669 : vector<2x32xf32>
    %cst_200 = arith.constant dense<0.000000e+00> : vector<2x128xf32>
    %671 = tpu.matmul %670, %28, %cst_200 {dimension_numbers = #tpu.dot_dimension_numbers<[1], [0], [0], [1], [0, 0, 1, 1], [], []>} : vector<2x32xf32>, vector<32x128xf32>, vector<2x128xf32> -> vector<2x128xf32>
    %672 = vector.broadcast %29 : vector<1x128xf32> to vector<2x128xf32>
    %673 = arith.addf %671, %672 : vector<2x128xf32>
    %c16_201 = arith.constant 16 : index
    %c0_202 = arith.constant 0 : index
    %c0_203 = arith.constant 0 : index
    %674 = vector.load %arg12[%c16_201, %c0_202, %c0_203] : memref<32x2x128xf32, #tpu.memory_space<vmem>>, vector<1x2x128xf32>
    %675 = vector.shape_cast %674 : vector<1x2x128xf32> to vector<2x128xf32>
    %676 = vector.shape_cast %673 : vector<2x128xf32> to vector<1x2x128xf32>
    tpu.vector_store %arg12[%c16_201, %c0_202, %c0_203], %676 {strides = array<i32>} : memref<32x2x128xf32, #tpu.memory_space<vmem>>, vector<1x2x128xf32>,
    %c17 = arith.constant 17 : index
    %c0_204 = arith.constant 0 : index
    %c0_205 = arith.constant 0 : index
    %677 = vector.load %arg13[%c17, %c0_204, %c0_205] : memref<32x2x96xf32, #tpu.memory_space<vmem>>, vector<1x2x96xf32>
    %678 = vector.shape_cast %677 : vector<1x2x96xf32> to vector<2x96xf32>
    %679 = arith.truncf %670 : vector<2x32xf32> to vector<2x32xbf16>
    %cst_206 = arith.constant dense<0.000000e+00> : vector<2x96xf32>
    %680 = tpu.matmul %679, %26, %cst_206 {dimension_numbers = #tpu.dot_dimension_numbers<[1], [0], [0], [1], [0, 0, 1, 1], [], []>} : vector<2x32xbf16>, vector<32x96xbf16>, vector<2x96xf32> -> vector<2x96xf32>
    %681 = vector.broadcast %27 : vector<1x96xf32> to vector<2x96xf32>
    %682 = arith.addf %680, %681 : vector<2x96xf32>
    %683 = vector.extract_strided_slice %678 {offsets = [0, 0], sizes = [2, 32], strides = [1, 1]} : vector<2x96xf32> to vector<2x32xf32>
    %684 = vector.extract_strided_slice %682 {offsets = [0, 0], sizes = [2, 32], strides = [1, 1]} : vector<2x96xf32> to vector<2x32xf32>
    %685 = arith.addf %683, %684 : vector<2x32xf32>
    %686 = arith.negf %685 : vector<2x32xf32>
    %687 = math.exp %686 : vector<2x32xf32>
    %cst_207 = arith.constant 1.000000e+00 : f32
    %688 = vector.broadcast %cst_207 : f32 to vector<2x32xf32>
    %689 = arith.addf %688, %687 : vector<2x32xf32>
    %690 = arith.divf %688, %689 : vector<2x32xf32>
    %691 = vector.extract_strided_slice %678 {offsets = [0, 32], sizes = [2, 32], strides = [1, 1]} : vector<2x96xf32> to vector<2x32xf32>
    %692 = vector.extract_strided_slice %682 {offsets = [0, 32], sizes = [2, 32], strides = [1, 1]} : vector<2x96xf32> to vector<2x32xf32>
    %693 = arith.addf %691, %692 : vector<2x32xf32>
    %694 = arith.negf %693 : vector<2x32xf32>
    %695 = math.exp %694 : vector<2x32xf32>
    %cst_208 = arith.constant 1.000000e+00 : f32
    %696 = vector.broadcast %cst_208 : f32 to vector<2x32xf32>
    %697 = arith.addf %696, %695 : vector<2x32xf32>
    %698 = arith.divf %696, %697 : vector<2x32xf32>
    %699 = vector.extract_strided_slice %678 {offsets = [0, 64], sizes = [2, 32], strides = [1, 1]} : vector<2x96xf32> to vector<2x32xf32>
    %700 = vector.extract_strided_slice %682 {offsets = [0, 64], sizes = [2, 32], strides = [1, 1]} : vector<2x96xf32> to vector<2x32xf32>
    %701 = arith.mulf %690, %700 : vector<2x32xf32>
    %702 = arith.addf %699, %701 : vector<2x32xf32>
    %703 = math.tanh %702 : vector<2x32xf32>
    %cst_209 = arith.constant 1.000000e+00 : f32
    %704 = vector.broadcast %cst_209 : f32 to vector<2x32xf32>
    %705 = arith.subf %704, %698 : vector<2x32xf32>
    %706 = arith.mulf %705, %703 : vector<2x32xf32>
    %707 = arith.mulf %698, %670 : vector<2x32xf32>
    %708 = arith.addf %706, %707 : vector<2x32xf32>
    %cst_210 = arith.constant dense<0.000000e+00> : vector<2x128xf32>
    %709 = tpu.matmul %708, %28, %cst_210 {dimension_numbers = #tpu.dot_dimension_numbers<[1], [0], [0], [1], [0, 0, 1, 1], [], []>} : vector<2x32xf32>, vector<32x128xf32>, vector<2x128xf32> -> vector<2x128xf32>
    %710 = vector.broadcast %29 : vector<1x128xf32> to vector<2x128xf32>
    %711 = arith.addf %709, %710 : vector<2x128xf32>
    %c17_211 = arith.constant 17 : index
    %c0_212 = arith.constant 0 : index
    %c0_213 = arith.constant 0 : index
    %712 = vector.load %arg12[%c17_211, %c0_212, %c0_213] : memref<32x2x128xf32, #tpu.memory_space<vmem>>, vector<1x2x128xf32>
    %713 = vector.shape_cast %712 : vector<1x2x128xf32> to vector<2x128xf32>
    %714 = vector.shape_cast %711 : vector<2x128xf32> to vector<1x2x128xf32>
    tpu.vector_store %arg12[%c17_211, %c0_212, %c0_213], %714 {strides = array<i32>} : memref<32x2x128xf32, #tpu.memory_space<vmem>>, vector<1x2x128xf32>,
    %c18 = arith.constant 18 : index
    %c0_214 = arith.constant 0 : index
    %c0_215 = arith.constant 0 : index
    %715 = vector.load %arg13[%c18, %c0_214, %c0_215] : memref<32x2x96xf32, #tpu.memory_space<vmem>>, vector<1x2x96xf32>
    %716 = vector.shape_cast %715 : vector<1x2x96xf32> to vector<2x96xf32>
    %717 = arith.truncf %708 : vector<2x32xf32> to vector<2x32xbf16>
    %cst_216 = arith.constant dense<0.000000e+00> : vector<2x96xf32>
    %718 = tpu.matmul %717, %26, %cst_216 {dimension_numbers = #tpu.dot_dimension_numbers<[1], [0], [0], [1], [0, 0, 1, 1], [], []>} : vector<2x32xbf16>, vector<32x96xbf16>, vector<2x96xf32> -> vector<2x96xf32>
    %719 = vector.broadcast %27 : vector<1x96xf32> to vector<2x96xf32>
    %720 = arith.addf %718, %719 : vector<2x96xf32>
    %721 = vector.extract_strided_slice %716 {offsets = [0, 0], sizes = [2, 32], strides = [1, 1]} : vector<2x96xf32> to vector<2x32xf32>
    %722 = vector.extract_strided_slice %720 {offsets = [0, 0], sizes = [2, 32], strides = [1, 1]} : vector<2x96xf32> to vector<2x32xf32>
    %723 = arith.addf %721, %722 : vector<2x32xf32>
    %724 = arith.negf %723 : vector<2x32xf32>
    %725 = math.exp %724 : vector<2x32xf32>
    %cst_217 = arith.constant 1.000000e+00 : f32
    %726 = vector.broadcast %cst_217 : f32 to vector<2x32xf32>
    %727 = arith.addf %726, %725 : vector<2x32xf32>
    %728 = arith.divf %726, %727 : vector<2x32xf32>
    %729 = vector.extract_strided_slice %716 {offsets = [0, 32], sizes = [2, 32], strides = [1, 1]} : vector<2x96xf32> to vector<2x32xf32>
    %730 = vector.extract_strided_slice %720 {offsets = [0, 32], sizes = [2, 32], strides = [1, 1]} : vector<2x96xf32> to vector<2x32xf32>
    %731 = arith.addf %729, %730 : vector<2x32xf32>
    %732 = arith.negf %731 : vector<2x32xf32>
    %733 = math.exp %732 : vector<2x32xf32>
    %cst_218 = arith.constant 1.000000e+00 : f32
    %734 = vector.broadcast %cst_218 : f32 to vector<2x32xf32>
    %735 = arith.addf %734, %733 : vector<2x32xf32>
    %736 = arith.divf %734, %735 : vector<2x32xf32>
    %737 = vector.extract_strided_slice %716 {offsets = [0, 64], sizes = [2, 32], strides = [1, 1]} : vector<2x96xf32> to vector<2x32xf32>
    %738 = vector.extract_strided_slice %720 {offsets = [0, 64], sizes = [2, 32], strides = [1, 1]} : vector<2x96xf32> to vector<2x32xf32>
    %739 = arith.mulf %728, %738 : vector<2x32xf32>
    %740 = arith.addf %737, %739 : vector<2x32xf32>
    %741 = math.tanh %740 : vector<2x32xf32>
    %cst_219 = arith.constant 1.000000e+00 : f32
    %742 = vector.broadcast %cst_219 : f32 to vector<2x32xf32>
    %743 = arith.subf %742, %736 : vector<2x32xf32>
    %744 = arith.mulf %743, %741 : vector<2x32xf32>
    %745 = arith.mulf %736, %708 : vector<2x32xf32>
    %746 = arith.addf %744, %745 : vector<2x32xf32>
    %cst_220 = arith.constant dense<0.000000e+00> : vector<2x128xf32>
    %747 = tpu.matmul %746, %28, %cst_220 {dimension_numbers = #tpu.dot_dimension_numbers<[1], [0], [0], [1], [0, 0, 1, 1], [], []>} : vector<2x32xf32>, vector<32x128xf32>, vector<2x128xf32> -> vector<2x128xf32>
    %748 = vector.broadcast %29 : vector<1x128xf32> to vector<2x128xf32>
    %749 = arith.addf %747, %748 : vector<2x128xf32>
    %c18_221 = arith.constant 18 : index
    %c0_222 = arith.constant 0 : index
    %c0_223 = arith.constant 0 : index
    %750 = vector.load %arg12[%c18_221, %c0_222, %c0_223] : memref<32x2x128xf32, #tpu.memory_space<vmem>>, vector<1x2x128xf32>
    %751 = vector.shape_cast %750 : vector<1x2x128xf32> to vector<2x128xf32>
    %752 = vector.shape_cast %749 : vector<2x128xf32> to vector<1x2x128xf32>
    tpu.vector_store %arg12[%c18_221, %c0_222, %c0_223], %752 {strides = array<i32>} : memref<32x2x128xf32, #tpu.memory_space<vmem>>, vector<1x2x128xf32>,
    %c19 = arith.constant 19 : index
    %c0_224 = arith.constant 0 : index
    %c0_225 = arith.constant 0 : index
    %753 = vector.load %arg13[%c19, %c0_224, %c0_225] : memref<32x2x96xf32, #tpu.memory_space<vmem>>, vector<1x2x96xf32>
    %754 = vector.shape_cast %753 : vector<1x2x96xf32> to vector<2x96xf32>
    %755 = arith.truncf %746 : vector<2x32xf32> to vector<2x32xbf16>
    %cst_226 = arith.constant dense<0.000000e+00> : vector<2x96xf32>
    %756 = tpu.matmul %755, %26, %cst_226 {dimension_numbers = #tpu.dot_dimension_numbers<[1], [0], [0], [1], [0, 0, 1, 1], [], []>} : vector<2x32xbf16>, vector<32x96xbf16>, vector<2x96xf32> -> vector<2x96xf32>
    %757 = vector.broadcast %27 : vector<1x96xf32> to vector<2x96xf32>
    %758 = arith.addf %756, %757 : vector<2x96xf32>
    %759 = vector.extract_strided_slice %754 {offsets = [0, 0], sizes = [2, 32], strides = [1, 1]} : vector<2x96xf32> to vector<2x32xf32>
    %760 = vector.extract_strided_slice %758 {offsets = [0, 0], sizes = [2, 32], strides = [1, 1]} : vector<2x96xf32> to vector<2x32xf32>
    %761 = arith.addf %759, %760 : vector<2x32xf32>
    %762 = arith.negf %761 : vector<2x32xf32>
    %763 = math.exp %762 : vector<2x32xf32>
    %cst_227 = arith.constant 1.000000e+00 : f32
    %764 = vector.broadcast %cst_227 : f32 to vector<2x32xf32>
    %765 = arith.addf %764, %763 : vector<2x32xf32>
    %766 = arith.divf %764, %765 : vector<2x32xf32>
    %767 = vector.extract_strided_slice %754 {offsets = [0, 32], sizes = [2, 32], strides = [1, 1]} : vector<2x96xf32> to vector<2x32xf32>
    %768 = vector.extract_strided_slice %758 {offsets = [0, 32], sizes = [2, 32], strides = [1, 1]} : vector<2x96xf32> to vector<2x32xf32>
    %769 = arith.addf %767, %768 : vector<2x32xf32>
    %770 = arith.negf %769 : vector<2x32xf32>
    %771 = math.exp %770 : vector<2x32xf32>
    %cst_228 = arith.constant 1.000000e+00 : f32
    %772 = vector.broadcast %cst_228 : f32 to vector<2x32xf32>
    %773 = arith.addf %772, %771 : vector<2x32xf32>
    %774 = arith.divf %772, %773 : vector<2x32xf32>
    %775 = vector.extract_strided_slice %754 {offsets = [0, 64], sizes = [2, 32], strides = [1, 1]} : vector<2x96xf32> to vector<2x32xf32>
    %776 = vector.extract_strided_slice %758 {offsets = [0, 64], sizes = [2, 32], strides = [1, 1]} : vector<2x96xf32> to vector<2x32xf32>
    %777 = arith.mulf %766, %776 : vector<2x32xf32>
    %778 = arith.addf %775, %777 : vector<2x32xf32>
    %779 = math.tanh %778 : vector<2x32xf32>
    %cst_229 = arith.constant 1.000000e+00 : f32
    %780 = vector.broadcast %cst_229 : f32 to vector<2x32xf32>
    %781 = arith.subf %780, %774 : vector<2x32xf32>
    %782 = arith.mulf %781, %779 : vector<2x32xf32>
    %783 = arith.mulf %774, %746 : vector<2x32xf32>
    %784 = arith.addf %782, %783 : vector<2x32xf32>
    %cst_230 = arith.constant dense<0.000000e+00> : vector<2x128xf32>
    %785 = tpu.matmul %784, %28, %cst_230 {dimension_numbers = #tpu.dot_dimension_numbers<[1], [0], [0], [1], [0, 0, 1, 1], [], []>} : vector<2x32xf32>, vector<32x128xf32>, vector<2x128xf32> -> vector<2x128xf32>
    %786 = vector.broadcast %29 : vector<1x128xf32> to vector<2x128xf32>
    %787 = arith.addf %785, %786 : vector<2x128xf32>
    %c19_231 = arith.constant 19 : index
    %c0_232 = arith.constant 0 : index
    %c0_233 = arith.constant 0 : index
    %788 = vector.load %arg12[%c19_231, %c0_232, %c0_233] : memref<32x2x128xf32, #tpu.memory_space<vmem>>, vector<1x2x128xf32>
    %789 = vector.shape_cast %788 : vector<1x2x128xf32> to vector<2x128xf32>
    %790 = vector.shape_cast %787 : vector<2x128xf32> to vector<1x2x128xf32>
    tpu.vector_store %arg12[%c19_231, %c0_232, %c0_233], %790 {strides = array<i32>} : memref<32x2x128xf32, #tpu.memory_space<vmem>>, vector<1x2x128xf32>,
    %c20 = arith.constant 20 : index
    %c0_234 = arith.constant 0 : index
    %c0_235 = arith.constant 0 : index
    %791 = vector.load %arg13[%c20, %c0_234, %c0_235] : memref<32x2x96xf32, #tpu.memory_space<vmem>>, vector<1x2x96xf32>
    %792 = vector.shape_cast %791 : vector<1x2x96xf32> to vector<2x96xf32>
    %793 = arith.truncf %784 : vector<2x32xf32> to vector<2x32xbf16>
    %cst_236 = arith.constant dense<0.000000e+00> : vector<2x96xf32>
    %794 = tpu.matmul %793, %26, %cst_236 {dimension_numbers = #tpu.dot_dimension_numbers<[1], [0], [0], [1], [0, 0, 1, 1], [], []>} : vector<2x32xbf16>, vector<32x96xbf16>, vector<2x96xf32> -> vector<2x96xf32>
    %795 = vector.broadcast %27 : vector<1x96xf32> to vector<2x96xf32>
    %796 = arith.addf %794, %795 : vector<2x96xf32>
    %797 = vector.extract_strided_slice %792 {offsets = [0, 0], sizes = [2, 32], strides = [1, 1]} : vector<2x96xf32> to vector<2x32xf32>
    %798 = vector.extract_strided_slice %796 {offsets = [0, 0], sizes = [2, 32], strides = [1, 1]} : vector<2x96xf32> to vector<2x32xf32>
    %799 = arith.addf %797, %798 : vector<2x32xf32>
    %800 = arith.negf %799 : vector<2x32xf32>
    %801 = math.exp %800 : vector<2x32xf32>
    %cst_237 = arith.constant 1.000000e+00 : f32
    %802 = vector.broadcast %cst_237 : f32 to vector<2x32xf32>
    %803 = arith.addf %802, %801 : vector<2x32xf32>
    %804 = arith.divf %802, %803 : vector<2x32xf32>
    %805 = vector.extract_strided_slice %792 {offsets = [0, 32], sizes = [2, 32], strides = [1, 1]} : vector<2x96xf32> to vector<2x32xf32>
    %806 = vector.extract_strided_slice %796 {offsets = [0, 32], sizes = [2, 32], strides = [1, 1]} : vector<2x96xf32> to vector<2x32xf32>
    %807 = arith.addf %805, %806 : vector<2x32xf32>
    %808 = arith.negf %807 : vector<2x32xf32>
    %809 = math.exp %808 : vector<2x32xf32>
    %cst_238 = arith.constant 1.000000e+00 : f32
    %810 = vector.broadcast %cst_238 : f32 to vector<2x32xf32>
    %811 = arith.addf %810, %809 : vector<2x32xf32>
    %812 = arith.divf %810, %811 : vector<2x32xf32>
    %813 = vector.extract_strided_slice %792 {offsets = [0, 64], sizes = [2, 32], strides = [1, 1]} : vector<2x96xf32> to vector<2x32xf32>
    %814 = vector.extract_strided_slice %796 {offsets = [0, 64], sizes = [2, 32], strides = [1, 1]} : vector<2x96xf32> to vector<2x32xf32>
    %815 = arith.mulf %804, %814 : vector<2x32xf32>
    %816 = arith.addf %813, %815 : vector<2x32xf32>
    %817 = math.tanh %816 : vector<2x32xf32>
    %cst_239 = arith.constant 1.000000e+00 : f32
    %818 = vector.broadcast %cst_239 : f32 to vector<2x32xf32>
    %819 = arith.subf %818, %812 : vector<2x32xf32>
    %820 = arith.mulf %819, %817 : vector<2x32xf32>
    %821 = arith.mulf %812, %784 : vector<2x32xf32>
    %822 = arith.addf %820, %821 : vector<2x32xf32>
    %cst_240 = arith.constant dense<0.000000e+00> : vector<2x128xf32>
    %823 = tpu.matmul %822, %28, %cst_240 {dimension_numbers = #tpu.dot_dimension_numbers<[1], [0], [0], [1], [0, 0, 1, 1], [], []>} : vector<2x32xf32>, vector<32x128xf32>, vector<2x128xf32> -> vector<2x128xf32>
    %824 = vector.broadcast %29 : vector<1x128xf32> to vector<2x128xf32>
    %825 = arith.addf %823, %824 : vector<2x128xf32>
    %c20_241 = arith.constant 20 : index
    %c0_242 = arith.constant 0 : index
    %c0_243 = arith.constant 0 : index
    %826 = vector.load %arg12[%c20_241, %c0_242, %c0_243] : memref<32x2x128xf32, #tpu.memory_space<vmem>>, vector<1x2x128xf32>
    %827 = vector.shape_cast %826 : vector<1x2x128xf32> to vector<2x128xf32>
    %828 = vector.shape_cast %825 : vector<2x128xf32> to vector<1x2x128xf32>
    tpu.vector_store %arg12[%c20_241, %c0_242, %c0_243], %828 {strides = array<i32>} : memref<32x2x128xf32, #tpu.memory_space<vmem>>, vector<1x2x128xf32>,
    %c21 = arith.constant 21 : index
    %c0_244 = arith.constant 0 : index
    %c0_245 = arith.constant 0 : index
    %829 = vector.load %arg13[%c21, %c0_244, %c0_245] : memref<32x2x96xf32, #tpu.memory_space<vmem>>, vector<1x2x96xf32>
    %830 = vector.shape_cast %829 : vector<1x2x96xf32> to vector<2x96xf32>
    %831 = arith.truncf %822 : vector<2x32xf32> to vector<2x32xbf16>
    %cst_246 = arith.constant dense<0.000000e+00> : vector<2x96xf32>
    %832 = tpu.matmul %831, %26, %cst_246 {dimension_numbers = #tpu.dot_dimension_numbers<[1], [0], [0], [1], [0, 0, 1, 1], [], []>} : vector<2x32xbf16>, vector<32x96xbf16>, vector<2x96xf32> -> vector<2x96xf32>
    %833 = vector.broadcast %27 : vector<1x96xf32> to vector<2x96xf32>
    %834 = arith.addf %832, %833 : vector<2x96xf32>
    %835 = vector.extract_strided_slice %830 {offsets = [0, 0], sizes = [2, 32], strides = [1, 1]} : vector<2x96xf32> to vector<2x32xf32>
    %836 = vector.extract_strided_slice %834 {offsets = [0, 0], sizes = [2, 32], strides = [1, 1]} : vector<2x96xf32> to vector<2x32xf32>
    %837 = arith.addf %835, %836 : vector<2x32xf32>
    %838 = arith.negf %837 : vector<2x32xf32>
    %839 = math.exp %838 : vector<2x32xf32>
    %cst_247 = arith.constant 1.000000e+00 : f32
    %840 = vector.broadcast %cst_247 : f32 to vector<2x32xf32>
    %841 = arith.addf %840, %839 : vector<2x32xf32>
    %842 = arith.divf %840, %841 : vector<2x32xf32>
    %843 = vector.extract_strided_slice %830 {offsets = [0, 32], sizes = [2, 32], strides = [1, 1]} : vector<2x96xf32> to vector<2x32xf32>
    %844 = vector.extract_strided_slice %834 {offsets = [0, 32], sizes = [2, 32], strides = [1, 1]} : vector<2x96xf32> to vector<2x32xf32>
    %845 = arith.addf %843, %844 : vector<2x32xf32>
    %846 = arith.negf %845 : vector<2x32xf32>
    %847 = math.exp %846 : vector<2x32xf32>
    %cst_248 = arith.constant 1.000000e+00 : f32
    %848 = vector.broadcast %cst_248 : f32 to vector<2x32xf32>
    %849 = arith.addf %848, %847 : vector<2x32xf32>
    %850 = arith.divf %848, %849 : vector<2x32xf32>
    %851 = vector.extract_strided_slice %830 {offsets = [0, 64], sizes = [2, 32], strides = [1, 1]} : vector<2x96xf32> to vector<2x32xf32>
    %852 = vector.extract_strided_slice %834 {offsets = [0, 64], sizes = [2, 32], strides = [1, 1]} : vector<2x96xf32> to vector<2x32xf32>
    %853 = arith.mulf %842, %852 : vector<2x32xf32>
    %854 = arith.addf %851, %853 : vector<2x32xf32>
    %855 = math.tanh %854 : vector<2x32xf32>
    %cst_249 = arith.constant 1.000000e+00 : f32
    %856 = vector.broadcast %cst_249 : f32 to vector<2x32xf32>
    %857 = arith.subf %856, %850 : vector<2x32xf32>
    %858 = arith.mulf %857, %855 : vector<2x32xf32>
    %859 = arith.mulf %850, %822 : vector<2x32xf32>
    %860 = arith.addf %858, %859 : vector<2x32xf32>
    %cst_250 = arith.constant dense<0.000000e+00> : vector<2x128xf32>
    %861 = tpu.matmul %860, %28, %cst_250 {dimension_numbers = #tpu.dot_dimension_numbers<[1], [0], [0], [1], [0, 0, 1, 1], [], []>} : vector<2x32xf32>, vector<32x128xf32>, vector<2x128xf32> -> vector<2x128xf32>
    %862 = vector.broadcast %29 : vector<1x128xf32> to vector<2x128xf32>
    %863 = arith.addf %861, %862 : vector<2x128xf32>
    %c21_251 = arith.constant 21 : index
    %c0_252 = arith.constant 0 : index
    %c0_253 = arith.constant 0 : index
    %864 = vector.load %arg12[%c21_251, %c0_252, %c0_253] : memref<32x2x128xf32, #tpu.memory_space<vmem>>, vector<1x2x128xf32>
    %865 = vector.shape_cast %864 : vector<1x2x128xf32> to vector<2x128xf32>
    %866 = vector.shape_cast %863 : vector<2x128xf32> to vector<1x2x128xf32>
    tpu.vector_store %arg12[%c21_251, %c0_252, %c0_253], %866 {strides = array<i32>} : memref<32x2x128xf32, #tpu.memory_space<vmem>>, vector<1x2x128xf32>,
    %c22 = arith.constant 22 : index
    %c0_254 = arith.constant 0 : index
    %c0_255 = arith.constant 0 : index
    %867 = vector.load %arg13[%c22, %c0_254, %c0_255] : memref<32x2x96xf32, #tpu.memory_space<vmem>>, vector<1x2x96xf32>
    %868 = vector.shape_cast %867 : vector<1x2x96xf32> to vector<2x96xf32>
    %869 = arith.truncf %860 : vector<2x32xf32> to vector<2x32xbf16>
    %cst_256 = arith.constant dense<0.000000e+00> : vector<2x96xf32>
    %870 = tpu.matmul %869, %26, %cst_256 {dimension_numbers = #tpu.dot_dimension_numbers<[1], [0], [0], [1], [0, 0, 1, 1], [], []>} : vector<2x32xbf16>, vector<32x96xbf16>, vector<2x96xf32> -> vector<2x96xf32>
    %871 = vector.broadcast %27 : vector<1x96xf32> to vector<2x96xf32>
    %872 = arith.addf %870, %871 : vector<2x96xf32>
    %873 = vector.extract_strided_slice %868 {offsets = [0, 0], sizes = [2, 32], strides = [1, 1]} : vector<2x96xf32> to vector<2x32xf32>
    %874 = vector.extract_strided_slice %872 {offsets = [0, 0], sizes = [2, 32], strides = [1, 1]} : vector<2x96xf32> to vector<2x32xf32>
    %875 = arith.addf %873, %874 : vector<2x32xf32>
    %876 = arith.negf %875 : vector<2x32xf32>
    %877 = math.exp %876 : vector<2x32xf32>
    %cst_257 = arith.constant 1.000000e+00 : f32
    %878 = vector.broadcast %cst_257 : f32 to vector<2x32xf32>
    %879 = arith.addf %878, %877 : vector<2x32xf32>
    %880 = arith.divf %878, %879 : vector<2x32xf32>
    %881 = vector.extract_strided_slice %868 {offsets = [0, 32], sizes = [2, 32], strides = [1, 1]} : vector<2x96xf32> to vector<2x32xf32>
    %882 = vector.extract_strided_slice %872 {offsets = [0, 32], sizes = [2, 32], strides = [1, 1]} : vector<2x96xf32> to vector<2x32xf32>
    %883 = arith.addf %881, %882 : vector<2x32xf32>
    %884 = arith.negf %883 : vector<2x32xf32>
    %885 = math.exp %884 : vector<2x32xf32>
    %cst_258 = arith.constant 1.000000e+00 : f32
    %886 = vector.broadcast %cst_258 : f32 to vector<2x32xf32>
    %887 = arith.addf %886, %885 : vector<2x32xf32>
    %888 = arith.divf %886, %887 : vector<2x32xf32>
    %889 = vector.extract_strided_slice %868 {offsets = [0, 64], sizes = [2, 32], strides = [1, 1]} : vector<2x96xf32> to vector<2x32xf32>
    %890 = vector.extract_strided_slice %872 {offsets = [0, 64], sizes = [2, 32], strides = [1, 1]} : vector<2x96xf32> to vector<2x32xf32>
    %891 = arith.mulf %880, %890 : vector<2x32xf32>
    %892 = arith.addf %889, %891 : vector<2x32xf32>
    %893 = math.tanh %892 : vector<2x32xf32>
    %cst_259 = arith.constant 1.000000e+00 : f32
    %894 = vector.broadcast %cst_259 : f32 to vector<2x32xf32>
    %895 = arith.subf %894, %888 : vector<2x32xf32>
    %896 = arith.mulf %895, %893 : vector<2x32xf32>
    %897 = arith.mulf %888, %860 : vector<2x32xf32>
    %898 = arith.addf %896, %897 : vector<2x32xf32>
    %cst_260 = arith.constant dense<0.000000e+00> : vector<2x128xf32>
    %899 = tpu.matmul %898, %28, %cst_260 {dimension_numbers = #tpu.dot_dimension_numbers<[1], [0], [0], [1], [0, 0, 1, 1], [], []>} : vector<2x32xf32>, vector<32x128xf32>, vector<2x128xf32> -> vector<2x128xf32>
    %900 = vector.broadcast %29 : vector<1x128xf32> to vector<2x128xf32>
    %901 = arith.addf %899, %900 : vector<2x128xf32>
    %c22_261 = arith.constant 22 : index
    %c0_262 = arith.constant 0 : index
    %c0_263 = arith.constant 0 : index
    %902 = vector.load %arg12[%c22_261, %c0_262, %c0_263] : memref<32x2x128xf32, #tpu.memory_space<vmem>>, vector<1x2x128xf32>
    %903 = vector.shape_cast %902 : vector<1x2x128xf32> to vector<2x128xf32>
    %904 = vector.shape_cast %901 : vector<2x128xf32> to vector<1x2x128xf32>
    tpu.vector_store %arg12[%c22_261, %c0_262, %c0_263], %904 {strides = array<i32>} : memref<32x2x128xf32, #tpu.memory_space<vmem>>, vector<1x2x128xf32>,
    %c23 = arith.constant 23 : index
    %c0_264 = arith.constant 0 : index
    %c0_265 = arith.constant 0 : index
    %905 = vector.load %arg13[%c23, %c0_264, %c0_265] : memref<32x2x96xf32, #tpu.memory_space<vmem>>, vector<1x2x96xf32>
    %906 = vector.shape_cast %905 : vector<1x2x96xf32> to vector<2x96xf32>
    %907 = arith.truncf %898 : vector<2x32xf32> to vector<2x32xbf16>
    %cst_266 = arith.constant dense<0.000000e+00> : vector<2x96xf32>
    %908 = tpu.matmul %907, %26, %cst_266 {dimension_numbers = #tpu.dot_dimension_numbers<[1], [0], [0], [1], [0, 0, 1, 1], [], []>} : vector<2x32xbf16>, vector<32x96xbf16>, vector<2x96xf32> -> vector<2x96xf32>
    %909 = vector.broadcast %27 : vector<1x96xf32> to vector<2x96xf32>
    %910 = arith.addf %908, %909 : vector<2x96xf32>
    %911 = vector.extract_strided_slice %906 {offsets = [0, 0], sizes = [2, 32], strides = [1, 1]} : vector<2x96xf32> to vector<2x32xf32>
    %912 = vector.extract_strided_slice %910 {offsets = [0, 0], sizes = [2, 32], strides = [1, 1]} : vector<2x96xf32> to vector<2x32xf32>
    %913 = arith.addf %911, %912 : vector<2x32xf32>
    %914 = arith.negf %913 : vector<2x32xf32>
    %915 = math.exp %914 : vector<2x32xf32>
    %cst_267 = arith.constant 1.000000e+00 : f32
    %916 = vector.broadcast %cst_267 : f32 to vector<2x32xf32>
    %917 = arith.addf %916, %915 : vector<2x32xf32>
    %918 = arith.divf %916, %917 : vector<2x32xf32>
    %919 = vector.extract_strided_slice %906 {offsets = [0, 32], sizes = [2, 32], strides = [1, 1]} : vector<2x96xf32> to vector<2x32xf32>
    %920 = vector.extract_strided_slice %910 {offsets = [0, 32], sizes = [2, 32], strides = [1, 1]} : vector<2x96xf32> to vector<2x32xf32>
    %921 = arith.addf %919, %920 : vector<2x32xf32>
    %922 = arith.negf %921 : vector<2x32xf32>
    %923 = math.exp %922 : vector<2x32xf32>
    %cst_268 = arith.constant 1.000000e+00 : f32
    %924 = vector.broadcast %cst_268 : f32 to vector<2x32xf32>
    %925 = arith.addf %924, %923 : vector<2x32xf32>
    %926 = arith.divf %924, %925 : vector<2x32xf32>
    %927 = vector.extract_strided_slice %906 {offsets = [0, 64], sizes = [2, 32], strides = [1, 1]} : vector<2x96xf32> to vector<2x32xf32>
    %928 = vector.extract_strided_slice %910 {offsets = [0, 64], sizes = [2, 32], strides = [1, 1]} : vector<2x96xf32> to vector<2x32xf32>
    %929 = arith.mulf %918, %928 : vector<2x32xf32>
    %930 = arith.addf %927, %929 : vector<2x32xf32>
    %931 = math.tanh %930 : vector<2x32xf32>
    %cst_269 = arith.constant 1.000000e+00 : f32
    %932 = vector.broadcast %cst_269 : f32 to vector<2x32xf32>
    %933 = arith.subf %932, %926 : vector<2x32xf32>
    %934 = arith.mulf %933, %931 : vector<2x32xf32>
    %935 = arith.mulf %926, %898 : vector<2x32xf32>
    %936 = arith.addf %934, %935 : vector<2x32xf32>
    %cst_270 = arith.constant dense<0.000000e+00> : vector<2x128xf32>
    %937 = tpu.matmul %936, %28, %cst_270 {dimension_numbers = #tpu.dot_dimension_numbers<[1], [0], [0], [1], [0, 0, 1, 1], [], []>} : vector<2x32xf32>, vector<32x128xf32>, vector<2x128xf32> -> vector<2x128xf32>
    %938 = vector.broadcast %29 : vector<1x128xf32> to vector<2x128xf32>
    %939 = arith.addf %937, %938 : vector<2x128xf32>
    %c23_271 = arith.constant 23 : index
    %c0_272 = arith.constant 0 : index
    %c0_273 = arith.constant 0 : index
    %940 = vector.load %arg12[%c23_271, %c0_272, %c0_273] : memref<32x2x128xf32, #tpu.memory_space<vmem>>, vector<1x2x128xf32>
    %941 = vector.shape_cast %940 : vector<1x2x128xf32> to vector<2x128xf32>
    %942 = vector.shape_cast %939 : vector<2x128xf32> to vector<1x2x128xf32>
    tpu.vector_store %arg12[%c23_271, %c0_272, %c0_273], %942 {strides = array<i32>} : memref<32x2x128xf32, #tpu.memory_space<vmem>>, vector<1x2x128xf32>,
    %c24 = arith.constant 24 : index
    %c0_274 = arith.constant 0 : index
    %c0_275 = arith.constant 0 : index
    %943 = vector.load %arg13[%c24, %c0_274, %c0_275] : memref<32x2x96xf32, #tpu.memory_space<vmem>>, vector<1x2x96xf32>
    %944 = vector.shape_cast %943 : vector<1x2x96xf32> to vector<2x96xf32>
    %945 = arith.truncf %936 : vector<2x32xf32> to vector<2x32xbf16>
    %cst_276 = arith.constant dense<0.000000e+00> : vector<2x96xf32>
    %946 = tpu.matmul %945, %26, %cst_276 {dimension_numbers = #tpu.dot_dimension_numbers<[1], [0], [0], [1], [0, 0, 1, 1], [], []>} : vector<2x32xbf16>, vector<32x96xbf16>, vector<2x96xf32> -> vector<2x96xf32>
    %947 = vector.broadcast %27 : vector<1x96xf32> to vector<2x96xf32>
    %948 = arith.addf %946, %947 : vector<2x96xf32>
    %949 = vector.extract_strided_slice %944 {offsets = [0, 0], sizes = [2, 32], strides = [1, 1]} : vector<2x96xf32> to vector<2x32xf32>
    %950 = vector.extract_strided_slice %948 {offsets = [0, 0], sizes = [2, 32], strides = [1, 1]} : vector<2x96xf32> to vector<2x32xf32>
    %951 = arith.addf %949, %950 : vector<2x32xf32>
    %952 = arith.negf %951 : vector<2x32xf32>
    %953 = math.exp %952 : vector<2x32xf32>
    %cst_277 = arith.constant 1.000000e+00 : f32
    %954 = vector.broadcast %cst_277 : f32 to vector<2x32xf32>
    %955 = arith.addf %954, %953 : vector<2x32xf32>
    %956 = arith.divf %954, %955 : vector<2x32xf32>
    %957 = vector.extract_strided_slice %944 {offsets = [0, 32], sizes = [2, 32], strides = [1, 1]} : vector<2x96xf32> to vector<2x32xf32>
    %958 = vector.extract_strided_slice %948 {offsets = [0, 32], sizes = [2, 32], strides = [1, 1]} : vector<2x96xf32> to vector<2x32xf32>
    %959 = arith.addf %957, %958 : vector<2x32xf32>
    %960 = arith.negf %959 : vector<2x32xf32>
    %961 = math.exp %960 : vector<2x32xf32>
    %cst_278 = arith.constant 1.000000e+00 : f32
    %962 = vector.broadcast %cst_278 : f32 to vector<2x32xf32>
    %963 = arith.addf %962, %961 : vector<2x32xf32>
    %964 = arith.divf %962, %963 : vector<2x32xf32>
    %965 = vector.extract_strided_slice %944 {offsets = [0, 64], sizes = [2, 32], strides = [1, 1]} : vector<2x96xf32> to vector<2x32xf32>
    %966 = vector.extract_strided_slice %948 {offsets = [0, 64], sizes = [2, 32], strides = [1, 1]} : vector<2x96xf32> to vector<2x32xf32>
    %967 = arith.mulf %956, %966 : vector<2x32xf32>
    %968 = arith.addf %965, %967 : vector<2x32xf32>
    %969 = math.tanh %968 : vector<2x32xf32>
    %cst_279 = arith.constant 1.000000e+00 : f32
    %970 = vector.broadcast %cst_279 : f32 to vector<2x32xf32>
    %971 = arith.subf %970, %964 : vector<2x32xf32>
    %972 = arith.mulf %971, %969 : vector<2x32xf32>
    %973 = arith.mulf %964, %936 : vector<2x32xf32>
    %974 = arith.addf %972, %973 : vector<2x32xf32>
    %cst_280 = arith.constant dense<0.000000e+00> : vector<2x128xf32>
    %975 = tpu.matmul %974, %28, %cst_280 {dimension_numbers = #tpu.dot_dimension_numbers<[1], [0], [0], [1], [0, 0, 1, 1], [], []>} : vector<2x32xf32>, vector<32x128xf32>, vector<2x128xf32> -> vector<2x128xf32>
    %976 = vector.broadcast %29 : vector<1x128xf32> to vector<2x128xf32>
    %977 = arith.addf %975, %976 : vector<2x128xf32>
    %c24_281 = arith.constant 24 : index
    %c0_282 = arith.constant 0 : index
    %c0_283 = arith.constant 0 : index
    %978 = vector.load %arg12[%c24_281, %c0_282, %c0_283] : memref<32x2x128xf32, #tpu.memory_space<vmem>>, vector<1x2x128xf32>
    %979 = vector.shape_cast %978 : vector<1x2x128xf32> to vector<2x128xf32>
    %980 = vector.shape_cast %977 : vector<2x128xf32> to vector<1x2x128xf32>
    tpu.vector_store %arg12[%c24_281, %c0_282, %c0_283], %980 {strides = array<i32>} : memref<32x2x128xf32, #tpu.memory_space<vmem>>, vector<1x2x128xf32>,
    %c25 = arith.constant 25 : index
    %c0_284 = arith.constant 0 : index
    %c0_285 = arith.constant 0 : index
    %981 = vector.load %arg13[%c25, %c0_284, %c0_285] : memref<32x2x96xf32, #tpu.memory_space<vmem>>, vector<1x2x96xf32>
    %982 = vector.shape_cast %981 : vector<1x2x96xf32> to vector<2x96xf32>
    %983 = arith.truncf %974 : vector<2x32xf32> to vector<2x32xbf16>
    %cst_286 = arith.constant dense<0.000000e+00> : vector<2x96xf32>
    %984 = tpu.matmul %983, %26, %cst_286 {dimension_numbers = #tpu.dot_dimension_numbers<[1], [0], [0], [1], [0, 0, 1, 1], [], []>} : vector<2x32xbf16>, vector<32x96xbf16>, vector<2x96xf32> -> vector<2x96xf32>
    %985 = vector.broadcast %27 : vector<1x96xf32> to vector<2x96xf32>
    %986 = arith.addf %984, %985 : vector<2x96xf32>
    %987 = vector.extract_strided_slice %982 {offsets = [0, 0], sizes = [2, 32], strides = [1, 1]} : vector<2x96xf32> to vector<2x32xf32>
    %988 = vector.extract_strided_slice %986 {offsets = [0, 0], sizes = [2, 32], strides = [1, 1]} : vector<2x96xf32> to vector<2x32xf32>
    %989 = arith.addf %987, %988 : vector<2x32xf32>
    %990 = arith.negf %989 : vector<2x32xf32>
    %991 = math.exp %990 : vector<2x32xf32>
    %cst_287 = arith.constant 1.000000e+00 : f32
    %992 = vector.broadcast %cst_287 : f32 to vector<2x32xf32>
    %993 = arith.addf %992, %991 : vector<2x32xf32>
    %994 = arith.divf %992, %993 : vector<2x32xf32>
    %995 = vector.extract_strided_slice %982 {offsets = [0, 32], sizes = [2, 32], strides = [1, 1]} : vector<2x96xf32> to vector<2x32xf32>
    %996 = vector.extract_strided_slice %986 {offsets = [0, 32], sizes = [2, 32], strides = [1, 1]} : vector<2x96xf32> to vector<2x32xf32>
    %997 = arith.addf %995, %996 : vector<2x32xf32>
    %998 = arith.negf %997 : vector<2x32xf32>
    %999 = math.exp %998 : vector<2x32xf32>
    %cst_288 = arith.constant 1.000000e+00 : f32
    %1000 = vector.broadcast %cst_288 : f32 to vector<2x32xf32>
    %1001 = arith.addf %1000, %999 : vector<2x32xf32>
    %1002 = arith.divf %1000, %1001 : vector<2x32xf32>
    %1003 = vector.extract_strided_slice %982 {offsets = [0, 64], sizes = [2, 32], strides = [1, 1]} : vector<2x96xf32> to vector<2x32xf32>
    %1004 = vector.extract_strided_slice %986 {offsets = [0, 64], sizes = [2, 32], strides = [1, 1]} : vector<2x96xf32> to vector<2x32xf32>
    %1005 = arith.mulf %994, %1004 : vector<2x32xf32>
    %1006 = arith.addf %1003, %1005 : vector<2x32xf32>
    %1007 = math.tanh %1006 : vector<2x32xf32>
    %cst_289 = arith.constant 1.000000e+00 : f32
    %1008 = vector.broadcast %cst_289 : f32 to vector<2x32xf32>
    %1009 = arith.subf %1008, %1002 : vector<2x32xf32>
    %1010 = arith.mulf %1009, %1007 : vector<2x32xf32>
    %1011 = arith.mulf %1002, %974 : vector<2x32xf32>
    %1012 = arith.addf %1010, %1011 : vector<2x32xf32>
    %cst_290 = arith.constant dense<0.000000e+00> : vector<2x128xf32>
    %1013 = tpu.matmul %1012, %28, %cst_290 {dimension_numbers = #tpu.dot_dimension_numbers<[1], [0], [0], [1], [0, 0, 1, 1], [], []>} : vector<2x32xf32>, vector<32x128xf32>, vector<2x128xf32> -> vector<2x128xf32>
    %1014 = vector.broadcast %29 : vector<1x128xf32> to vector<2x128xf32>
    %1015 = arith.addf %1013, %1014 : vector<2x128xf32>
    %c25_291 = arith.constant 25 : index
    %c0_292 = arith.constant 0 : index
    %c0_293 = arith.constant 0 : index
    %1016 = vector.load %arg12[%c25_291, %c0_292, %c0_293] : memref<32x2x128xf32, #tpu.memory_space<vmem>>, vector<1x2x128xf32>
    %1017 = vector.shape_cast %1016 : vector<1x2x128xf32> to vector<2x128xf32>
    %1018 = vector.shape_cast %1015 : vector<2x128xf32> to vector<1x2x128xf32>
    tpu.vector_store %arg12[%c25_291, %c0_292, %c0_293], %1018 {strides = array<i32>} : memref<32x2x128xf32, #tpu.memory_space<vmem>>, vector<1x2x128xf32>,
    %c26 = arith.constant 26 : index
    %c0_294 = arith.constant 0 : index
    %c0_295 = arith.constant 0 : index
    %1019 = vector.load %arg13[%c26, %c0_294, %c0_295] : memref<32x2x96xf32, #tpu.memory_space<vmem>>, vector<1x2x96xf32>
    %1020 = vector.shape_cast %1019 : vector<1x2x96xf32> to vector<2x96xf32>
    %1021 = arith.truncf %1012 : vector<2x32xf32> to vector<2x32xbf16>
    %cst_296 = arith.constant dense<0.000000e+00> : vector<2x96xf32>
    %1022 = tpu.matmul %1021, %26, %cst_296 {dimension_numbers = #tpu.dot_dimension_numbers<[1], [0], [0], [1], [0, 0, 1, 1], [], []>} : vector<2x32xbf16>, vector<32x96xbf16>, vector<2x96xf32> -> vector<2x96xf32>
    %1023 = vector.broadcast %27 : vector<1x96xf32> to vector<2x96xf32>
    %1024 = arith.addf %1022, %1023 : vector<2x96xf32>
    %1025 = vector.extract_strided_slice %1020 {offsets = [0, 0], sizes = [2, 32], strides = [1, 1]} : vector<2x96xf32> to vector<2x32xf32>
    %1026 = vector.extract_strided_slice %1024 {offsets = [0, 0], sizes = [2, 32], strides = [1, 1]} : vector<2x96xf32> to vector<2x32xf32>
    %1027 = arith.addf %1025, %1026 : vector<2x32xf32>
    %1028 = arith.negf %1027 : vector<2x32xf32>
    %1029 = math.exp %1028 : vector<2x32xf32>
    %cst_297 = arith.constant 1.000000e+00 : f32
    %1030 = vector.broadcast %cst_297 : f32 to vector<2x32xf32>
    %1031 = arith.addf %1030, %1029 : vector<2x32xf32>
    %1032 = arith.divf %1030, %1031 : vector<2x32xf32>
    %1033 = vector.extract_strided_slice %1020 {offsets = [0, 32], sizes = [2, 32], strides = [1, 1]} : vector<2x96xf32> to vector<2x32xf32>
    %1034 = vector.extract_strided_slice %1024 {offsets = [0, 32], sizes = [2, 32], strides = [1, 1]} : vector<2x96xf32> to vector<2x32xf32>
    %1035 = arith.addf %1033, %1034 : vector<2x32xf32>
    %1036 = arith.negf %1035 : vector<2x32xf32>
    %1037 = math.exp %1036 : vector<2x32xf32>
    %cst_298 = arith.constant 1.000000e+00 : f32
    %1038 = vector.broadcast %cst_298 : f32 to vector<2x32xf32>
    %1039 = arith.addf %1038, %1037 : vector<2x32xf32>
    %1040 = arith.divf %1038, %1039 : vector<2x32xf32>
    %1041 = vector.extract_strided_slice %1020 {offsets = [0, 64], sizes = [2, 32], strides = [1, 1]} : vector<2x96xf32> to vector<2x32xf32>
    %1042 = vector.extract_strided_slice %1024 {offsets = [0, 64], sizes = [2, 32], strides = [1, 1]} : vector<2x96xf32> to vector<2x32xf32>
    %1043 = arith.mulf %1032, %1042 : vector<2x32xf32>
    %1044 = arith.addf %1041, %1043 : vector<2x32xf32>
    %1045 = math.tanh %1044 : vector<2x32xf32>
    %cst_299 = arith.constant 1.000000e+00 : f32
    %1046 = vector.broadcast %cst_299 : f32 to vector<2x32xf32>
    %1047 = arith.subf %1046, %1040 : vector<2x32xf32>
    %1048 = arith.mulf %1047, %1045 : vector<2x32xf32>
    %1049 = arith.mulf %1040, %1012 : vector<2x32xf32>
    %1050 = arith.addf %1048, %1049 : vector<2x32xf32>
    %cst_300 = arith.constant dense<0.000000e+00> : vector<2x128xf32>
    %1051 = tpu.matmul %1050, %28, %cst_300 {dimension_numbers = #tpu.dot_dimension_numbers<[1], [0], [0], [1], [0, 0, 1, 1], [], []>} : vector<2x32xf32>, vector<32x128xf32>, vector<2x128xf32> -> vector<2x128xf32>
    %1052 = vector.broadcast %29 : vector<1x128xf32> to vector<2x128xf32>
    %1053 = arith.addf %1051, %1052 : vector<2x128xf32>
    %c26_301 = arith.constant 26 : index
    %c0_302 = arith.constant 0 : index
    %c0_303 = arith.constant 0 : index
    %1054 = vector.load %arg12[%c26_301, %c0_302, %c0_303] : memref<32x2x128xf32, #tpu.memory_space<vmem>>, vector<1x2x128xf32>
    %1055 = vector.shape_cast %1054 : vector<1x2x128xf32> to vector<2x128xf32>
    %1056 = vector.shape_cast %1053 : vector<2x128xf32> to vector<1x2x128xf32>
    tpu.vector_store %arg12[%c26_301, %c0_302, %c0_303], %1056 {strides = array<i32>} : memref<32x2x128xf32, #tpu.memory_space<vmem>>, vector<1x2x128xf32>,
    %c27 = arith.constant 27 : index
    %c0_304 = arith.constant 0 : index
    %c0_305 = arith.constant 0 : index
    %1057 = vector.load %arg13[%c27, %c0_304, %c0_305] : memref<32x2x96xf32, #tpu.memory_space<vmem>>, vector<1x2x96xf32>
    %1058 = vector.shape_cast %1057 : vector<1x2x96xf32> to vector<2x96xf32>
    %1059 = arith.truncf %1050 : vector<2x32xf32> to vector<2x32xbf16>
    %cst_306 = arith.constant dense<0.000000e+00> : vector<2x96xf32>
    %1060 = tpu.matmul %1059, %26, %cst_306 {dimension_numbers = #tpu.dot_dimension_numbers<[1], [0], [0], [1], [0, 0, 1, 1], [], []>} : vector<2x32xbf16>, vector<32x96xbf16>, vector<2x96xf32> -> vector<2x96xf32>
    %1061 = vector.broadcast %27 : vector<1x96xf32> to vector<2x96xf32>
    %1062 = arith.addf %1060, %1061 : vector<2x96xf32>
    %1063 = vector.extract_strided_slice %1058 {offsets = [0, 0], sizes = [2, 32], strides = [1, 1]} : vector<2x96xf32> to vector<2x32xf32>
    %1064 = vector.extract_strided_slice %1062 {offsets = [0, 0], sizes = [2, 32], strides = [1, 1]} : vector<2x96xf32> to vector<2x32xf32>
    %1065 = arith.addf %1063, %1064 : vector<2x32xf32>
    %1066 = arith.negf %1065 : vector<2x32xf32>
    %1067 = math.exp %1066 : vector<2x32xf32>
    %cst_307 = arith.constant 1.000000e+00 : f32
    %1068 = vector.broadcast %cst_307 : f32 to vector<2x32xf32>
    %1069 = arith.addf %1068, %1067 : vector<2x32xf32>
    %1070 = arith.divf %1068, %1069 : vector<2x32xf32>
    %1071 = vector.extract_strided_slice %1058 {offsets = [0, 32], sizes = [2, 32], strides = [1, 1]} : vector<2x96xf32> to vector<2x32xf32>
    %1072 = vector.extract_strided_slice %1062 {offsets = [0, 32], sizes = [2, 32], strides = [1, 1]} : vector<2x96xf32> to vector<2x32xf32>
    %1073 = arith.addf %1071, %1072 : vector<2x32xf32>
    %1074 = arith.negf %1073 : vector<2x32xf32>
    %1075 = math.exp %1074 : vector<2x32xf32>
    %cst_308 = arith.constant 1.000000e+00 : f32
    %1076 = vector.broadcast %cst_308 : f32 to vector<2x32xf32>
    %1077 = arith.addf %1076, %1075 : vector<2x32xf32>
    %1078 = arith.divf %1076, %1077 : vector<2x32xf32>
    %1079 = vector.extract_strided_slice %1058 {offsets = [0, 64], sizes = [2, 32], strides = [1, 1]} : vector<2x96xf32> to vector<2x32xf32>
    %1080 = vector.extract_strided_slice %1062 {offsets = [0, 64], sizes = [2, 32], strides = [1, 1]} : vector<2x96xf32> to vector<2x32xf32>
    %1081 = arith.mulf %1070, %1080 : vector<2x32xf32>
    %1082 = arith.addf %1079, %1081 : vector<2x32xf32>
    %1083 = math.tanh %1082 : vector<2x32xf32>
    %cst_309 = arith.constant 1.000000e+00 : f32
    %1084 = vector.broadcast %cst_309 : f32 to vector<2x32xf32>
    %1085 = arith.subf %1084, %1078 : vector<2x32xf32>
    %1086 = arith.mulf %1085, %1083 : vector<2x32xf32>
    %1087 = arith.mulf %1078, %1050 : vector<2x32xf32>
    %1088 = arith.addf %1086, %1087 : vector<2x32xf32>
    %cst_310 = arith.constant dense<0.000000e+00> : vector<2x128xf32>
    %1089 = tpu.matmul %1088, %28, %cst_310 {dimension_numbers = #tpu.dot_dimension_numbers<[1], [0], [0], [1], [0, 0, 1, 1], [], []>} : vector<2x32xf32>, vector<32x128xf32>, vector<2x128xf32> -> vector<2x128xf32>
    %1090 = vector.broadcast %29 : vector<1x128xf32> to vector<2x128xf32>
    %1091 = arith.addf %1089, %1090 : vector<2x128xf32>
    %c27_311 = arith.constant 27 : index
    %c0_312 = arith.constant 0 : index
    %c0_313 = arith.constant 0 : index
    %1092 = vector.load %arg12[%c27_311, %c0_312, %c0_313] : memref<32x2x128xf32, #tpu.memory_space<vmem>>, vector<1x2x128xf32>
    %1093 = vector.shape_cast %1092 : vector<1x2x128xf32> to vector<2x128xf32>
    %1094 = vector.shape_cast %1091 : vector<2x128xf32> to vector<1x2x128xf32>
    tpu.vector_store %arg12[%c27_311, %c0_312, %c0_313], %1094 {strides = array<i32>} : memref<32x2x128xf32, #tpu.memory_space<vmem>>, vector<1x2x128xf32>,
    %c28 = arith.constant 28 : index
    %c0_314 = arith.constant 0 : index
    %c0_315 = arith.constant 0 : index
    %1095 = vector.load %arg13[%c28, %c0_314, %c0_315] : memref<32x2x96xf32, #tpu.memory_space<vmem>>, vector<1x2x96xf32>
    %1096 = vector.shape_cast %1095 : vector<1x2x96xf32> to vector<2x96xf32>
    %1097 = arith.truncf %1088 : vector<2x32xf32> to vector<2x32xbf16>
    %cst_316 = arith.constant dense<0.000000e+00> : vector<2x96xf32>
    %1098 = tpu.matmul %1097, %26, %cst_316 {dimension_numbers = #tpu.dot_dimension_numbers<[1], [0], [0], [1], [0, 0, 1, 1], [], []>} : vector<2x32xbf16>, vector<32x96xbf16>, vector<2x96xf32> -> vector<2x96xf32>
    %1099 = vector.broadcast %27 : vector<1x96xf32> to vector<2x96xf32>
    %1100 = arith.addf %1098, %1099 : vector<2x96xf32>
    %1101 = vector.extract_strided_slice %1096 {offsets = [0, 0], sizes = [2, 32], strides = [1, 1]} : vector<2x96xf32> to vector<2x32xf32>
    %1102 = vector.extract_strided_slice %1100 {offsets = [0, 0], sizes = [2, 32], strides = [1, 1]} : vector<2x96xf32> to vector<2x32xf32>
    %1103 = arith.addf %1101, %1102 : vector<2x32xf32>
    %1104 = arith.negf %1103 : vector<2x32xf32>
    %1105 = math.exp %1104 : vector<2x32xf32>
    %cst_317 = arith.constant 1.000000e+00 : f32
    %1106 = vector.broadcast %cst_317 : f32 to vector<2x32xf32>
    %1107 = arith.addf %1106, %1105 : vector<2x32xf32>
    %1108 = arith.divf %1106, %1107 : vector<2x32xf32>
    %1109 = vector.extract_strided_slice %1096 {offsets = [0, 32], sizes = [2, 32], strides = [1, 1]} : vector<2x96xf32> to vector<2x32xf32>
    %1110 = vector.extract_strided_slice %1100 {offsets = [0, 32], sizes = [2, 32], strides = [1, 1]} : vector<2x96xf32> to vector<2x32xf32>
    %1111 = arith.addf %1109, %1110 : vector<2x32xf32>
    %1112 = arith.negf %1111 : vector<2x32xf32>
    %1113 = math.exp %1112 : vector<2x32xf32>
    %cst_318 = arith.constant 1.000000e+00 : f32
    %1114 = vector.broadcast %cst_318 : f32 to vector<2x32xf32>
    %1115 = arith.addf %1114, %1113 : vector<2x32xf32>
    %1116 = arith.divf %1114, %1115 : vector<2x32xf32>
    %1117 = vector.extract_strided_slice %1096 {offsets = [0, 64], sizes = [2, 32], strides = [1, 1]} : vector<2x96xf32> to vector<2x32xf32>
    %1118 = vector.extract_strided_slice %1100 {offsets = [0, 64], sizes = [2, 32], strides = [1, 1]} : vector<2x96xf32> to vector<2x32xf32>
    %1119 = arith.mulf %1108, %1118 : vector<2x32xf32>
    %1120 = arith.addf %1117, %1119 : vector<2x32xf32>
    %1121 = math.tanh %1120 : vector<2x32xf32>
    %cst_319 = arith.constant 1.000000e+00 : f32
    %1122 = vector.broadcast %cst_319 : f32 to vector<2x32xf32>
    %1123 = arith.subf %1122, %1116 : vector<2x32xf32>
    %1124 = arith.mulf %1123, %1121 : vector<2x32xf32>
    %1125 = arith.mulf %1116, %1088 : vector<2x32xf32>
    %1126 = arith.addf %1124, %1125 : vector<2x32xf32>
    %cst_320 = arith.constant dense<0.000000e+00> : vector<2x128xf32>
    %1127 = tpu.matmul %1126, %28, %cst_320 {dimension_numbers = #tpu.dot_dimension_numbers<[1], [0], [0], [1], [0, 0, 1, 1], [], []>} : vector<2x32xf32>, vector<32x128xf32>, vector<2x128xf32> -> vector<2x128xf32>
    %1128 = vector.broadcast %29 : vector<1x128xf32> to vector<2x128xf32>
    %1129 = arith.addf %1127, %1128 : vector<2x128xf32>
    %c28_321 = arith.constant 28 : index
    %c0_322 = arith.constant 0 : index
    %c0_323 = arith.constant 0 : index
    %1130 = vector.load %arg12[%c28_321, %c0_322, %c0_323] : memref<32x2x128xf32, #tpu.memory_space<vmem>>, vector<1x2x128xf32>
    %1131 = vector.shape_cast %1130 : vector<1x2x128xf32> to vector<2x128xf32>
    %1132 = vector.shape_cast %1129 : vector<2x128xf32> to vector<1x2x128xf32>
    tpu.vector_store %arg12[%c28_321, %c0_322, %c0_323], %1132 {strides = array<i32>} : memref<32x2x128xf32, #tpu.memory_space<vmem>>, vector<1x2x128xf32>,
    %c29 = arith.constant 29 : index
    %c0_324 = arith.constant 0 : index
    %c0_325 = arith.constant 0 : index
    %1133 = vector.load %arg13[%c29, %c0_324, %c0_325] : memref<32x2x96xf32, #tpu.memory_space<vmem>>, vector<1x2x96xf32>
    %1134 = vector.shape_cast %1133 : vector<1x2x96xf32> to vector<2x96xf32>
    %1135 = arith.truncf %1126 : vector<2x32xf32> to vector<2x32xbf16>
    %cst_326 = arith.constant dense<0.000000e+00> : vector<2x96xf32>
    %1136 = tpu.matmul %1135, %26, %cst_326 {dimension_numbers = #tpu.dot_dimension_numbers<[1], [0], [0], [1], [0, 0, 1, 1], [], []>} : vector<2x32xbf16>, vector<32x96xbf16>, vector<2x96xf32> -> vector<2x96xf32>
    %1137 = vector.broadcast %27 : vector<1x96xf32> to vector<2x96xf32>
    %1138 = arith.addf %1136, %1137 : vector<2x96xf32>
    %1139 = vector.extract_strided_slice %1134 {offsets = [0, 0], sizes = [2, 32], strides = [1, 1]} : vector<2x96xf32> to vector<2x32xf32>
    %1140 = vector.extract_strided_slice %1138 {offsets = [0, 0], sizes = [2, 32], strides = [1, 1]} : vector<2x96xf32> to vector<2x32xf32>
    %1141 = arith.addf %1139, %1140 : vector<2x32xf32>
    %1142 = arith.negf %1141 : vector<2x32xf32>
    %1143 = math.exp %1142 : vector<2x32xf32>
    %cst_327 = arith.constant 1.000000e+00 : f32
    %1144 = vector.broadcast %cst_327 : f32 to vector<2x32xf32>
    %1145 = arith.addf %1144, %1143 : vector<2x32xf32>
    %1146 = arith.divf %1144, %1145 : vector<2x32xf32>
    %1147 = vector.extract_strided_slice %1134 {offsets = [0, 32], sizes = [2, 32], strides = [1, 1]} : vector<2x96xf32> to vector<2x32xf32>
    %1148 = vector.extract_strided_slice %1138 {offsets = [0, 32], sizes = [2, 32], strides = [1, 1]} : vector<2x96xf32> to vector<2x32xf32>
    %1149 = arith.addf %1147, %1148 : vector<2x32xf32>
    %1150 = arith.negf %1149 : vector<2x32xf32>
    %1151 = math.exp %1150 : vector<2x32xf32>
    %cst_328 = arith.constant 1.000000e+00 : f32
    %1152 = vector.broadcast %cst_328 : f32 to vector<2x32xf32>
    %1153 = arith.addf %1152, %1151 : vector<2x32xf32>
    %1154 = arith.divf %1152, %1153 : vector<2x32xf32>
    %1155 = vector.extract_strided_slice %1134 {offsets = [0, 64], sizes = [2, 32], strides = [1, 1]} : vector<2x96xf32> to vector<2x32xf32>
    %1156 = vector.extract_strided_slice %1138 {offsets = [0, 64], sizes = [2, 32], strides = [1, 1]} : vector<2x96xf32> to vector<2x32xf32>
    %1157 = arith.mulf %1146, %1156 : vector<2x32xf32>
    %1158 = arith.addf %1155, %1157 : vector<2x32xf32>
    %1159 = math.tanh %1158 : vector<2x32xf32>
    %cst_329 = arith.constant 1.000000e+00 : f32
    %1160 = vector.broadcast %cst_329 : f32 to vector<2x32xf32>
    %1161 = arith.subf %1160, %1154 : vector<2x32xf32>
    %1162 = arith.mulf %1161, %1159 : vector<2x32xf32>
    %1163 = arith.mulf %1154, %1126 : vector<2x32xf32>
    %1164 = arith.addf %1162, %1163 : vector<2x32xf32>
    %cst_330 = arith.constant dense<0.000000e+00> : vector<2x128xf32>
    %1165 = tpu.matmul %1164, %28, %cst_330 {dimension_numbers = #tpu.dot_dimension_numbers<[1], [0], [0], [1], [0, 0, 1, 1], [], []>} : vector<2x32xf32>, vector<32x128xf32>, vector<2x128xf32> -> vector<2x128xf32>
    %1166 = vector.broadcast %29 : vector<1x128xf32> to vector<2x128xf32>
    %1167 = arith.addf %1165, %1166 : vector<2x128xf32>
    %c29_331 = arith.constant 29 : index
    %c0_332 = arith.constant 0 : index
    %c0_333 = arith.constant 0 : index
    %1168 = vector.load %arg12[%c29_331, %c0_332, %c0_333] : memref<32x2x128xf32, #tpu.memory_space<vmem>>, vector<1x2x128xf32>
    %1169 = vector.shape_cast %1168 : vector<1x2x128xf32> to vector<2x128xf32>
    %1170 = vector.shape_cast %1167 : vector<2x128xf32> to vector<1x2x128xf32>
    tpu.vector_store %arg12[%c29_331, %c0_332, %c0_333], %1170 {strides = array<i32>} : memref<32x2x128xf32, #tpu.memory_space<vmem>>, vector<1x2x128xf32>,
    %c30 = arith.constant 30 : index
    %c0_334 = arith.constant 0 : index
    %c0_335 = arith.constant 0 : index
    %1171 = vector.load %arg13[%c30, %c0_334, %c0_335] : memref<32x2x96xf32, #tpu.memory_space<vmem>>, vector<1x2x96xf32>
    %1172 = vector.shape_cast %1171 : vector<1x2x96xf32> to vector<2x96xf32>
    %1173 = arith.truncf %1164 : vector<2x32xf32> to vector<2x32xbf16>
    %cst_336 = arith.constant dense<0.000000e+00> : vector<2x96xf32>
    %1174 = tpu.matmul %1173, %26, %cst_336 {dimension_numbers = #tpu.dot_dimension_numbers<[1], [0], [0], [1], [0, 0, 1, 1], [], []>} : vector<2x32xbf16>, vector<32x96xbf16>, vector<2x96xf32> -> vector<2x96xf32>
    %1175 = vector.broadcast %27 : vector<1x96xf32> to vector<2x96xf32>
    %1176 = arith.addf %1174, %1175 : vector<2x96xf32>
    %1177 = vector.extract_strided_slice %1172 {offsets = [0, 0], sizes = [2, 32], strides = [1, 1]} : vector<2x96xf32> to vector<2x32xf32>
    %1178 = vector.extract_strided_slice %1176 {offsets = [0, 0], sizes = [2, 32], strides = [1, 1]} : vector<2x96xf32> to vector<2x32xf32>
    %1179 = arith.addf %1177, %1178 : vector<2x32xf32>
    %1180 = arith.negf %1179 : vector<2x32xf32>
    %1181 = math.exp %1180 : vector<2x32xf32>
    %cst_337 = arith.constant 1.000000e+00 : f32
    %1182 = vector.broadcast %cst_337 : f32 to vector<2x32xf32>
    %1183 = arith.addf %1182, %1181 : vector<2x32xf32>
    %1184 = arith.divf %1182, %1183 : vector<2x32xf32>
    %1185 = vector.extract_strided_slice %1172 {offsets = [0, 32], sizes = [2, 32], strides = [1, 1]} : vector<2x96xf32> to vector<2x32xf32>
    %1186 = vector.extract_strided_slice %1176 {offsets = [0, 32], sizes = [2, 32], strides = [1, 1]} : vector<2x96xf32> to vector<2x32xf32>
    %1187 = arith.addf %1185, %1186 : vector<2x32xf32>
    %1188 = arith.negf %1187 : vector<2x32xf32>
    %1189 = math.exp %1188 : vector<2x32xf32>
    %cst_338 = arith.constant 1.000000e+00 : f32
    %1190 = vector.broadcast %cst_338 : f32 to vector<2x32xf32>
    %1191 = arith.addf %1190, %1189 : vector<2x32xf32>
    %1192 = arith.divf %1190, %1191 : vector<2x32xf32>
    %1193 = vector.extract_strided_slice %1172 {offsets = [0, 64], sizes = [2, 32], strides = [1, 1]} : vector<2x96xf32> to vector<2x32xf32>
    %1194 = vector.extract_strided_slice %1176 {offsets = [0, 64], sizes = [2, 32], strides = [1, 1]} : vector<2x96xf32> to vector<2x32xf32>
    %1195 = arith.mulf %1184, %1194 : vector<2x32xf32>
    %1196 = arith.addf %1193, %1195 : vector<2x32xf32>
    %1197 = math.tanh %1196 : vector<2x32xf32>
    %cst_339 = arith.constant 1.000000e+00 : f32
    %1198 = vector.broadcast %cst_339 : f32 to vector<2x32xf32>
    %1199 = arith.subf %1198, %1192 : vector<2x32xf32>
    %1200 = arith.mulf %1199, %1197 : vector<2x32xf32>
    %1201 = arith.mulf %1192, %1164 : vector<2x32xf32>
    %1202 = arith.addf %1200, %1201 : vector<2x32xf32>
    %cst_340 = arith.constant dense<0.000000e+00> : vector<2x128xf32>
    %1203 = tpu.matmul %1202, %28, %cst_340 {dimension_numbers = #tpu.dot_dimension_numbers<[1], [0], [0], [1], [0, 0, 1, 1], [], []>} : vector<2x32xf32>, vector<32x128xf32>, vector<2x128xf32> -> vector<2x128xf32>
    %1204 = vector.broadcast %29 : vector<1x128xf32> to vector<2x128xf32>
    %1205 = arith.addf %1203, %1204 : vector<2x128xf32>
    %c30_341 = arith.constant 30 : index
    %c0_342 = arith.constant 0 : index
    %c0_343 = arith.constant 0 : index
    %1206 = vector.load %arg12[%c30_341, %c0_342, %c0_343] : memref<32x2x128xf32, #tpu.memory_space<vmem>>, vector<1x2x128xf32>
    %1207 = vector.shape_cast %1206 : vector<1x2x128xf32> to vector<2x128xf32>
    %1208 = vector.shape_cast %1205 : vector<2x128xf32> to vector<1x2x128xf32>
    tpu.vector_store %arg12[%c30_341, %c0_342, %c0_343], %1208 {strides = array<i32>} : memref<32x2x128xf32, #tpu.memory_space<vmem>>, vector<1x2x128xf32>,
    %c31 = arith.constant 31 : index
    %c0_344 = arith.constant 0 : index
    %c0_345 = arith.constant 0 : index
    %1209 = vector.load %arg13[%c31, %c0_344, %c0_345] : memref<32x2x96xf32, #tpu.memory_space<vmem>>, vector<1x2x96xf32>
    %1210 = vector.shape_cast %1209 : vector<1x2x96xf32> to vector<2x96xf32>
    %1211 = arith.truncf %1202 : vector<2x32xf32> to vector<2x32xbf16>
    %cst_346 = arith.constant dense<0.000000e+00> : vector<2x96xf32>
    %1212 = tpu.matmul %1211, %26, %cst_346 {dimension_numbers = #tpu.dot_dimension_numbers<[1], [0], [0], [1], [0, 0, 1, 1], [], []>} : vector<2x32xbf16>, vector<32x96xbf16>, vector<2x96xf32> -> vector<2x96xf32>
    %1213 = vector.broadcast %27 : vector<1x96xf32> to vector<2x96xf32>
    %1214 = arith.addf %1212, %1213 : vector<2x96xf32>
    %1215 = vector.extract_strided_slice %1210 {offsets = [0, 0], sizes = [2, 32], strides = [1, 1]} : vector<2x96xf32> to vector<2x32xf32>
    %1216 = vector.extract_strided_slice %1214 {offsets = [0, 0], sizes = [2, 32], strides = [1, 1]} : vector<2x96xf32> to vector<2x32xf32>
    %1217 = arith.addf %1215, %1216 : vector<2x32xf32>
    %1218 = arith.negf %1217 : vector<2x32xf32>
    %1219 = math.exp %1218 : vector<2x32xf32>
    %cst_347 = arith.constant 1.000000e+00 : f32
    %1220 = vector.broadcast %cst_347 : f32 to vector<2x32xf32>
    %1221 = arith.addf %1220, %1219 : vector<2x32xf32>
    %1222 = arith.divf %1220, %1221 : vector<2x32xf32>
    %1223 = vector.extract_strided_slice %1210 {offsets = [0, 32], sizes = [2, 32], strides = [1, 1]} : vector<2x96xf32> to vector<2x32xf32>
    %1224 = vector.extract_strided_slice %1214 {offsets = [0, 32], sizes = [2, 32], strides = [1, 1]} : vector<2x96xf32> to vector<2x32xf32>
    %1225 = arith.addf %1223, %1224 : vector<2x32xf32>
    %1226 = arith.negf %1225 : vector<2x32xf32>
    %1227 = math.exp %1226 : vector<2x32xf32>
    %cst_348 = arith.constant 1.000000e+00 : f32
    %1228 = vector.broadcast %cst_348 : f32 to vector<2x32xf32>
    %1229 = arith.addf %1228, %1227 : vector<2x32xf32>
    %1230 = arith.divf %1228, %1229 : vector<2x32xf32>
    %1231 = vector.extract_strided_slice %1210 {offsets = [0, 64], sizes = [2, 32], strides = [1, 1]} : vector<2x96xf32> to vector<2x32xf32>
    %1232 = vector.extract_strided_slice %1214 {offsets = [0, 64], sizes = [2, 32], strides = [1, 1]} : vector<2x96xf32> to vector<2x32xf32>
    %1233 = arith.mulf %1222, %1232 : vector<2x32xf32>
    %1234 = arith.addf %1231, %1233 : vector<2x32xf32>
    %1235 = math.tanh %1234 : vector<2x32xf32>
    %cst_349 = arith.constant 1.000000e+00 : f32
    %1236 = vector.broadcast %cst_349 : f32 to vector<2x32xf32>
    %1237 = arith.subf %1236, %1230 : vector<2x32xf32>
    %1238 = arith.mulf %1237, %1235 : vector<2x32xf32>
    %1239 = arith.mulf %1230, %1202 : vector<2x32xf32>
    %1240 = arith.addf %1238, %1239 : vector<2x32xf32>
    %cst_350 = arith.constant dense<0.000000e+00> : vector<2x128xf32>
    %1241 = tpu.matmul %1240, %28, %cst_350 {dimension_numbers = #tpu.dot_dimension_numbers<[1], [0], [0], [1], [0, 0, 1, 1], [], []>} : vector<2x32xf32>, vector<32x128xf32>, vector<2x128xf32> -> vector<2x128xf32>
    %1242 = vector.broadcast %29 : vector<1x128xf32> to vector<2x128xf32>
    %1243 = arith.addf %1241, %1242 : vector<2x128xf32>
    %c31_351 = arith.constant 31 : index
    %c0_352 = arith.constant 0 : index
    %c0_353 = arith.constant 0 : index
    %1244 = vector.load %arg12[%c31_351, %c0_352, %c0_353] : memref<32x2x128xf32, #tpu.memory_space<vmem>>, vector<1x2x128xf32>
    %1245 = vector.shape_cast %1244 : vector<1x2x128xf32> to vector<2x128xf32>
    %1246 = vector.shape_cast %1243 : vector<2x128xf32> to vector<1x2x128xf32>
    tpu.vector_store %arg12[%c31_351, %c0_352, %c0_353], %1246 {strides = array<i32>} : memref<32x2x128xf32, #tpu.memory_space<vmem>>, vector<1x2x128xf32>,
    return
  }
}

</mosaic_0001>

<bundles_post_ra>
// kernel: _lambda_.1
= control target key start
LH: loop header
LB: loop body
LE: loop exit
PB: predicated region body
PF: predicated region fallthrough
CT: control target
= control target key end

     0   :  { %vm161_vm0 = vcmask 441344   ;;  %v7439_v3 = vmov 0   ;;  %vm210_vm1 = vcmask 1045504   ;;  %vm7441_vm2 = vmmov 0   ;;  %s7442_s24 = smov 64   ;;  %s7443_s28 = smov 96   ;;  %s8946_s0 = inlined_call_operand.vmem [shape: f32[54,32], index: 0, kind: input, shape index: {}]   ;;  %s8947_s1 = inlined_call_operand.vmem [shape: f32[128,54], index: 1, kind: input, shape index: {}]   ;;  %s8948_s2 = inlined_call_operand.vmem [shape: f32[128,1], index: 2, kind: input, shape index: {}]   ;;  %s8949_s5 = inlined_call_operand.vmem [shape: f32[32,1], index: 5, kind: input, shape index: {}]   ;;  %s8950_s4 = inlined_call_operand.vmem [shape: f32[32,128], index: 4, kind: input, shape index: {}]   ;;  %s8951_s3 = inlined_call_operand.vmem [shape: f32[32,2], index: 3, kind: input, shape index: {}]   ;;  %s8952_s8 = inlined_call_operand.vmem [shape: bf16[32,96], index: 8, kind: input, shape index: {}]   ;;  %s8953_s9 = inlined_call_operand.vmem [shape: f32[1,96], index: 9, kind: input, shape index: {}]   ;;  %s8954_s6 = inlined_call_operand.vmem [shape: f32[1,1,96], index: 6, kind: input, shape index: {}]   ;;  %s8955_s7 = inlined_call_operand.vmem [shape: f32[1,1,96], index: 7, kind: input, shape index: {}]   ;;  %s8956_s10 = inlined_call_operand.vmem [shape: f32[32,128], index: 10, kind: input, shape index: {}]   ;;  %s8957_s11 = inlined_call_operand.vmem [shape: f32[1,128], index: 11, kind: input, shape index: {}]   ;;  %s8958_s12 = inlined_call_operand.vmem [shape: f32[32,2,128], index: 12, kind: output, shape index: {}]  }
   0x1   :  { %v58_v0 = vld [vmem:[%s8946_s0] sm:$0xff]  ;;  %v59_v1 = vld [vmem:[%s8946_s0 + $0x8] sm:$0xff]  ;;  %v60_v2 = vld [vmem:[%s8946_s0 + $0x10] sm:$0xff]  ;;  %7233 = vset.pattern.permute.xlu0 %v7439_v3  ;;  %7234 = vset.pattern.permute.xlu1 %v7439_v3  ;;  %vm492_vm3 = vcmask 261120   ;;  %vm896_vm4 = vcmask 779264  }
   0x2   :  { %v6983_v4 = vpack.c.bf16 %v59_v1, %v58_v0  ;;  %v61_v5 = vld [vmem:[%s8946_s0 + $0x18] sm:$0xff]  ;;  %v62_v7 = vld [vmem:[%s8946_s0 + $0x20] sm:$0xff]  ;;  %v63_v8 = vld [vmem:[%s8946_s0 + $0x28] sm:$0xff] }
   0x3   :  { %v6987_v6 = vpack.c.bf16 %v61_v5, %v60_v2  ;;  %v42_v9 = vld [vmem:[%s8947_s1] sm:$0xff]  ;;  %v6991_v10 = vpack.c.bf16 %v63_v8, %v62_v7  ;;  %v67_v12 = vld [vmem:[%s8948_s2 + $0x10] sm:$0xff]  ;;  %v66_v13 = vld [vmem:[%s8948_s2 + $0x8] sm:$0xff] }
   0x4   :  { %6984 = vmatprep.subr.bf16.mxu0 %v6983_v4  ;;  %6299 = vmatprep.mubr.msk.f32.mxu0 %vm161_vm0, %v42_v9  ;;  %v65_v11 = vld [vmem:[%s8948_s2] sm:$0xff]  ;;  %v64_v14 = vld [vmem:[%s8946_s0 + $0x30] sm:$0x3f]  ;;  %v68_v15 = vld [vmem:[%s8948_s2 + $0x18] sm:$0xff] }
   0x5   :  { %6986 = vmatpush3.bf16.msra.mxu0 %v6983_v4  ;;  %83 = vperm.xlu0 %7233, %v65_v11   ;;  %v69_v16 = vld [vmem:[%s8948_s2 + $0x20] sm:$0xff]  ;;  %v43_v17 = vld [vmem:[%s8947_s1 + $0x8] sm:$0xff]  ;;  %v44_v19 = vld [vmem:[%s8947_s1 + $0x10] sm:$0xff] }
   0x6   :  { %6988 = vmatprep.subr.bf16.mxu0 %v6987_v6  ;;  %93 = vperm.xlu1 %7234, %v67_v12   ;;  %v70_v18 = vld [vmem:[%s8948_s2 + $0x28] sm:$0xff]  ;;  %v71_v20 = vld [vmem:[%s8948_s2 + $0x30] sm:$0xff]  ;;  %v45_v21 = vld [vmem:[%s8947_s1 + $0x18] sm:$0xff] }
   0x7   :  { %v72_v22 = vld [vmem:[%s8948_s2 + $0x38] sm:$0xff]  ;;  %v46_v23 = vld [vmem:[%s8947_s1 + $0x20] sm:$0xff]  ;;  %v47_v25 = vld [vmem:[%s8947_s1 + $0x28] sm:$0xff] }
   0x8   :  { %v73_v24 = vld [vmem:[%s8948_s2 + $0x40] sm:$0xff]  ;;  %v74_v26 = vld [vmem:[%s8948_s2 + $0x48] sm:$0xff]  ;;  %v48_v27 = vld [vmem:[%s8947_s1 + $0x30] sm:$0xff] }
   0x9   :  { %6990 = vmatpush3.bf16.msra.mxu0 %v6987_v6  ;;  %88 = vperm.xlu0 %7233, %v66_v13   ;;  %v75_v28 = vld [vmem:[%s8948_s2 + $0x50] sm:$0xff]  ;;  %v49_v29 = vld [vmem:[%s8947_s1 + $0x38] sm:$0xff]  ;;  %v50_v31 = vld [vmem:[%s8947_s1 + $0x40] sm:$0xff] }
   0xa   :  { %6992 = vmatprep.subr.bf16.mxu0 %v6991_v10  ;;  %98 = vperm.xlu1 %7234, %v68_v15   ;;  %v76_v30 = vld [vmem:[%s8948_s2 + $0x58] sm:$0xff]  ;;  %v77_v32 = vld [vmem:[%s8948_s2 + $0x60] sm:$0xff]  ;;  %v51_v33 = vld [vmem:[%s8947_s1 + $0x48] sm:$0xff] }
   0xb   :  { %v78_v34 = vld [vmem:[%s8948_s2 + $0x68] sm:$0xff]  ;;  %v52_v35 = vld [vmem:[%s8947_s1 + $0x50] sm:$0xff]  ;;  %v53_v37 = vld [vmem:[%s8947_s1 + $0x58] sm:$0xff] }
   0xc   :  { %v79_v36 = vld [vmem:[%s8948_s2 + $0x70] sm:$0xff]  ;;  %v80_v38 = vld [vmem:[%s8948_s2 + $0x78] sm:$0xff]  ;;  %v54_v39 = vld [vmem:[%s8947_s1 + $0x60] sm:$0xff] }
   0xd   :  { %6994 = vmatpush3.bf16.msra.mxu0 %v6991_v10  ;;  %103 = vperm.xlu0 %7233, %v69_v16   ;;  %v468_v40 = vld [vmem:[%s8949_s5] sm:$0xff]  ;;  %v55_v41 = vld [vmem:[%s8947_s1 + $0x68] sm:$0xff]  ;;  %v56_v42 = vld [vmem:[%s8947_s1 + $0x70] sm:$0xff] }
   0xe   :  { %6297 = vmatprep.subr.msk.mxu0 %vm210_vm1, %v64_v14  ;;  %108 = vperm.xlu1 %7234, %v70_v18   ;;  %v57_v43 = vld [vmem:[%s8947_s1 + $0x78] sm:$0xff]  ;;  %v375_v44 = vld [vmem:[%s8950_s4] sm:$0xff] }
   0xf   :  { %6355 = vmatprep.mubr.f32.mxu1 %v375_v44 }
  0x11   :  { %6298 = vmatpush3.msk.msra.mxu0 %vm210_vm1, %v64_v14  ;;  %113 = vperm.xlu0 %7233, %v71_v20  }
  0x12   :  { %6300 = vmatmul.mubr.msk.f32.vlgmr.msra.gmra.mrb[0].mxu0 %vm161_vm0, %v43_v17  ;;  %118 = vperm.xlu1 %7234, %v72_v22  }
  0x13   :  { %6302 = vmatprep.mubr.msk.f32.mxu0 %vm161_vm0, %v44_v19 }
  0x15   :  { %123 = vperm.xlu0 %7233, %v73_v24  }
  0x16   :  { %6303 = vmatmul.mubr.msk.f32.gmra.mrb[2].mxu0 %vm161_vm0, %v45_v21  ;;  %128 = vperm.xlu1 %7234, %v74_v26  }
  0x17   :  { %6305 = vmatprep.mubr.msk.f32.mxu0 %vm161_vm0, %v46_v23 }
  0x19   :  { %133 = vperm.xlu0 %7233, %v75_v28  }
  0x1a   :  { %6306 = vmatmul.mubr.msk.f32.gmra.mrb[4].mxu0 %vm161_vm0, %v47_v25  ;;  %138 = vperm.xlu1 %7234, %v76_v30  }
  0x1b   :  { %6308 = vmatprep.mubr.msk.f32.mxu0 %vm161_vm0, %v48_v27 }
  0x1d   :  { %143 = vperm.xlu0 %7233, %v77_v32  }
  0x1e   :  { %6309 = vmatmul.mubr.msk.f32.gmra.mrb[6].mxu0 %vm161_vm0, %v49_v29  ;;  %148 = vperm.xlu1 %7234, %v78_v34  }
  0x1f   :  { %6311 = vmatprep.mubr.msk.f32.mxu0 %vm161_vm0, %v50_v31 }
  0x21   :  { %153 = vperm.xlu0 %7233, %v79_v36  }
  0x22   :  { %6312 = vmatmul.mubr.msk.f32.gmra.mrb[8].mxu0 %vm161_vm0, %v51_v33  ;;  %158 = vperm.xlu1 %7234, %v80_v38  }
  0x23   :  { %6314 = vmatprep.mubr.msk.f32.mxu0 %vm161_vm0, %v52_v35 }
  0x25   :  { %474 = vperm.xlu0 %7233, %v468_v40  }
  0x26   :  { %6315 = vmatmul.mubr.msk.f32.gmra.mrb[10].mxu0 %vm161_vm0, %v53_v37 }
  0x27   :  { %6317 = vmatprep.mubr.msk.f32.mxu0 %vm161_vm0, %v54_v39 }
  0x2a   :  { %6318 = vmatmul.mubr.msk.f32.gmra.mrb[12].mxu0 %vm161_vm0, %v55_v41 }
  0x2b   :  { %6320 = vmatprep.mubr.msk.f32.mxu0 %vm161_vm0, %v56_v42 }
  0x2e   :  { %6321 = vmatmul.mubr.msk.f32.gmra.mrb[14].mxu0 %vm161_vm0, %v57_v43 }
  0x84   :  { %v84_v46 = vpop.permute.xlu0 %83 }
  0x85   :  { %v94_v45 = vpop.permute.xlu1 %93 }
  0x88   :  { %v89_v48 = vpop.permute.xlu0 %88 }
  0x89   :  { %v99_v47 = vpop.permute.xlu1 %98 }
  0x8c   :  { %v104_v50 = vpop.permute.xlu0 %103 }
  0x8d   :  { %v109_v49 = vpop.permute.xlu1 %108 }
  0x90   :  { %v114_v59 = vpop.permute.xlu0 %113 }
  0x91   :  { %v119_v56 = vpop.permute.xlu1 %118 }
  0x94   :  { %v124_v9 = vpop.permute.xlu0 %123 }
  0x95   :  { %v129_v6 = vpop.permute.xlu1 %128 }
  0x98   :  { %v134_v21 = vpop.permute.xlu0 %133 }
  0x99   :  { %v139_v18 = vpop.permute.xlu1 %138 }
  0x9c   :  { %v144_v34 = vpop.permute.xlu0 %143 }
  0x9d   :  { %v149_v31 = vpop.permute.xlu1 %148 }
  0xa1   :  { %v159_v43 = vpop.permute.xlu1 %158 }
  0xe5   :  { %v6301_v51 = vpop.f32.mrb[0].mxu0 }
  0xe6   :  { %v286_v52 = vadd.f32 %v6301_v51, %v89_v48  ;;  %v280_v53 = vpop.f32.mrb[1].mxu0 }
  0xe7   :  { %v281_v54 = vadd.f32 %v280_v53, %v84_v46  ;;  %v154_v46 = vpop.permute.xlu0 %153  ;;  %v465_v53 = vld [vmem:[%s8951_s3 + $0x8] sm:$0xff] }
  0xe8   :  { %v360_v55 = vmax.f32 %v286_v52, 0.0  ;;  %v464_v52 = vld [vmem:[%s8951_s3] sm:$0xff] }
  0xe9   :  { %v359_v57 = vmax.f32 %v281_v54, 0.0  ;;  %v6304_v58 = vpop.f32.mrb[2].mxu0 }
  0xea   :  { %v296_v60 = vadd.f32 %v6304_v58, %v99_v47  ;;  %v290_v61 = vpop.f32.mrb[3].mxu0  ;;  %v467_v58 = vld [vmem:[%s8951_s3 + $0x18] sm:$0xff] }
  0xeb   :  { %v291_v62 = vadd.f32 %v290_v61, %v94_v45  ;;  %v6995_v63 = vpack.c.bf16 %v360_v55, %v359_v57  ;;  %v466_v57 = vld [vmem:[%s8951_s3 + $0x10] sm:$0xff] }
  0xec   :  { %v362_v0 = vmax.f32 %v296_v60, 0.0  ;;  %v377_v60 = vld [vmem:[%s8950_s4 + $0x10] sm:$0xff]  ;;  %v7031_v61 = vpack.c.bf16 %v467_v58, %v466_v57 }
  0xed   :  { %v361_v1 = vmax.f32 %v291_v62, 0.0  ;;  %v6307_v2 = vpop.f32.mrb[4].mxu0  ;;  %6996 = vmatprep.subr.bf16.mxu1 %v6995_v63  ;;  %v378_v62 = vld [vmem:[%s8950_s4 + $0x18] sm:$0xff] }
  0xee   :  { %v306_v4 = vadd.f32 %v6307_v2, %v109_v49  ;;  %v300_v5 = vpop.f32.mrb[5].mxu0  ;;  %6998 = vmatpush3.bf16.msra.mxu1 %v6995_v63  ;;  %v7440_v63 = vmov 0.0  }
  0xef   :  { %v6999_v7 = vpack.c.bf16 %v362_v0, %v361_v1  ;;  %v301_v8 = vadd.f32 %v300_v5, %v104_v50  ;;  %6375 = vmatprep.subr.bf16.mxu0 %v7440_v63  ;;  %v7676_v0 = vld [vmem:[%s8952_s8] sm:$0xff]   ;;  %6379 = vmatprep.mubr.msk.bf16.mxu0 %vm7441_vm2, %v7440_v63  ;;  %v7684_v1 = vld [vmem:[%s8952_s8 + $0x8] sm:$0xff]  }
  0xf0   :  { %v364_v10 = vmax.f32 %v306_v4, 0.0  ;;  %6376 = vmatpush3.bf16.msra.mxu0 %v7676_v0 }
  0xf1   :  { %v363_v11 = vmax.f32 %v301_v8, 0.0  ;;  %v6310_v12 = vpop.f32.mrb[6].mxu0  ;;  %7000 = vmatprep.subr.bf16.mxu1 %v6999_v7  ;;  %6377 = vmatprep.subr.bf16.mxu0 %v7440_v63 }
  0xf2   :  { %v316_v13 = vadd.f32 %v6310_v12, %v119_v56  ;;  %v310_v14 = vpop.f32.mrb[7].mxu0  ;;  %7002 = vmatpush3.bf16.msra.mxu1 %v6999_v7  ;;  %v7027_v56 = vpack.c.bf16 %v465_v53, %v464_v52  ;;  %v594_v12 = vlaneseq }
  0xf3   :  { %v7003_v15 = vpack.c.bf16 %v364_v10, %v363_v11  ;;  %v311_v16 = vadd.f32 %v310_v14, %v114_v59  ;;  %v376_v59 = vld [vmem:[%s8950_s4 + $0x8] sm:$0xff] }
  0xf4   :  { %v366_v17 = vmax.f32 %v316_v13, 0.0  ;;  %6378 = vmatpush3.bf16.msra.mxu0 %v7684_v1  ;;  %v7709_v13 = vshrl.u32 %v594_v12, 7 }
  0xf5   :  { %v365_v19 = vmax.f32 %v311_v16, 0.0  ;;  %v6313_v20 = vpop.f32.mrb[8].mxu0  ;;  %7004 = vmatprep.subr.bf16.mxu1 %v7003_v15  ;;  %6394 = vmatprep.subr.bf16.mxu0 %v7440_v63 }
  0xf6   :  { %v326_v22 = vadd.f32 %v6313_v20, %v129_v6  ;;  %v320_v23 = vpop.f32.mrb[9].mxu0  ;;  %7006 = vmatpush3.bf16.msra.mxu1 %v7003_v15  ;;  %v7705_v6 = vld [vmem:[%s8953_s9] ss:$0 sm:$0xff]  ;;  %v475_v15 = vpop.permute.xlu0 %474 }
  0xf7   :  { %v7007_v24 = vpack.c.bf16 %v366_v17, %v365_v19  ;;  %v321_v25 = vadd.f32 %v320_v23, %v124_v9  ;;  %6380 = vmatmul.mubr.bf16.vlgmr.msra.gmra.mrb[16].mxu0 %v7439_v3  ;;  %v7727_v23 = vld [vmem:[%s8954_s6] ss:$0 sm:$0xff] }
  0xf8   :  { %v368_v26 = vmax.f32 %v326_v22, 0.0  ;;  %6395 = vmatpush3.bf16.msra.mxu0 %v7676_v0  ;;  %6398 = vmatprep.mubr.msk.bf16.mxu0 %vm7441_vm2, %v7440_v63 }
  0xf9   :  { %v367_v27 = vmax.f32 %v321_v25, 0.0  ;;  %v6316_v28 = vpop.f32.mrb[10].mxu0  ;;  %7008 = vmatprep.subr.bf16.mxu1 %v7007_v24  ;;  %6396 = vmatprep.subr.bf16.mxu0 %v7440_v63 }
  0xfa   :  { %v336_v29 = vadd.f32 %v6316_v28, %v139_v18  ;;  %v330_v30 = vpop.f32.mrb[11].mxu0  ;;  %7010 = vmatpush3.bf16.msra.mxu1 %v7007_v24  ;;  %v7714_v18 = vsub.s32 0, %v7709_v13  ;;  %v7732_v24 = vld [vmem:[%s8955_s7] ss:$0 sm:$0xff] }
  0xfb   :  { %v7011_v32 = vpack.c.bf16 %v368_v26, %v367_v27  ;;  %v331_v33 = vadd.f32 %v330_v30, %v134_v21 }
  0xfc   :  { %v370_v35 = vmax.f32 %v336_v29, 0.0  ;;  %6397 = vmatpush3.bf16.msra.mxu0 %v7684_v1 }
  0xfd   :  { %v369_v36 = vmax.f32 %v331_v33, 0.0  ;;  %v6319_v37 = vpop.f32.mrb[12].mxu0  ;;  %7012 = vmatprep.subr.bf16.mxu1 %v7011_v32  ;;  %6413 = vmatprep.subr.bf16.mxu0 %v7440_v63 }
  0xfe   :  { %v346_v38 = vadd.f32 %v6319_v37, %v149_v31  ;;  %v340_v39 = vpop.f32.mrb[13].mxu0  ;;  %7014 = vmatpush3.bf16.msra.mxu1 %v7011_v32 }
  0xff   :  { %v7015_v40 = vpack.c.bf16 %v370_v35, %v369_v36  ;;  %v341_v41 = vadd.f32 %v340_v39, %v144_v34 }
 0x100   :  { %v372_v42 = vmax.f32 %v346_v38, 0.0  ;;  %v7739_v38 = vsub.s32 1, %v7709_v13 }
 0x101   :  { %v371_v44 = vmax.f32 %v341_v41, 0.0  ;;  %v6322_v45 = vpop.f32.mrb[14].mxu0  ;;  %7016 = vmatprep.subr.bf16.mxu1 %v7015_v40 }
 0x102   :  { %v356_v47 = vadd.f32 %v6322_v45, %v159_v43  ;;  %v350_v48 = vpop.f32.mrb[15].mxu0  ;;  %7018 = vmatpush3.bf16.msra.mxu1 %v7015_v40 }
 0x103   :  { %v7019_v49 = vpack.c.bf16 %v372_v42, %v371_v44  ;;  %v351_v50 = vadd.f32 %v350_v48, %v154_v46 }
 0x104   :  { %v374_v51 = vmax.f32 %v356_v47, 0.0 }
 0x105   :  { %v373_v54 = vmax.f32 %v351_v50, 0.0  ;;  %7020 = vmatprep.subr.bf16.mxu1 %v7019_v49 }
 0x106   :  { %7022 = vmatpush3.bf16.msra.mxu1 %v7019_v49 }
 0x107   :  { %v7023_v55 = vpack.c.bf16 %v374_v51, %v373_v54 }
 0x109   :  { %7024 = vmatprep.subr.bf16.mxu1 %v7023_v55 }
 0x10a   :  { %7026 = vmatpush3.bf16.msra.mxu1 %v7023_v55 }
 0x10b   :  { %7028 = vmatprep.subr.bf16.mxu1 %v7027_v56 }
 0x10d   :  { %6356 = vmatmul.mubr.f32.vlgmr.msra.gmra.mrb[0].mxu1 %v376_v59 }
 0x10e   :  { %6358 = vmatprep.mubr.f32.mxu1 %v377_v60  ;;  %7030 = vmatpush3.bf16.msra.mxu1 %v7027_v56 }
 0x10f   :  { %7032 = vmatprep.subr.bf16.mxu1 %v7031_v61 }
 0x111   :  { %6359 = vmatmul.mubr.f32.gmra.mrb[2].mxu1 %v378_v62 }
 0x112   :  { %7034 = vmatpush3.bf16.msra.mxu1 %v7031_v61 }
 0x1ca   :  { %v995_v7 = vpop.f32.mrb[16].mxu0 }
 0x1cb   :  { %v996_v8 = vadd.f32 %v7705_v6, %v995_v7  ;;  %v6381_v9 = vpop.f32.mrb[17].mxu0 }
 0x1cc   :  { %v998_v10 = vpop.f32.mrb[18].mxu0 }
 0x1cd   :  { %v6382_v11 = vpop.f32.mrb[19].mxu0  ;;  %1009 = vrot.lane.b32.xlu0 %v996_v8, %s7442_s24 }
 0x1e0   :  { %v6357_v2 = vpop.f32.mrb[0].mxu1 }
 0x1e1   :  { %v445_v4 = vpop.f32.mrb[1].mxu1 }
 0x1e2   :  { %6369 = vmatprep.mubr.msk.f32.mxu1 %vm492_vm3, %v445_v4 }
 0x1e3   :  { %6370 = vmatmul.mubr.msk.f32.vlgmr.msra.gmra.mrb[4].mxu1 %vm492_vm3, %v6357_v2 }
 0x1e4   :  { %v6360_v5 = vpop.f32.mrb[2].mxu1 }
 0x1e5   :  { %v455_v3 = vpop.f32.mrb[3].mxu1 }
 0x1e6   :  { %6372 = vmatprep.mubr.msk.f32.mxu1 %vm492_vm3, %v455_v3  ;;  %v7763_v3 = vsub.s32 2, %v7709_v13 }
 0x1e7   :  { %6373 = vmatmul.mubr.msk.f32.gmra.mrb[6].mxu1 %vm492_vm3, %v6360_v5 }
 0x1e8   :  { %6391 = vmatprep.mubr.msk.f32.mxu1 %vm7441_vm2, %v7440_v63 }
 0x23f   :  { %v1010_v33 = vpop.permute.xlu0 %1009 }
 0x2b6   :  { %v7711_v14 = vpop.f32.mrb[4].mxu1 }
 0x2b7   :  { %v571_v16 = vpop.f32.mrb[5].mxu1 }
 0x2b8   :  { %v572_v17 = vadd.f32 %v571_v16, %v475_v15 }
 0x2ba   :  { %v7716_v19 = vmax.f32 %v572_v17, 0.0  ;;  %v7720_v21 = vpop.f32.mrb[6].mxu1 }
 0x2bb   :  { %v7722_v22 = vpop.f32.mrb[7].mxu1 }
 0x2bc   :  { %v597_v20 = vrot.slane %v7716_v19, %v7714_v18  ;;  %v604_v40 = vrot.slane %v7716_v19, %v7739_v38 }
 0x2be   :  { %599 = vbcast.lane.b32.xlu1 %v597_v20, 256 }
 0x330   :  { %v600_v25 = vpop.permute.xlu1 %599 }
 0x331   :  { %v825_v26 = vmul.f32 %v7727_v23, %v600_v25 }
 0x333   :  { %v864_v27 = vadd.f32 %v7732_v24, %v825_v26 }
 0x335   :  { %897 = vst.msk [vmem:[#allocation2] sm:$0x3] %vm896_vm4, %v864_v27 }
 0x33c   :  { %v939_v28 = vld [vmem:[#allocation2] sm:$0x3] }
 0x33d   :  { %v1001_v29 = vadd.f32 %v996_v8, %v939_v28  ;;  %v611_v8 = vrot.slane %v7716_v19, %v7763_v3 }
 0x33f   :  { %v5851_v30 = vmul.f32 -1.442695, %v1001_v29 }
 0x341   :  { %7237 = vpow2.f32 %v5851_v30 }
 0x34b   :  { %v7238_v31 = vpop.eup %7237 }
 0x34c   :  { %v1005_v32 = vadd.f32 1.0, %v7238_v31 }
 0x34e   :  { %7239 = vrcp.f32 %v1005_v32 }
 0x358   :  { %v7240_v34 = vpop.eup %7239 }
 0x359   :  { %v1012_v35 = vmul.f32 %v7240_v34, %v1010_v33  ;;  %v1019_v41 = vsub.f32 1.0, %v7240_v34  ;;  %v1025_v43 = vmul.f32 0.0, %v7240_v34 }
 0x35b   :  { %1014 = vrot.lane.b32.xlu1 %v1012_v35, %s7442_s24 }
 0x3cd   :  { %v1015_v36 = vpop.permute.xlu1 %1014 }
 0x3ce   :  { %v1017_v37 = vadd.f32 %v1015_v36, %v939_v28 }
 0x3d0   :  { %7241 = vtanh.f32 %v1017_v37 }
 0x3da   :  { %v7242_v39 = vpop.eup %7241 }
 0x3db   :  { %1021 = vrot.lane.b32.xlu0 %v7242_v39, %s7443_s28 }
 0x3df   :  { %606 = vbcast.lane.b32.xlu0 %v604_v40, 256 }
 0x44d   :  { %v1022_v42 = vpop.permute.xlu0 %1021 }
 0x44e   :  { %v1024_v44 = vmul.f32 %v1022_v42, %v1019_v41 }
 0x450   :  { %v7744_v45 = vadd.f32 %v1025_v43, %v1024_v44  ;;  %v7788_v43 = vsub.s32 3, %v7709_v13 }
 0x451   :  { %v607_v46 = vpop.permute.xlu0 %606 }
 0x452   :  { %v826_v47 = vmul.f32 %v7727_v23, %v607_v46  ;;  %v1111_v48 = vpack.c.bf16 %v7744_v45, %v7744_v45  ;;  %v618_v46 = vrot.slane %v7716_v19, %v7788_v43 }
 0x454   :  { %v865_v49 = vadd.f32 %v7732_v24, %v826_v47  ;;  %1113 = vrot.lane.b32.xlu1 %v1111_v48, %s7443_s28 }
 0x456   :  { %898 = vst.msk [vmem:[#allocation2 + $0x2] sm:$0x3] %vm896_vm4, %v865_v49 }
 0x45d   :  { %v1110_v56 = vld [vmem:[#allocation2 + $0x2] sm:$0x3] }
 0x4c6   :  { %v1114_v50 = vpop.permute.xlu1 %1113 }
 0x4c7   :  { %6399 = vmatmul.mubr.msk.bf16.vlgmr.msra.gmra.mrb[20].mxu0 %vm492_vm3, %v1114_v50 }
 0x4c8   :  { %6414 = vmatpush3.bf16.msra.mxu0 %v7676_v0  ;;  %6417 = vmatprep.mubr.msk.bf16.mxu0 %vm7441_vm2, %v7440_v63 }
 0x4c9   :  { %6415 = vmatprep.subr.bf16.mxu0 %v7440_v63 }
 0x4cc   :  { %6416 = vmatpush3.bf16.msra.mxu0 %v7684_v1 }
 0x4cd   :  { %6432 = vmatprep.subr.bf16.mxu0 %v7440_v63 }
 0x59a   :  { %v1152_v51 = vpop.f32.mrb[20].mxu0 }
 0x59b   :  { %v1153_v52 = vadd.f32 %v7705_v6, %v1152_v51  ;;  %v6400_v53 = vpop.f32.mrb[21].mxu0 }
 0x59c   :  { %v1155_v54 = vpop.f32.mrb[22].mxu0 }
 0x59d   :  { %1166 = vrot.lane.b32.xlu1 %v1153_v52, %s7442_s24  ;;  %v6401_v55 = vpop.f32.mrb[23].mxu0  ;;  %v1158_v57 = vadd.f32 %v1153_v52, %v1110_v56 }
 0x59f   :  { %v5855_v58 = vmul.f32 -1.442695, %v1158_v57 }
 0x5a1   :  { %7243 = vpow2.f32 %v5855_v58 }
 0x5ab   :  { %v7244_v59 = vpop.eup %7243 }
 0x5ac   :  { %v1162_v60 = vadd.f32 1.0, %v7244_v59 }
 0x5ae   :  { %7245 = vrcp.f32 %v1162_v60 }
 0x5b8   :  { %v7246_v61 = vpop.eup %7245 }
 0x5b9   :  { %v1176_v9 = vsub.f32 1.0, %v7246_v61  ;;  %v1182_v11 = vmul.f32 %v7246_v61, %v7744_v45 }
 0x60f   :  { %v1167_v62 = vpop.permute.xlu1 %1166 }
 0x610   :  { %v1169_v2 = vmul.f32 %v7246_v61, %v1167_v62 }
 0x612   :  { %1171 = vrot.lane.b32.xlu0 %v1169_v2, %s7442_s24 }
 0x684   :  { %v1172_v4 = vpop.permute.xlu0 %1171 }
 0x685   :  { %v1174_v5 = vadd.f32 %v1172_v4, %v1110_v56 }
 0x687   :  { %7247 = vtanh.f32 %v1174_v5 }
 0x691   :  { %v7248_v7 = vpop.eup %7247 }
 0x692   :  { %1178 = vrot.lane.b32.xlu1 %v7248_v7, %s7443_s28 }
 0x696   :  { %613 = vbcast.lane.b32.xlu1 %v611_v8, 256 }
 0x704   :  { %v1179_v10 = vpop.permute.xlu1 %1178 }
 0x705   :  { %v1181_v12 = vmul.f32 %v1179_v10, %v1176_v9 }
 0x707   :  { %v7769_v15 = vadd.f32 %v1182_v11, %v1181_v12 }
 0x708   :  { %v614_v16 = vpop.permute.xlu1 %613 }
 0x709   :  { %v827_v17 = vmul.f32 %v7727_v23, %v614_v16  ;;  %v1263_v20 = vpack.c.bf16 %v7769_v15, %v7769_v15  ;;  %v7813_v16 = vsub.s32 4, %v7709_v13 }
 0x70b   :  { %v866_v25 = vadd.f32 %v7732_v24, %v827_v17  ;;  %1265 = vrot.lane.b32.xlu0 %v1263_v20, %s7443_s28  ;;  %v625_v20 = vrot.slane %v7716_v19, %v7813_v16 }
 0x70d   :  { %899 = vst.msk [vmem:[#allocation2 + $0x4] sm:$0x3] %vm896_vm4, %v866_v25 }
 0x714   :  { %v1262_v32 = vld [vmem:[#allocation2 + $0x4] sm:$0x3] }
 0x77d   :  { %v1266_v26 = vpop.permute.xlu0 %1265 }
 0x77e   :  { %6418 = vmatmul.mubr.msk.bf16.vlgmr.msra.gmra.mrb[24].mxu0 %vm492_vm3, %v1266_v26 }
 0x77f   :  { %6433 = vmatpush3.bf16.msra.mxu0 %v7676_v0  ;;  %6436 = vmatprep.mubr.msk.bf16.mxu0 %vm7441_vm2, %v7440_v63 }
 0x780   :  { %6434 = vmatprep.subr.bf16.mxu0 %v7440_v63 }
 0x783   :  { %6435 = vmatpush3.bf16.msra.mxu0 %v7684_v1 }
 0x784   :  { %6451 = vmatprep.subr.bf16.mxu0 %v7440_v63 }
 0x851   :  { %v1304_v27 = vpop.f32.mrb[24].mxu0 }
 0x852   :  { %v1305_v28 = vadd.f32 %v7705_v6, %v1304_v27  ;;  %v6419_v29 = vpop.f32.mrb[25].mxu0 }
 0x853   :  { %v1307_v30 = vpop.f32.mrb[26].mxu0 }
 0x854   :  { %1318 = vrot.lane.b32.xlu0 %v1305_v28, %s7442_s24  ;;  %v6420_v31 = vpop.f32.mrb[27].mxu0  ;;  %v1310_v33 = vadd.f32 %v1305_v28, %v1262_v32 }
 0x856   :  { %v5859_v34 = vmul.f32 -1.442695, %v1310_v33 }
 0x858   :  { %7249 = vpow2.f32 %v5859_v34 }
 0x862   :  { %v7250_v35 = vpop.eup %7249 }
 0x863   :  { %v1314_v36 = vadd.f32 1.0, %v7250_v35 }
 0x865   :  { %7251 = vrcp.f32 %v1314_v36 }
 0x86f   :  { %v7252_v37 = vpop.eup %7251 }
 0x870   :  { %v1328_v47 = vsub.f32 1.0, %v7252_v37  ;;  %v1334_v49 = vmul.f32 %v7252_v37, %v7769_v15 }
 0x8c6   :  { %v1319_v39 = vpop.permute.xlu0 %1318 }
 0x8c7   :  { %v1321_v40 = vmul.f32 %v7252_v37, %v1319_v39 }
 0x8c9   :  { %1323 = vrot.lane.b32.xlu1 %v1321_v40, %s7442_s24 }
 0x93b   :  { %v1324_v41 = vpop.permute.xlu1 %1323 }
 0x93c   :  { %v1326_v42 = vadd.f32 %v1324_v41, %v1262_v32 }
 0x93e   :  { %7253 = vtanh.f32 %v1326_v42 }
 0x948   :  { %v7254_v44 = vpop.eup %7253 }
 0x949   :  { %1330 = vrot.lane.b32.xlu0 %v7254_v44, %s7443_s28 }
 0x94d   :  { %620 = vbcast.lane.b32.xlu0 %v618_v46, 256 }
 0x9bb   :  { %v1331_v48 = vpop.permute.xlu0 %1330 }
 0x9bc   :  { %v1333_v50 = vmul.f32 %v1331_v48, %v1328_v47 }
 0x9be   :  { %v7794_v51 = vadd.f32 %v1334_v49, %v1333_v50 }
 0x9bf   :  { %v621_v52 = vpop.permute.xlu0 %620 }
 0x9c0   :  { %v828_v53 = vmul.f32 %v7727_v23, %v621_v52  ;;  %v1415_v54 = vpack.c.bf16 %v7794_v51, %v7794_v51 }
 0x9c2   :  { %v867_v55 = vadd.f32 %v7732_v24, %v828_v53  ;;  %1417 = vrot.lane.b32.xlu1 %v1415_v54, %s7443_s28  ;;  %v7838_v54 = vsub.s32 5, %v7709_v13 }
 0x9c4   :  { %900 = vst.msk [vmem:[#allocation2 + $0x6] sm:$0x3] %vm896_vm4, %v867_v55 }
 0x9cb   :  { %v1414_v62 = vld [vmem:[#allocation2 + $0x6] sm:$0x3] }
 0xa34   :  { %v1418_v56 = vpop.permute.xlu1 %1417 }
 0xa35   :  { %6437 = vmatmul.mubr.msk.bf16.vlgmr.msra.gmra.mrb[28].mxu0 %vm492_vm3, %v1418_v56  ;;  %v632_v56 = vrot.slane %v7716_v19, %v7838_v54 }
 0xa36   :  { %6452 = vmatpush3.bf16.msra.mxu0 %v7676_v0  ;;  %6455 = vmatprep.mubr.msk.bf16.mxu0 %vm7441_vm2, %v7440_v63 }
 0xa37   :  { %6453 = vmatprep.subr.bf16.mxu0 %v7440_v63 }
 0xa3a   :  { %6454 = vmatpush3.bf16.msra.mxu0 %v7684_v1 }
 0xa3b   :  { %6470 = vmatprep.subr.bf16.mxu0 %v7440_v63 }
 0xb08   :  { %v1456_v57 = vpop.f32.mrb[28].mxu0 }
 0xb09   :  { %v1457_v58 = vadd.f32 %v7705_v6, %v1456_v57  ;;  %v6438_v59 = vpop.f32.mrb[29].mxu0 }
 0xb0a   :  { %v1459_v60 = vpop.f32.mrb[30].mxu0 }
 0xb0b   :  { %1470 = vrot.lane.b32.xlu1 %v1457_v58, %s7442_s24  ;;  %v6439_v61 = vpop.f32.mrb[31].mxu0  ;;  %v1462_v2 = vadd.f32 %v1457_v58, %v1414_v62 }
 0xb0d   :  { %v5863_v4 = vmul.f32 -1.442695, %v1462_v2 }
 0xb0f   :  { %7255 = vpow2.f32 %v5863_v4 }
 0xb19   :  { %v7256_v5 = vpop.eup %7255 }
 0xb1a   :  { %v1466_v7 = vadd.f32 1.0, %v7256_v5 }
 0xb1c   :  { %7257 = vrcp.f32 %v1466_v7 }
 0xb26   :  { %v7258_v8 = vpop.eup %7257 }
 0xb27   :  { %v1480_v25 = vsub.f32 1.0, %v7258_v8  ;;  %v1486_v27 = vmul.f32 %v7258_v8, %v7794_v51 }
 0xb7d   :  { %v1471_v9 = vpop.permute.xlu1 %1470 }
 0xb7e   :  { %v1473_v10 = vmul.f32 %v7258_v8, %v1471_v9 }
 0xb80   :  { %1475 = vrot.lane.b32.xlu0 %v1473_v10, %s7442_s24 }
 0xbf2   :  { %v1476_v11 = vpop.permute.xlu0 %1475 }
 0xbf3   :  { %v1478_v12 = vadd.f32 %v1476_v11, %v1414_v62 }
 0xbf5   :  { %7259 = vtanh.f32 %v1478_v12 }
 0xbff   :  { %v7260_v17 = vpop.eup %7259 }
 0xc00   :  { %1482 = vrot.lane.b32.xlu1 %v7260_v17, %s7443_s28 }
 0xc04   :  { %627 = vbcast.lane.b32.xlu1 %v625_v20, 256 }
 0xc72   :  { %v1483_v26 = vpop.permute.xlu1 %1482 }
 0xc73   :  { %v1485_v28 = vmul.f32 %v1483_v26, %v1480_v25 }
 0xc75   :  { %v7819_v29 = vadd.f32 %v1486_v27, %v1485_v28 }
 0xc76   :  { %v628_v30 = vpop.permute.xlu1 %627 }
 0xc77   :  { %v829_v31 = vmul.f32 %v7727_v23, %v628_v30  ;;  %v1567_v32 = vpack.c.bf16 %v7819_v29, %v7819_v29 }
 0xc79   :  { %v868_v33 = vadd.f32 %v7732_v24, %v829_v31  ;;  %1569 = vrot.lane.b32.xlu0 %v1567_v32, %s7443_s28 }
 0xc7b   :  { %901 = vst.msk [vmem:[#allocation2 + $0x8] sm:$0x3] %vm896_vm4, %v868_v33 }
 0xc82   :  { %v1566_v41 = vld [vmem:[#allocation2 + $0x8] sm:$0x3] }
 0xceb   :  { %v1570_v34 = vpop.permute.xlu0 %1569 }
 0xcec   :  { %6456 = vmatmul.mubr.msk.bf16.vlgmr.msra.gmra.mrb[32].mxu0 %vm492_vm3, %v1570_v34  ;;  %v7863_v34 = vsub.s32 6, %v7709_v13 }
 0xced   :  { %6471 = vmatpush3.bf16.msra.mxu0 %v7676_v0  ;;  %6474 = vmatprep.mubr.msk.bf16.mxu0 %vm7441_vm2, %v7440_v63 }
 0xcee   :  { %6472 = vmatprep.subr.bf16.mxu0 %v7440_v63 }
 0xcf1   :  { %6473 = vmatpush3.bf16.msra.mxu0 %v7684_v1 }
 0xcf2   :  { %6489 = vmatprep.subr.bf16.mxu0 %v7440_v63 }
 0xdbf   :  { %v1608_v35 = vpop.f32.mrb[32].mxu0 }
 0xdc0   :  { %v1609_v36 = vadd.f32 %v7705_v6, %v1608_v35  ;;  %v6457_v37 = vpop.f32.mrb[33].mxu0 }
 0xdc1   :  { %v1611_v39 = vpop.f32.mrb[34].mxu0 }
 0xdc2   :  { %1622 = vrot.lane.b32.xlu0 %v1609_v36, %s7442_s24  ;;  %v6458_v40 = vpop.f32.mrb[35].mxu0  ;;  %v1614_v42 = vadd.f32 %v1609_v36, %v1566_v41  ;;  %v639_v36 = vrot.slane %v7716_v19, %v7863_v34 }
 0xdc4   :  { %v5867_v44 = vmul.f32 -1.442695, %v1614_v42 }
 0xdc6   :  { %7261 = vpow2.f32 %v5867_v44 }
 0xdd0   :  { %v7262_v46 = vpop.eup %7261 }
 0xdd1   :  { %v1618_v47 = vadd.f32 1.0, %v7262_v46 }
 0xdd3   :  { %7263 = vrcp.f32 %v1618_v47 }
 0xddd   :  { %v7264_v48 = vpop.eup %7263 }
 0xdde   :  { %v1632_v57 = vsub.f32 1.0, %v7264_v48  ;;  %v1638_v59 = vmul.f32 %v7264_v48, %v7819_v29 }
 0xe34   :  { %v1623_v49 = vpop.permute.xlu0 %1622 }
 0xe35   :  { %v1625_v50 = vmul.f32 %v7264_v48, %v1623_v49 }
 0xe37   :  { %1627 = vrot.lane.b32.xlu1 %v1625_v50, %s7442_s24 }
 0xea9   :  { %v1628_v52 = vpop.permute.xlu1 %1627 }
 0xeaa   :  { %v1630_v53 = vadd.f32 %v1628_v52, %v1566_v41 }
 0xeac   :  { %7265 = vtanh.f32 %v1630_v53 }
 0xeb6   :  { %v7266_v55 = vpop.eup %7265 }
 0xeb7   :  { %1634 = vrot.lane.b32.xlu0 %v7266_v55, %s7443_s28 }
 0xebb   :  { %634 = vbcast.lane.b32.xlu0 %v632_v56, 256 }
 0xf29   :  { %v1635_v58 = vpop.permute.xlu0 %1634 }
 0xf2a   :  { %v1637_v60 = vmul.f32 %v1635_v58, %v1632_v57 }
 0xf2c   :  { %v7844_v61 = vadd.f32 %v1638_v59, %v1637_v60 }
 0xf2d   :  { %v635_v62 = vpop.permute.xlu0 %634 }
 0xf2e   :  { %v830_v2 = vmul.f32 %v7727_v23, %v635_v62  ;;  %v1719_v4 = vpack.c.bf16 %v7844_v61, %v7844_v61 }
 0xf30   :  { %v869_v5 = vadd.f32 %v7732_v24, %v830_v2  ;;  %1721 = vrot.lane.b32.xlu1 %v1719_v4, %s7443_s28 }
 0xf32   :  { %902 = vst.msk [vmem:[#allocation2 + $0xa] sm:$0x3] %vm896_vm4, %v869_v5 }
 0xf39   :  { %v1718_v17 = vld [vmem:[#allocation2 + $0xa] sm:$0x3] }
 0xfa2   :  { %v1722_v7 = vpop.permute.xlu1 %1721 }
 0xfa3   :  { %6475 = vmatmul.mubr.msk.bf16.vlgmr.msra.gmra.mrb[36].mxu0 %vm492_vm3, %v1722_v7 }
 0xfa4   :  { %6490 = vmatpush3.bf16.msra.mxu0 %v7676_v0  ;;  %6493 = vmatprep.mubr.msk.bf16.mxu0 %vm7441_vm2, %v7440_v63 }
 0xfa5   :  { %6491 = vmatprep.subr.bf16.mxu0 %v7440_v63 }
 0xfa8   :  { %6492 = vmatpush3.bf16.msra.mxu0 %v7684_v1 }
 0xfa9   :  { %6508 = vmatprep.subr.bf16.mxu0 %v7440_v63 }
0x1076   :  { %v1760_v8 = vpop.f32.mrb[36].mxu0 }
0x1077   :  { %v1761_v9 = vadd.f32 %v7705_v6, %v1760_v8  ;;  %v6476_v10 = vpop.f32.mrb[37].mxu0 }
0x1078   :  { %v1763_v11 = vpop.f32.mrb[38].mxu0 }
0x1079   :  { %1774 = vrot.lane.b32.xlu1 %v1761_v9, %s7442_s24  ;;  %v6477_v12 = vpop.f32.mrb[39].mxu0  ;;  %v1766_v20 = vadd.f32 %v1761_v9, %v1718_v17  ;;  %v7888_v9 = vsub.s32 7, %v7709_v13 }
0x107b   :  { %v5871_v25 = vmul.f32 -1.442695, %v1766_v20  ;;  %v646_v11 = vrot.slane %v7716_v19, %v7888_v9 }
0x107d   :  { %7267 = vpow2.f32 %v5871_v25 }
0x1087   :  { %v7268_v26 = vpop.eup %7267 }
0x1088   :  { %v1770_v27 = vadd.f32 1.0, %v7268_v26 }
0x108a   :  { %7269 = vrcp.f32 %v1770_v27 }
0x1094   :  { %v7270_v28 = vpop.eup %7269 }
0x1095   :  { %v1784_v37 = vsub.f32 1.0, %v7270_v28  ;;  %v1790_v40 = vmul.f32 %v7270_v28, %v7844_v61 }
0x10eb   :  { %v1775_v30 = vpop.permute.xlu1 %1774 }
0x10ec   :  { %v1777_v31 = vmul.f32 %v7270_v28, %v1775_v30 }
0x10ee   :  { %1779 = vrot.lane.b32.xlu0 %v1777_v31, %s7442_s24 }
0x1160   :  { %v1780_v32 = vpop.permute.xlu0 %1779 }
0x1161   :  { %v1782_v33 = vadd.f32 %v1780_v32, %v1718_v17 }
0x1163   :  { %7271 = vtanh.f32 %v1782_v33 }
0x116d   :  { %v7272_v35 = vpop.eup %7271 }
0x116e   :  { %1786 = vrot.lane.b32.xlu1 %v7272_v35, %s7443_s28 }
0x1172   :  { %641 = vbcast.lane.b32.xlu1 %v639_v36, 256 }
0x11e0   :  { %v1787_v39 = vpop.permute.xlu1 %1786 }
0x11e1   :  { %v1789_v41 = vmul.f32 %v1787_v39, %v1784_v37 }
0x11e3   :  { %v7869_v42 = vadd.f32 %v1790_v40, %v1789_v41 }
0x11e4   :  { %v642_v44 = vpop.permute.xlu1 %641 }
0x11e5   :  { %v831_v46 = vmul.f32 %v7727_v23, %v642_v44  ;;  %v1871_v47 = vpack.c.bf16 %v7869_v42, %v7869_v42 }
0x11e7   :  { %v870_v48 = vadd.f32 %v7732_v24, %v831_v46  ;;  %1873 = vrot.lane.b32.xlu0 %v1871_v47, %s7443_s28 }
0x11e9   :  { %903 = vst.msk [vmem:[#allocation2 + $0xc] sm:$0x3] %vm896_vm4, %v870_v48 }
0x11f0   :  { %v1870_v57 = vld [vmem:[#allocation2 + $0xc] sm:$0x3] }
0x1259   :  { %v1874_v49 = vpop.permute.xlu0 %1873 }
0x125a   :  { %6494 = vmatmul.mubr.msk.bf16.vlgmr.msra.gmra.mrb[40].mxu0 %vm492_vm3, %v1874_v49 }
0x125b   :  { %6509 = vmatpush3.bf16.msra.mxu0 %v7676_v0  ;;  %6512 = vmatprep.mubr.msk.bf16.mxu0 %vm7441_vm2, %v7440_v63 }
0x125c   :  { %6510 = vmatprep.subr.bf16.mxu0 %v7440_v63 }
0x125f   :  { %6511 = vmatpush3.bf16.msra.mxu0 %v7684_v1 }
0x1260   :  { %6527 = vmatprep.subr.bf16.mxu0 %v7440_v63 }
0x132d   :  { %v1912_v50 = vpop.f32.mrb[40].mxu0 }
0x132e   :  { %v1913_v52 = vadd.f32 %v7705_v6, %v1912_v50  ;;  %v6495_v53 = vpop.f32.mrb[41].mxu0 }
0x132f   :  { %v1915_v55 = vpop.f32.mrb[42].mxu0  ;;  %v469_v53 = vld [vmem:[%s8949_s5 + $0x8] sm:$0xff] }
0x1330   :  { %1926 = vrot.lane.b32.xlu0 %v1913_v52, %s7442_s24  ;;  %v6496_v56 = vpop.f32.mrb[43].mxu0  ;;  %v1918_v58 = vadd.f32 %v1913_v52, %v1870_v57 }
0x1332   :  { %v5875_v59 = vmul.f32 -1.442695, %v1918_v58 }
0x1334   :  { %7273 = vpow2.f32 %v5875_v59 }
0x133e   :  { %v7274_v60 = vpop.eup %7273 }
0x133f   :  { %v1922_v62 = vadd.f32 1.0, %v7274_v60 }
0x1341   :  { %7275 = vrcp.f32 %v1922_v62 }
0x134b   :  { %v7276_v2 = vpop.eup %7275 }
0x134c   :  { %v1936_v12 = vsub.f32 1.0, %v7276_v2  ;;  %v1942_v20 = vmul.f32 %v7276_v2, %v7869_v42 }
0x13a2   :  { %v1927_v4 = vpop.permute.xlu0 %1926 }
0x13a3   :  { %v1929_v5 = vmul.f32 %v7276_v2, %v1927_v4 }
0x13a5   :  { %1931 = vrot.lane.b32.xlu1 %v1929_v5, %s7442_s24 }
0x1417   :  { %v1932_v7 = vpop.permute.xlu1 %1931 }
0x1418   :  { %v1934_v8 = vadd.f32 %v1932_v7, %v1870_v57 }
0x141a   :  { %7277 = vtanh.f32 %v1934_v8 }
0x1424   :  { %v7278_v10 = vpop.eup %7277 }
0x1425   :  { %1938 = vrot.lane.b32.xlu0 %v7278_v10, %s7443_s28 }
0x1429   :  { %648 = vbcast.lane.b32.xlu0 %v646_v11, 256 }
0x1497   :  { %v1939_v17 = vpop.permute.xlu0 %1938 }
0x1498   :  { %v1941_v25 = vmul.f32 %v1939_v17, %v1936_v12 }
0x149a   :  { %v7894_v26 = vadd.f32 %v1942_v20, %v1941_v25 }
0x149b   :  { %v649_v27 = vpop.permute.xlu0 %648 }
0x149c   :  { %v832_v28 = vmul.f32 %v7727_v23, %v649_v27  ;;  %v2023_v13 = vpack.c.bf16 %v7894_v26, %v7894_v26 }
0x149e   :  { %v871_v30 = vadd.f32 %v7732_v24, %v832_v28  ;;  %2025 = vrot.lane.b32.xlu1 %v2023_v13, %s7443_s28 }
0x14a0   :  { %904 = vst.msk [vmem:[#allocation2 + $0xe] sm:$0x3] %vm896_vm4, %v871_v30 }
0x14a7   :  { %v2022_v37 = vld [vmem:[#allocation2 + $0xe] sm:$0x3] }
0x1510   :  { %v2026_v19 = vpop.permute.xlu1 %2025 }
0x1511   :  { %6513 = vmatmul.mubr.msk.bf16.vlgmr.msra.gmra.mrb[44].mxu0 %vm492_vm3, %v2026_v19 }
0x1512   :  { %6528 = vmatpush3.bf16.msra.mxu0 %v7676_v0  ;;  %6531 = vmatprep.mubr.msk.bf16.mxu0 %vm7441_vm2, %v7440_v63 }
0x1513   :  { %6529 = vmatprep.subr.bf16.mxu0 %v7440_v63 }
0x1516   :  { %6530 = vmatpush3.bf16.msra.mxu0 %v7684_v1 }
0x1517   :  { %6546 = vmatprep.subr.bf16.mxu0 %v7440_v63 }
0x15e4   :  { %v2064_v31 = vpop.f32.mrb[44].mxu0 }
0x15e5   :  { %v2065_v32 = vadd.f32 %v7705_v6, %v2064_v31  ;;  %v6514_v33 = vpop.f32.mrb[45].mxu0 }
0x15e6   :  { %v2067_v35 = vpop.f32.mrb[46].mxu0 }
0x15e7   :  { %2078 = vrot.lane.b32.xlu1 %v2065_v32, %s7442_s24  ;;  %v6515_v36 = vpop.f32.mrb[47].mxu0  ;;  %v2070_v39 = vadd.f32 %v2065_v32, %v2022_v37 }
0x15e9   :  { %v5879_v40 = vmul.f32 -1.442695, %v2070_v39 }
0x15eb   :  { %7279 = vpow2.f32 %v5879_v40 }
0x15f5   :  { %v7280_v41 = vpop.eup %7279 }
0x15f6   :  { %v2074_v44 = vadd.f32 1.0, %v7280_v41 }
0x15f8   :  { %7281 = vrcp.f32 %v2074_v44 }
0x1602   :  { %v7282_v46 = vpop.eup %7281 }
0x1603   :  { %v2088_v55 = vsub.f32 1.0, %v7282_v46  ;;  %v2094_v57 = vmul.f32 %v7282_v46, %v7894_v26 }
0x1659   :  { %v2079_v47 = vpop.permute.xlu1 %2078 }
0x165a   :  { %v2081_v48 = vmul.f32 %v7282_v46, %v2079_v47 }
0x165c   :  { %2083 = vrot.lane.b32.xlu0 %v2081_v48, %s7442_s24 }
0x16ce   :  { %v2084_v49 = vpop.permute.xlu0 %2083 }
0x16cf   :  { %v2086_v50 = vadd.f32 %v2084_v49, %v2022_v37 }
0x16d1   :  { %7283 = vtanh.f32 %v2086_v50 }
0x16db   :  { %v7284_v52 = vpop.eup %7283 }
0x16dc   :  { %2090 = vrot.lane.b32.xlu1 %v7284_v52, %s7443_s28 }
0x16e0   :  { %479 = vperm.xlu1 %7234, %v469_v53  }
0x174e   :  { %v2091_v56 = vpop.permute.xlu1 %2090 }
0x174f   :  { %v2093_v58 = vmul.f32 %v2091_v56, %v2088_v55 }
0x1751   :  { %v7917_v59 = vadd.f32 %v2094_v57, %v2093_v58 }
0x1753   :  { %v2175_v60 = vpack.c.bf16 %v7917_v59, %v7917_v59 }
0x1755   :  { %2177 = vrot.lane.b32.xlu0 %v2175_v60, %s7443_s28 }
0x175f   :  { %v480_v62 = vpop.permute.xlu1 %479 }
0x1760   :  { %v577_v2 = vadd.f32 %v7711_v14, %v480_v62 }
0x1762   :  { %v7923_v4 = vmax.f32 %v577_v2, 0.0 }
0x1764   :  { %v653_v5 = vrot.slane %v7923_v4, %v7714_v18  ;;  %v660_v39 = vrot.slane %v7923_v4, %v7739_v38 }
0x1766   :  { %655 = vbcast.lane.b32.xlu0 %v653_v5, 256 }
0x17c7   :  { %v2178_v7 = vpop.permute.xlu0 %2177 }
0x17c8   :  { %6532 = vmatmul.mubr.msk.bf16.vlgmr.msra.gmra.mrb[48].mxu0 %vm492_vm3, %v2178_v7 }
0x17c9   :  { %6547 = vmatpush3.bf16.msra.mxu0 %v7676_v0  ;;  %6550 = vmatprep.mubr.msk.bf16.mxu0 %vm7441_vm2, %v7440_v63 }
0x17ca   :  { %6548 = vmatprep.subr.bf16.mxu0 %v7440_v63 }
0x17cd   :  { %6549 = vmatpush3.bf16.msra.mxu0 %v7684_v1 }
0x17ce   :  { %6565 = vmatprep.subr.bf16.mxu0 %v7440_v63 }
0x17d8   :  { %v656_v14 = vpop.permute.xlu0 %655 }
0x17d9   :  { %v833_v8 = vmul.f32 %v7727_v23, %v656_v14 }
0x17db   :  { %v872_v10 = vadd.f32 %v7732_v24, %v833_v8 }
0x17dd   :  { %905 = vst.msk [vmem:[#allocation2 + $0x10] sm:$0x3] %vm896_vm4, %v872_v10 }
0x17e4   :  { %v2174_v27 = vld [vmem:[#allocation2 + $0x10] sm:$0x3] }
0x189b   :  { %v2216_v11 = vpop.f32.mrb[48].mxu0 }
0x189c   :  { %v2217_v12 = vadd.f32 %v7705_v6, %v2216_v11  ;;  %v6533_v17 = vpop.f32.mrb[49].mxu0 }
0x189d   :  { %v2219_v20 = vpop.f32.mrb[50].mxu0 }
0x189e   :  { %2230 = vrot.lane.b32.xlu1 %v2217_v12, %s7442_s24  ;;  %v6534_v25 = vpop.f32.mrb[51].mxu0  ;;  %v2222_v28 = vadd.f32 %v2217_v12, %v2174_v27 }
0x189f   :  { %v667_v25 = vrot.slane %v7923_v4, %v7763_v3 }
0x18a0   :  { %v5883_v13 = vmul.f32 -1.442695, %v2222_v28 }
0x18a2   :  { %7285 = vpow2.f32 %v5883_v13 }
0x18ac   :  { %v7286_v30 = vpop.eup %7285 }
0x18ad   :  { %v2226_v19 = vadd.f32 1.0, %v7286_v30 }
0x18af   :  { %7287 = vrcp.f32 %v2226_v19 }
0x18b9   :  { %v7288_v31 = vpop.eup %7287 }
0x18ba   :  { %v2240_v40 = vsub.f32 1.0, %v7288_v31  ;;  %v2246_v44 = vmul.f32 %v7288_v31, %v7917_v59 }
0x1910   :  { %v2231_v32 = vpop.permute.xlu1 %2230 }
0x1911   :  { %v2233_v33 = vmul.f32 %v7288_v31, %v2231_v32 }
0x1913   :  { %2235 = vrot.lane.b32.xlu0 %v2233_v33, %s7442_s24 }
0x1985   :  { %v2236_v35 = vpop.permute.xlu0 %2235 }
0x1986   :  { %v2238_v36 = vadd.f32 %v2236_v35, %v2174_v27 }
0x1988   :  { %7289 = vtanh.f32 %v2238_v36 }
0x1992   :  { %v7290_v37 = vpop.eup %7289 }
0x1993   :  { %2242 = vrot.lane.b32.xlu1 %v7290_v37, %s7443_s28 }
0x1997   :  { %662 = vbcast.lane.b32.xlu1 %v660_v39, 256 }
0x1a05   :  { %v2243_v41 = vpop.permute.xlu1 %2242 }
0x1a06   :  { %v2245_v46 = vmul.f32 %v2243_v41, %v2240_v40 }
0x1a08   :  { %v7944_v47 = vadd.f32 %v2246_v44, %v2245_v46 }
0x1a09   :  { %v663_v48 = vpop.permute.xlu1 %662 }
0x1a0a   :  { %v834_v49 = vmul.f32 %v7727_v23, %v663_v48  ;;  %v2327_v50 = vpack.c.bf16 %v7944_v47, %v7944_v47 }
0x1a0c   :  { %v873_v52 = vadd.f32 %v7732_v24, %v834_v49  ;;  %2329 = vrot.lane.b32.xlu0 %v2327_v50, %s7443_s28 }
0x1a0e   :  { %906 = vst.msk [vmem:[#allocation2 + $0x12] sm:$0x3] %vm896_vm4, %v873_v52 }
0x1a15   :  { %v2326_v62 = vld [vmem:[#allocation2 + $0x12] sm:$0x3] }
0x1a7e   :  { %v2330_v53 = vpop.permute.xlu0 %2329 }
0x1a7f   :  { %6551 = vmatmul.mubr.msk.bf16.vlgmr.msra.gmra.mrb[52].mxu0 %vm492_vm3, %v2330_v53 }
0x1a80   :  { %6566 = vmatpush3.bf16.msra.mxu0 %v7676_v0  ;;  %6569 = vmatprep.mubr.msk.bf16.mxu0 %vm7441_vm2, %v7440_v63 }
0x1a81   :  { %6567 = vmatprep.subr.bf16.mxu0 %v7440_v63 }
0x1a84   :  { %6568 = vmatpush3.bf16.msra.mxu0 %v7684_v1 }
0x1a85   :  { %6584 = vmatprep.subr.bf16.mxu0 %v7440_v63 }
0x1b52   :  { %v2368_v55 = vpop.f32.mrb[52].mxu0 }
0x1b53   :  { %v2369_v56 = vadd.f32 %v7705_v6, %v2368_v55  ;;  %v6552_v57 = vpop.f32.mrb[53].mxu0 }
0x1b54   :  { %v2371_v58 = vpop.f32.mrb[54].mxu0 }
0x1b55   :  { %2382 = vrot.lane.b32.xlu0 %v2369_v56, %s7442_s24  ;;  %v6553_v60 = vpop.f32.mrb[55].mxu0  ;;  %v2374_v2 = vadd.f32 %v2369_v56, %v2326_v62  ;;  %v674_v58 = vrot.slane %v7923_v4, %v7788_v43 }
0x1b57   :  { %v5887_v5 = vmul.f32 -1.442695, %v2374_v2 }
0x1b59   :  { %7291 = vpow2.f32 %v5887_v5 }
0x1b63   :  { %v7292_v7 = vpop.eup %7291 }
0x1b64   :  { %v2378_v14 = vadd.f32 1.0, %v7292_v7 }
0x1b66   :  { %7293 = vrcp.f32 %v2378_v14 }
0x1b70   :  { %v7294_v8 = vpop.eup %7293 }
0x1b71   :  { %v2392_v27 = vsub.f32 1.0, %v7294_v8  ;;  %v2398_v13 = vmul.f32 %v7294_v8, %v7944_v47 }
0x1bc7   :  { %v2383_v10 = vpop.permute.xlu0 %2382 }
0x1bc8   :  { %v2385_v11 = vmul.f32 %v7294_v8, %v2383_v10 }
0x1bca   :  { %2387 = vrot.lane.b32.xlu1 %v2385_v11, %s7442_s24 }
0x1c3c   :  { %v2388_v12 = vpop.permute.xlu1 %2387 }
0x1c3d   :  { %v2390_v17 = vadd.f32 %v2388_v12, %v2326_v62 }
0x1c3f   :  { %7295 = vtanh.f32 %v2390_v17  ;;  %v8000_v17 = vld [vmem:[%s8952_s8] sm:$0xff]  }
0x1c49   :  { %v7296_v20 = vpop.eup %7295 }
0x1c4a   :  { %2394 = vrot.lane.b32.xlu0 %v7296_v20, %s7443_s28  ;;  %v8009_v20 = vld [vmem:[%s8952_s8 + $0x8] sm:$0xff]  }
0x1c4e   :  { %669 = vbcast.lane.b32.xlu0 %v667_v25, 256 }
0x1cbc   :  { %v2395_v28 = vpop.permute.xlu0 %2394 }
0x1cbd   :  { %v2397_v30 = vmul.f32 %v2395_v28, %v2392_v27 }
0x1cbf   :  { %v7966_v19 = vadd.f32 %v2398_v13, %v2397_v30 }
0x1cc0   :  { %v670_v31 = vpop.permute.xlu0 %669 }
0x1cc1   :  { %v835_v32 = vmul.f32 %v7727_v23, %v670_v31  ;;  %v2479_v33 = vpack.c.bf16 %v7966_v19, %v7966_v19 }
0x1cc3   :  { %v874_v35 = vadd.f32 %v7732_v24, %v835_v32  ;;  %2481 = vrot.lane.b32.xlu1 %v2479_v33, %s7443_s28 }
0x1cc5   :  { %907 = vst.msk [vmem:[#allocation2 + $0x14] sm:$0x3] %vm896_vm4, %v874_v35 }
0x1ccc   :  { %v2478_v46 = vld [vmem:[#allocation2 + $0x14] sm:$0x3] }
0x1d35   :  { %v2482_v36 = vpop.permute.xlu1 %2481 }
0x1d36   :  { %6570 = vmatmul.mubr.msk.bf16.vlgmr.msra.gmra.mrb[56].mxu0 %vm492_vm3, %v2482_v36 }
0x1d37   :  { %6585 = vmatpush3.bf16.msra.mxu0 %v7676_v0  ;;  %6588 = vmatprep.mubr.msk.bf16.mxu0 %vm7441_vm2, %v7440_v63 }
0x1d38   :  { %6586 = vmatprep.subr.bf16.mxu0 %v7440_v63 }
0x1d3b   :  { %6587 = vmatpush3.bf16.msra.mxu0 %v7684_v1 }
0x1d3c   :  { %6603 = vmatprep.subr.bf16.mxu0 %v7440_v63 }
0x1e09   :  { %v2520_v37 = vpop.f32.mrb[56].mxu0 }
0x1e0a   :  { %v2521_v39 = vadd.f32 %v7705_v6, %v2520_v37  ;;  %v6571_v40 = vpop.f32.mrb[57].mxu0 }
0x1e0b   :  { %v2523_v41 = vpop.f32.mrb[58].mxu0 }
0x1e0c   :  { %2534 = vrot.lane.b32.xlu1 %v2521_v39, %s7442_s24  ;;  %v6572_v44 = vpop.f32.mrb[59].mxu0  ;;  %v2526_v48 = vadd.f32 %v2521_v39, %v2478_v46 }
0x1e0e   :  { %v5891_v0 = vmul.f32 -1.442695, %v2526_v48 }
0x1e10   :  { %7297 = vpow2.f32 %v5891_v0 }
0x1e1a   :  { %v7298_v49 = vpop.eup %7297 }
0x1e1b   :  { %v2530_v50 = vadd.f32 1.0, %v7298_v49 }
0x1e1d   :  { %7299 = vrcp.f32 %v2530_v50 }
0x1e27   :  { %v7300_v52 = vpop.eup %7299 }
0x1e28   :  { %v2544_v60 = vsub.f32 1.0, %v7300_v52  ;;  %v2550_v2 = vmul.f32 %v7300_v52, %v7966_v19 }
0x1e7e   :  { %v2535_v53 = vpop.permute.xlu1 %2534 }
0x1e7f   :  { %v2537_v1 = vmul.f32 %v7300_v52, %v2535_v53 }
0x1e81   :  { %2539 = vrot.lane.b32.xlu0 %v2537_v1, %s7442_s24 }
0x1ef3   :  { %v2540_v55 = vpop.permute.xlu0 %2539 }
0x1ef4   :  { %v2542_v56 = vadd.f32 %v2540_v55, %v2478_v46  ;;  %v681_v46 = vrot.slane %v7923_v4, %v7813_v16 }
0x1ef6   :  { %7301 = vtanh.f32 %v2542_v56 }
0x1f00   :  { %v7302_v57 = vpop.eup %7301 }
0x1f01   :  { %2546 = vrot.lane.b32.xlu1 %v7302_v57, %s7443_s28 }
0x1f05   :  { %676 = vbcast.lane.b32.xlu1 %v674_v58, 256 }
0x1f73   :  { %v2547_v62 = vpop.permute.xlu1 %2546 }
0x1f74   :  { %v2549_v5 = vmul.f32 %v2547_v62, %v2544_v60 }
0x1f76   :  { %v7988_v7 = vadd.f32 %v2550_v2, %v2549_v5 }
0x1f77   :  { %v677_v14 = vpop.permute.xlu1 %676 }
0x1f78   :  { %v836_v8 = vmul.f32 %v7727_v23, %v677_v14  ;;  %v2631_v10 = vpack.c.bf16 %v7988_v7, %v7988_v7 }
0x1f7a   :  { %v875_v11 = vadd.f32 %v7732_v24, %v836_v8  ;;  %2633 = vrot.lane.b32.xlu0 %v2631_v10, %s7443_s28 }
0x1f7c   :  { %908 = vst.msk [vmem:[#allocation2 + $0x16] sm:$0x3] %vm896_vm4, %v875_v11 }
0x1f83   :  { %v2630_v31 = vld [vmem:[#allocation2 + $0x16] sm:$0x3] }
0x1fec   :  { %v2634_v12 = vpop.permute.xlu0 %2633 }
0x1fed   :  { %6589 = vmatmul.mubr.msk.bf16.vlgmr.msra.gmra.mrb[60].mxu0 %vm492_vm3, %v2634_v12 }
0x1fee   :  { %6604 = vmatpush3.bf16.msra.mxu0 %v8000_v17  ;;  %6607 = vmatprep.mubr.msk.bf16.mxu0 %vm7441_vm2, %v7440_v63 }
0x1fef   :  { %6605 = vmatprep.subr.bf16.mxu0 %v7440_v63 }
0x1ff2   :  { %6606 = vmatpush3.bf16.msra.mxu0 %v8009_v20 }
0x1ff3   :  { %6622 = vmatprep.subr.bf16.mxu0 %v7440_v63 }
0x20c0   :  { %v2672_v25 = vpop.f32.mrb[60].mxu0 }
0x20c1   :  { %v2673_v27 = vadd.f32 %v7705_v6, %v2672_v25  ;;  %v6590_v28 = vpop.f32.mrb[61].mxu0 }
0x20c2   :  { %v2675_v13 = vpop.f32.mrb[62].mxu0 }
0x20c3   :  { %2686 = vrot.lane.b32.xlu0 %v2673_v27, %s7442_s24  ;;  %v6591_v30 = vpop.f32.mrb[63].mxu0  ;;  %v2678_v32 = vadd.f32 %v2673_v27, %v2630_v31 }
0x20c5   :  { %v5895_v33 = vmul.f32 -1.442695, %v2678_v32 }
0x20c7   :  { %7303 = vpow2.f32 %v5895_v33 }
0x20d1   :  { %v7304_v35 = vpop.eup %7303 }
0x20d2   :  { %v2682_v36 = vadd.f32 1.0, %v7304_v35 }
0x20d4   :  { %7305 = vrcp.f32 %v2682_v36 }
0x20de   :  { %v7306_v37 = vpop.eup %7305 }
0x20df   :  { %v2696_v48 = vsub.f32 1.0, %v7306_v37  ;;  %v2702_v49 = vmul.f32 %v7306_v37, %v7988_v7 }
0x2135   :  { %v2687_v39 = vpop.permute.xlu0 %2686 }
0x2136   :  { %v2689_v40 = vmul.f32 %v7306_v37, %v2687_v39 }
0x2138   :  { %2691 = vrot.lane.b32.xlu1 %v2689_v40, %s7442_s24  ;;  %v8052_v40 = vld [vmem:[%s8954_s6] ss:$0 sm:$0xff] }
0x21aa   :  { %v2692_v41 = vpop.permute.xlu1 %2691 }
0x21ab   :  { %v2694_v44 = vadd.f32 %v2692_v41, %v2630_v31  ;;  %v688_v31 = vrot.slane %v7923_v4, %v7838_v54 }
0x21ad   :  { %7307 = vtanh.f32 %v2694_v44 }
0x21b7   :  { %v7308_v6 = vpop.eup %7307 }
0x21b8   :  { %2698 = vrot.lane.b32.xlu0 %v7308_v6, %s7443_s28  ;;  %v8060_v6 = vld [vmem:[%s8955_s7] ss:$0 sm:$0xff] }
0x21bc   :  { %683 = vbcast.lane.b32.xlu0 %v681_v46, 256 }
0x222a   :  { %v2699_v0 = vpop.permute.xlu0 %2698 }
0x222b   :  { %v2701_v50 = vmul.f32 %v2699_v0, %v2696_v48 }
0x222d   :  { %v8020_v52 = vadd.f32 %v2702_v49, %v2701_v50 }
0x222e   :  { %v684_v53 = vpop.permute.xlu0 %683 }
0x222f   :  { %v837_v1 = vmul.f32 %v7727_v23, %v684_v53  ;;  %v2783_v55 = vpack.c.bf16 %v8020_v52, %v8020_v52 }
0x2231   :  { %v876_v56 = vadd.f32 %v7732_v24, %v837_v1  ;;  %2785 = vrot.lane.b32.xlu1 %v2783_v55, %s7443_s28  ;;  %v8038_v24 = vld [vmem:[%s8953_s9] ss:$0 sm:$0xff] }
0x2233   :  { %909 = vst.msk [vmem:[#allocation2 + $0x18] sm:$0x3] %vm896_vm4, %v876_v56 }
0x223a   :  { %v2782_v5 = vld [vmem:[#allocation2 + $0x18] sm:$0x3] }
0x22a3   :  { %v2786_v57 = vpop.permute.xlu1 %2785 }
0x22a4   :  { %6608 = vmatmul.mubr.msk.bf16.vlgmr.msra.gmra.mrb[64].mxu0 %vm492_vm3, %v2786_v57 }
0x22a5   :  { %6623 = vmatpush3.bf16.msra.mxu0 %v8000_v17  ;;  %6626 = vmatprep.mubr.msk.bf16.mxu0 %vm7441_vm2, %v7440_v63 }
0x22a6   :  { %6624 = vmatprep.subr.bf16.mxu0 %v7440_v63 }
0x22a9   :  { %6625 = vmatpush3.bf16.msra.mxu0 %v8009_v20 }
0x22aa   :  { %6641 = vmatprep.subr.bf16.mxu0 %v7440_v63 }
0x2377   :  { %v2824_v23 = vpop.f32.mrb[64].mxu0 }
0x2378   :  { %v2825_v58 = vadd.f32 %v8038_v24, %v2824_v23  ;;  %v6609_v60 = vpop.f32.mrb[65].mxu0 }
0x2379   :  { %v2827_v62 = vpop.f32.mrb[66].mxu0 }
0x237a   :  { %2838 = vrot.lane.b32.xlu1 %v2825_v58, %s7442_s24  ;;  %v6610_v2 = vpop.f32.mrb[67].mxu0  ;;  %v2830_v14 = vadd.f32 %v2825_v58, %v2782_v5 }
0x237c   :  { %v5899_v8 = vmul.f32 -1.442695, %v2830_v14 }
0x237e   :  { %7309 = vpow2.f32 %v5899_v8 }
0x2388   :  { %v7310_v10 = vpop.eup %7309 }
0x2389   :  { %v2834_v11 = vadd.f32 1.0, %v7310_v10  ;;  %v695_v10 = vrot.slane %v7923_v4, %v7863_v34 }
0x238b   :  { %7311 = vrcp.f32 %v2834_v11 }
0x2395   :  { %v7312_v12 = vpop.eup %7311 }
0x2396   :  { %v2848_v32 = vsub.f32 1.0, %v7312_v12  ;;  %v2854_v35 = vmul.f32 %v7312_v12, %v8020_v52 }
0x23ec   :  { %v2839_v25 = vpop.permute.xlu1 %2838 }
0x23ed   :  { %v2841_v27 = vmul.f32 %v7312_v12, %v2839_v25 }
0x23ef   :  { %2843 = vrot.lane.b32.xlu0 %v2841_v27, %s7442_s24 }
0x2461   :  { %v2844_v28 = vpop.permute.xlu0 %2843 }
0x2462   :  { %v2846_v13 = vadd.f32 %v2844_v28, %v2782_v5 }
0x2464   :  { %7313 = vtanh.f32 %v2846_v13 }
0x246e   :  { %v7314_v30 = vpop.eup %7313 }
0x246f   :  { %2850 = vrot.lane.b32.xlu1 %v7314_v30, %s7443_s28 }
0x2473   :  { %690 = vbcast.lane.b32.xlu1 %v688_v31, 256 }
0x24e1   :  { %v2851_v33 = vpop.permute.xlu1 %2850 }
0x24e2   :  { %v2853_v36 = vmul.f32 %v2851_v33, %v2848_v32 }
0x24e4   :  { %v8047_v37 = vadd.f32 %v2854_v35, %v2853_v36 }
0x24e5   :  { %v691_v39 = vpop.permute.xlu1 %690 }
0x24e6   :  { %v838_v41 = vmul.f32 %v8052_v40, %v691_v39  ;;  %v2935_v44 = vpack.c.bf16 %v8047_v37, %v8047_v37 }
0x24e8   :  { %v877_v46 = vadd.f32 %v8060_v6, %v838_v41  ;;  %2937 = vrot.lane.b32.xlu0 %v2935_v44, %s7443_s28 }
0x24ea   :  { %910 = vst.msk [vmem:[#allocation2 + $0x1a] sm:$0x3] %vm896_vm4, %v877_v46 }
0x24f1   :  { %v2934_v55 = vld [vmem:[#allocation2 + $0x1a] sm:$0x3] }
0x255a   :  { %v2938_v48 = vpop.permute.xlu0 %2937 }
0x255b   :  { %6627 = vmatmul.mubr.msk.bf16.vlgmr.msra.gmra.mrb[68].mxu0 %vm492_vm3, %v2938_v48 }
0x255c   :  { %6642 = vmatpush3.bf16.msra.mxu0 %v8000_v17  ;;  %6645 = vmatprep.mubr.msk.bf16.mxu0 %vm7441_vm2, %v7440_v63 }
0x255d   :  { %6643 = vmatprep.subr.bf16.mxu0 %v7440_v63 }
0x2560   :  { %6644 = vmatpush3.bf16.msra.mxu0 %v8009_v20 }
0x2561   :  { %6660 = vmatprep.subr.bf16.mxu0 %v7440_v63 }
0x262e   :  { %v2976_v0 = vpop.f32.mrb[68].mxu0 }
0x262f   :  { %v2977_v49 = vadd.f32 %v8038_v24, %v2976_v0  ;;  %v6628_v50 = vpop.f32.mrb[69].mxu0 }
0x2630   :  { %v2979_v53 = vpop.f32.mrb[70].mxu0 }
0x2631   :  { %2990 = vrot.lane.b32.xlu0 %v2977_v49, %s7442_s24  ;;  %v6629_v1 = vpop.f32.mrb[71].mxu0  ;;  %v2982_v56 = vadd.f32 %v2977_v49, %v2934_v55 }
0x2633   :  { %v5903_v57 = vmul.f32 -1.442695, %v2982_v56 }
0x2635   :  { %7315 = vpow2.f32 %v5903_v57 }
0x263f   :  { %v7316_v23 = vpop.eup %7315 }
0x2640   :  { %v2986_v58 = vadd.f32 1.0, %v7316_v23 }
0x2642   :  { %7317 = vrcp.f32 %v2986_v58  ;;  %v702_v58 = vrot.slane %v7923_v4, %v7888_v9 }
0x264c   :  { %v7318_v60 = vpop.eup %7317 }
0x264d   :  { %v3000_v11 = vsub.f32 1.0, %v7318_v60  ;;  %v3006_v25 = vmul.f32 %v7318_v60, %v8047_v37 }
0x26a3   :  { %v2991_v62 = vpop.permute.xlu0 %2990 }
0x26a4   :  { %v2993_v2 = vmul.f32 %v7318_v60, %v2991_v62 }
0x26a6   :  { %2995 = vrot.lane.b32.xlu1 %v2993_v2, %s7442_s24 }
0x2718   :  { %v2996_v5 = vpop.permute.xlu1 %2995 }
0x2719   :  { %v2998_v14 = vadd.f32 %v2996_v5, %v2934_v55 }
0x271b   :  { %7319 = vtanh.f32 %v2998_v14 }
0x2725   :  { %v7320_v8 = vpop.eup %7319 }
0x2726   :  { %3002 = vrot.lane.b32.xlu0 %v7320_v8, %s7443_s28 }
0x272a   :  { %697 = vbcast.lane.b32.xlu0 %v695_v10, 256 }
0x2798   :  { %v3003_v12 = vpop.permute.xlu0 %3002 }
0x2799   :  { %v3005_v27 = vmul.f32 %v3003_v12, %v3000_v11 }
0x279b   :  { %v8079_v28 = vadd.f32 %v3006_v25, %v3005_v27 }
0x279c   :  { %v698_v13 = vpop.permute.xlu0 %697 }
0x279d   :  { %v839_v30 = vmul.f32 %v8052_v40, %v698_v13  ;;  %v3087_v31 = vpack.c.bf16 %v8079_v28, %v8079_v28 }
0x279f   :  { %v878_v32 = vadd.f32 %v8060_v6, %v839_v30  ;;  %3089 = vrot.lane.b32.xlu1 %v3087_v31, %s7443_s28 }
0x27a1   :  { %911 = vst.msk [vmem:[#allocation2 + $0x1c] sm:$0x3] %vm896_vm4, %v878_v32 }
0x27a8   :  { %v3086_v46 = vld [vmem:[#allocation2 + $0x1c] sm:$0x3] }
0x2811   :  { %v3090_v33 = vpop.permute.xlu1 %3089 }
0x2812   :  { %6646 = vmatmul.mubr.msk.bf16.vlgmr.msra.gmra.mrb[72].mxu0 %vm492_vm3, %v3090_v33 }
0x2813   :  { %6661 = vmatpush3.bf16.msra.mxu0 %v8000_v17  ;;  %6664 = vmatprep.mubr.msk.bf16.mxu0 %vm7441_vm2, %v7440_v63 }
0x2814   :  { %6662 = vmatprep.subr.bf16.mxu0 %v7440_v63 }
0x2817   :  { %6663 = vmatpush3.bf16.msra.mxu0 %v8009_v20 }
0x2818   :  { %6679 = vmatprep.subr.bf16.mxu0 %v7440_v63 }
0x28e5   :  { %v3128_v35 = vpop.f32.mrb[72].mxu0 }
0x28e6   :  { %v3129_v36 = vadd.f32 %v8038_v24, %v3128_v35  ;;  %v6647_v39 = vpop.f32.mrb[73].mxu0 }
0x28e7   :  { %v3131_v41 = vpop.f32.mrb[74].mxu0 }
0x28e8   :  { %3142 = vrot.lane.b32.xlu1 %v3129_v36, %s7442_s24  ;;  %v6648_v44 = vpop.f32.mrb[75].mxu0  ;;  %v3134_v48 = vadd.f32 %v3129_v36, %v3086_v46 }
0x28ea   :  { %v5907_v0 = vmul.f32 -1.442695, %v3134_v48 }
0x28ec   :  { %7321 = vpow2.f32 %v5907_v0 }
0x28f6   :  { %v7322_v49 = vpop.eup %7321 }
0x28f7   :  { %v3138_v50 = vadd.f32 1.0, %v7322_v49 }
0x28f9   :  { %7323 = vrcp.f32 %v3138_v50  ;;  %v470_v50 = vld [vmem:[%s8949_s5 + $0x10] sm:$0xff] }
0x2903   :  { %v7324_v53 = vpop.eup %7323 }
0x2904   :  { %v3152_v60 = vsub.f32 1.0, %v7324_v53  ;;  %v3158_v2 = vmul.f32 %v7324_v53, %v8079_v28 }
0x295a   :  { %v3143_v1 = vpop.permute.xlu1 %3142 }
0x295b   :  { %v3145_v55 = vmul.f32 %v7324_v53, %v3143_v1 }
0x295d   :  { %3147 = vrot.lane.b32.xlu0 %v3145_v55, %s7442_s24 }
0x29cf   :  { %v3148_v56 = vpop.permute.xlu0 %3147 }
0x29d0   :  { %v3150_v57 = vadd.f32 %v3148_v56, %v3086_v46 }
0x29d2   :  { %7325 = vtanh.f32 %v3150_v57 }
0x29dc   :  { %v7326_v23 = vpop.eup %7325 }
0x29dd   :  { %3154 = vrot.lane.b32.xlu1 %v7326_v23, %s7443_s28 }
0x29e1   :  { %704 = vbcast.lane.b32.xlu1 %v702_v58, 256 }
0x2a4f   :  { %v3155_v62 = vpop.permute.xlu1 %3154 }
0x2a50   :  { %v3157_v5 = vmul.f32 %v3155_v62, %v3152_v60 }
0x2a52   :  { %v8101_v14 = vadd.f32 %v3158_v2, %v3157_v5 }
0x2a53   :  { %v705_v8 = vpop.permute.xlu1 %704 }
0x2a54   :  { %v840_v10 = vmul.f32 %v8052_v40, %v705_v8  ;;  %v3239_v11 = vpack.c.bf16 %v8101_v14, %v8101_v14 }
0x2a56   :  { %v879_v12 = vadd.f32 %v8060_v6, %v840_v10  ;;  %3241 = vrot.lane.b32.xlu0 %v3239_v11, %s7443_s28 }
0x2a58   :  { %912 = vst.msk [vmem:[#allocation2 + $0x1e] sm:$0x3] %vm896_vm4, %v879_v12 }
0x2a5f   :  { %v3238_v32 = vld [vmem:[#allocation2 + $0x1e] sm:$0x3] }
0x2ac8   :  { %v3242_v4 = vpop.permute.xlu0 %3241 }
0x2ac9   :  { %6665 = vmatmul.mubr.msk.bf16.vlgmr.msra.gmra.mrb[76].mxu0 %vm492_vm3, %v3242_v4 }
0x2aca   :  { %6680 = vmatpush3.bf16.msra.mxu0 %v8000_v17  ;;  %6683 = vmatprep.mubr.msk.bf16.mxu0 %vm7441_vm2, %v7440_v63 }
0x2acb   :  { %6681 = vmatprep.subr.bf16.mxu0 %v7440_v63 }
0x2ace   :  { %6682 = vmatpush3.bf16.msra.mxu0 %v8009_v20 }
0x2acf   :  { %6698 = vmatprep.subr.bf16.mxu0 %v7440_v63 }
0x2b9c   :  { %v3280_v25 = vpop.f32.mrb[76].mxu0 }
0x2b9d   :  { %v3281_v27 = vadd.f32 %v8038_v24, %v3280_v25  ;;  %v6666_v13 = vpop.f32.mrb[77].mxu0 }
0x2b9e   :  { %v3283_v30 = vpop.f32.mrb[78].mxu0 }
0x2b9f   :  { %3294 = vrot.lane.b32.xlu0 %v3281_v27, %s7442_s24  ;;  %v6667_v31 = vpop.f32.mrb[79].mxu0  ;;  %v3286_v33 = vadd.f32 %v3281_v27, %v3238_v32 }
0x2ba1   :  { %v5911_v35 = vmul.f32 -1.442695, %v3286_v33 }
0x2ba3   :  { %7327 = vpow2.f32 %v5911_v35 }
0x2bad   :  { %v7328_v36 = vpop.eup %7327 }
0x2bae   :  { %v3290_v39 = vadd.f32 1.0, %v7328_v36 }
0x2bb0   :  { %7329 = vrcp.f32 %v3290_v39 }
0x2bba   :  { %v7330_v41 = vpop.eup %7329 }
0x2bbb   :  { %v3304_v53 = vsub.f32 1.0, %v7330_v41  ;;  %v3310_v55 = vmul.f32 %v7330_v41, %v8101_v14 }
0x2c11   :  { %v3295_v44 = vpop.permute.xlu0 %3294 }
0x2c12   :  { %v3297_v46 = vmul.f32 %v7330_v41, %v3295_v44 }
0x2c14   :  { %3299 = vrot.lane.b32.xlu1 %v3297_v46, %s7442_s24 }
0x2c86   :  { %v3300_v48 = vpop.permute.xlu1 %3299 }
0x2c87   :  { %v3302_v0 = vadd.f32 %v3300_v48, %v3238_v32 }
0x2c89   :  { %7331 = vtanh.f32 %v3302_v0 }
0x2c93   :  { %v7332_v49 = vpop.eup %7331 }
0x2c94   :  { %3306 = vrot.lane.b32.xlu0 %v7332_v49, %s7443_s28 }
0x2c98   :  { %484 = vperm.xlu0 %7233, %v470_v50  }
0x2d06   :  { %v3307_v1 = vpop.permute.xlu0 %3306 }
0x2d07   :  { %v3309_v56 = vmul.f32 %v3307_v1, %v3304_v53 }
0x2d09   :  { %v8124_v57 = vadd.f32 %v3310_v55, %v3309_v56 }
0x2d0b   :  { %v3391_v23 = vpack.c.bf16 %v8124_v57, %v8124_v57 }
0x2d0d   :  { %3393 = vrot.lane.b32.xlu1 %v3391_v23, %s7443_s28 }
0x2d17   :  { %v485_v58 = vpop.permute.xlu0 %484 }
0x2d18   :  { %v582_v60 = vadd.f32 %v7722_v22, %v485_v58 }
0x2d1a   :  { %v8130_v62 = vmax.f32 %v582_v60, 0.0 }
0x2d1c   :  { %v709_v2 = vrot.slane %v8130_v62, %v7714_v18  ;;  %v716_v48 = vrot.slane %v8130_v62, %v7739_v38 }
0x2d1e   :  { %711 = vbcast.lane.b32.xlu1 %v709_v2, 256 }
0x2d7f   :  { %v3394_v5 = vpop.permute.xlu1 %3393 }
0x2d80   :  { %6684 = vmatmul.mubr.msk.bf16.vlgmr.msra.gmra.mrb[80].mxu0 %vm492_vm3, %v3394_v5 }
0x2d81   :  { %6699 = vmatpush3.bf16.msra.mxu0 %v8000_v17  ;;  %6702 = vmatprep.mubr.msk.bf16.mxu0 %vm7441_vm2, %v7440_v63 }
0x2d82   :  { %6700 = vmatprep.subr.bf16.mxu0 %v7440_v63 }
0x2d85   :  { %6701 = vmatpush3.bf16.msra.mxu0 %v8009_v20 }
0x2d86   :  { %6717 = vmatprep.subr.bf16.mxu0 %v7440_v63 }
0x2d90   :  { %v712_v22 = vpop.permute.xlu1 %711 }
0x2d91   :  { %v841_v8 = vmul.f32 %v8052_v40, %v712_v22 }
0x2d93   :  { %v880_v10 = vadd.f32 %v8060_v6, %v841_v8 }
0x2d95   :  { %913 = vst.msk [vmem:[#allocation2 + $0x20] sm:$0x3] %vm896_vm4, %v880_v10 }
0x2d9c   :  { %v3390_v13 = vld [vmem:[#allocation2 + $0x20] sm:$0x3] }
0x2e53   :  { %v3432_v11 = vpop.f32.mrb[80].mxu0 }
0x2e54   :  { %v3433_v12 = vadd.f32 %v8038_v24, %v3432_v11  ;;  %v6685_v4 = vpop.f32.mrb[81].mxu0 }
0x2e55   :  { %v3435_v25 = vpop.f32.mrb[82].mxu0 }
0x2e56   :  { %3446 = vrot.lane.b32.xlu0 %v3433_v12, %s7442_s24  ;;  %v6686_v27 = vpop.f32.mrb[83].mxu0  ;;  %v3438_v30 = vadd.f32 %v3433_v12, %v3390_v13 }
0x2e58   :  { %v5915_v31 = vmul.f32 -1.442695, %v3438_v30 }
0x2e5a   :  { %7333 = vpow2.f32 %v5915_v31 }
0x2e64   :  { %v7334_v32 = vpop.eup %7333 }
0x2e65   :  { %v3442_v33 = vadd.f32 1.0, %v7334_v32 }
0x2e67   :  { %7335 = vrcp.f32 %v3442_v33 }
0x2e71   :  { %v7336_v35 = vpop.eup %7335 }
0x2e72   :  { %v3456_v0 = vsub.f32 1.0, %v7336_v35  ;;  %v3462_v50 = vmul.f32 %v7336_v35, %v8124_v57 }
0x2ec8   :  { %v3447_v36 = vpop.permute.xlu0 %3446 }
0x2ec9   :  { %v3449_v39 = vmul.f32 %v7336_v35, %v3447_v36  ;;  %v723_v36 = vrot.slane %v8130_v62, %v7763_v3 }
0x2ecb   :  { %3451 = vrot.lane.b32.xlu1 %v3449_v39, %s7442_s24 }
0x2f3d   :  { %v3452_v41 = vpop.permute.xlu1 %3451 }
0x2f3e   :  { %v3454_v44 = vadd.f32 %v3452_v41, %v3390_v13 }
0x2f40   :  { %7337 = vtanh.f32 %v3454_v44 }
0x2f4a   :  { %v7338_v46 = vpop.eup %7337 }
0x2f4b   :  { %3458 = vrot.lane.b32.xlu0 %v7338_v46, %s7443_s28 }
0x2f4f   :  { %718 = vbcast.lane.b32.xlu0 %v716_v48, 256 }
0x2fbd   :  { %v3459_v49 = vpop.permute.xlu0 %3458 }
0x2fbe   :  { %v3461_v53 = vmul.f32 %v3459_v49, %v3456_v0 }
0x2fc0   :  { %v8151_v1 = vadd.f32 %v3462_v50, %v3461_v53 }
0x2fc1   :  { %v719_v55 = vpop.permute.xlu0 %718 }
0x2fc2   :  { %v842_v56 = vmul.f32 %v8052_v40, %v719_v55  ;;  %v3543_v23 = vpack.c.bf16 %v8151_v1, %v8151_v1 }
0x2fc4   :  { %v881_v58 = vadd.f32 %v8060_v6, %v842_v56  ;;  %3545 = vrot.lane.b32.xlu1 %v3543_v23, %s7443_s28 }
0x2fc6   :  { %914 = vst.msk [vmem:[#allocation2 + $0x22] sm:$0x3] %vm896_vm4, %v881_v58 }
0x2fcd   :  { %v3542_v11 = vld [vmem:[#allocation2 + $0x22] sm:$0x3] }
0x3036   :  { %v3546_v60 = vpop.permute.xlu1 %3545 }
0x3037   :  { %6703 = vmatmul.mubr.msk.bf16.vlgmr.msra.gmra.mrb[84].mxu0 %vm492_vm3, %v3546_v60 }
0x3038   :  { %6718 = vmatpush3.bf16.msra.mxu0 %v8000_v17  ;;  %6721 = vmatprep.mubr.msk.bf16.mxu0 %vm7441_vm2, %v7440_v63 }
0x3039   :  { %6719 = vmatprep.subr.bf16.mxu0 %v7440_v63 }
0x303c   :  { %6720 = vmatpush3.bf16.msra.mxu0 %v8009_v20 }
0x303d   :  { %6736 = vmatprep.subr.bf16.mxu0 %v7440_v63 }
0x310a   :  { %v3584_v2 = vpop.f32.mrb[84].mxu0 }
0x310b   :  { %v3585_v5 = vadd.f32 %v8038_v24, %v3584_v2  ;;  %v6704_v22 = vpop.f32.mrb[85].mxu0 }
0x310c   :  { %v3587_v8 = vpop.f32.mrb[86].mxu0 }
0x310d   :  { %3598 = vrot.lane.b32.xlu1 %v3585_v5, %s7442_s24  ;;  %v6705_v10 = vpop.f32.mrb[87].mxu0  ;;  %v3590_v12 = vadd.f32 %v3585_v5, %v3542_v11 }
0x310f   :  { %v5919_v4 = vmul.f32 -1.442695, %v3590_v12 }
0x3111   :  { %7339 = vpow2.f32 %v5919_v4 }
0x311b   :  { %v7340_v25 = vpop.eup %7339 }
0x311c   :  { %v3594_v27 = vadd.f32 1.0, %v7340_v25 }
0x311e   :  { %7341 = vrcp.f32 %v3594_v27 }
0x3128   :  { %v7342_v13 = vpop.eup %7341 }
0x3129   :  { %v3608_v39 = vsub.f32 1.0, %v7342_v13  ;;  %v3614_v44 = vmul.f32 %v7342_v13, %v8151_v1 }
0x317f   :  { %v3599_v30 = vpop.permute.xlu1 %3598 }
0x3180   :  { %v3601_v31 = vmul.f32 %v7342_v13, %v3599_v30 }
0x3182   :  { %3603 = vrot.lane.b32.xlu0 %v3601_v31, %s7442_s24  ;;  %v730_v31 = vrot.slane %v8130_v62, %v7788_v43 }
0x31f4   :  { %v3604_v32 = vpop.permute.xlu0 %3603 }
0x31f5   :  { %v3606_v33 = vadd.f32 %v3604_v32, %v3542_v11 }
0x31f7   :  { %7343 = vtanh.f32 %v3606_v33 }
0x3201   :  { %v7344_v35 = vpop.eup %7343 }
0x3202   :  { %3610 = vrot.lane.b32.xlu1 %v7344_v35, %s7443_s28 }
0x3206   :  { %725 = vbcast.lane.b32.xlu1 %v723_v36, 256 }
0x3274   :  { %v3611_v41 = vpop.permute.xlu1 %3610 }
0x3275   :  { %v3613_v46 = vmul.f32 %v3611_v41, %v3608_v39 }
0x3277   :  { %v8173_v48 = vadd.f32 %v3614_v44, %v3613_v46 }
0x3278   :  { %v726_v0 = vpop.permute.xlu1 %725 }
0x3279   :  { %v843_v49 = vmul.f32 %v8052_v40, %v726_v0  ;;  %v3695_v50 = vpack.c.bf16 %v8173_v48, %v8173_v48 }
0x327b   :  { %v882_v53 = vadd.f32 %v8060_v6, %v843_v49  ;;  %3697 = vrot.lane.b32.xlu0 %v3695_v50, %s7443_s28 }
0x327d   :  { %915 = vst.msk [vmem:[#allocation2 + $0x24] sm:$0x3] %vm896_vm4, %v882_v53 }
0x3284   :  { %v3694_v5 = vld [vmem:[#allocation2 + $0x24] sm:$0x3] }
0x32ed   :  { %v3698_v55 = vpop.permute.xlu0 %3697 }
0x32ee   :  { %6722 = vmatmul.mubr.msk.bf16.vlgmr.msra.gmra.mrb[88].mxu0 %vm492_vm3, %v3698_v55 }
0x32ef   :  { %6737 = vmatpush3.bf16.msra.mxu0 %v8000_v17  ;;  %6740 = vmatprep.mubr.msk.bf16.mxu0 %vm7441_vm2, %v7440_v63 }
0x32f0   :  { %6738 = vmatprep.subr.bf16.mxu0 %v7440_v63 }
0x32f3   :  { %6739 = vmatpush3.bf16.msra.mxu0 %v8009_v20 }
0x32f4   :  { %6755 = vmatprep.subr.bf16.mxu0 %v7440_v63 }
0x33c1   :  { %v3736_v56 = vpop.f32.mrb[88].mxu0 }
0x33c2   :  { %v3737_v23 = vadd.f32 %v8038_v24, %v3736_v56  ;;  %v6723_v58 = vpop.f32.mrb[89].mxu0 }
0x33c3   :  { %v3739_v60 = vpop.f32.mrb[90].mxu0 }
0x33c4   :  { %3750 = vrot.lane.b32.xlu0 %v3737_v23, %s7442_s24  ;;  %v6724_v2 = vpop.f32.mrb[91].mxu0  ;;  %v3742_v22 = vadd.f32 %v3737_v23, %v3694_v5 }
0x33c6   :  { %v5923_v8 = vmul.f32 -1.442695, %v3742_v22 }
0x33c8   :  { %7345 = vpow2.f32 %v5923_v8 }
0x33d2   :  { %v7346_v10 = vpop.eup %7345 }
0x33d3   :  { %v3746_v11 = vadd.f32 1.0, %v7346_v10 }
0x33d5   :  { %7347 = vrcp.f32 %v3746_v11 }
0x33df   :  { %v7348_v12 = vpop.eup %7347 }
0x33e0   :  { %v3760_v32 = vsub.f32 1.0, %v7348_v12  ;;  %v3766_v35 = vmul.f32 %v7348_v12, %v8173_v48 }
0x3436   :  { %v3751_v4 = vpop.permute.xlu0 %3750 }
0x3437   :  { %v3753_v25 = vmul.f32 %v7348_v12, %v3751_v4 }
0x3439   :  { %3755 = vrot.lane.b32.xlu1 %v3753_v25, %s7442_s24 }
0x34ab   :  { %v3756_v27 = vpop.permute.xlu1 %3755 }
0x34ac   :  { %v3758_v13 = vadd.f32 %v3756_v27, %v3694_v5  ;;  %v737_v27 = vrot.slane %v8130_v62, %v7813_v16 }
0x34ae   :  { %7349 = vtanh.f32 %v3758_v13 }
0x34b8   :  { %v7350_v30 = vpop.eup %7349 }
0x34b9   :  { %3762 = vrot.lane.b32.xlu0 %v7350_v30, %s7443_s28 }
0x34bd   :  { %732 = vbcast.lane.b32.xlu0 %v730_v31, 256 }
0x352b   :  { %v3763_v33 = vpop.permute.xlu0 %3762 }
0x352c   :  { %v3765_v36 = vmul.f32 %v3763_v33, %v3760_v32 }
0x352e   :  { %v8195_v39 = vadd.f32 %v3766_v35, %v3765_v36 }
0x352f   :  { %v733_v41 = vpop.permute.xlu0 %732 }
0x3530   :  { %v844_v44 = vmul.f32 %v8052_v40, %v733_v41  ;;  %v3847_v46 = vpack.c.bf16 %v8195_v39, %v8195_v39 }
0x3532   :  { %v883_v0 = vadd.f32 %v8060_v6, %v844_v44  ;;  %3849 = vrot.lane.b32.xlu1 %v3847_v46, %s7443_s28 }
0x3534   :  { %916 = vst.msk [vmem:[#allocation2 + $0x26] sm:$0x3] %vm896_vm4, %v883_v0 }
0x353b   :  { %v3846_v58 = vld [vmem:[#allocation2 + $0x26] sm:$0x3] }
0x35a4   :  { %v3850_v49 = vpop.permute.xlu1 %3849 }
0x35a5   :  { %6741 = vmatmul.mubr.msk.bf16.vlgmr.msra.gmra.mrb[92].mxu0 %vm492_vm3, %v3850_v49 }
0x35a6   :  { %6756 = vmatpush3.bf16.msra.mxu0 %v8000_v17  ;;  %6759 = vmatprep.mubr.msk.bf16.mxu0 %vm7441_vm2, %v7440_v63 }
0x35a7   :  { %6757 = vmatprep.subr.bf16.mxu0 %v7440_v63 }
0x35aa   :  { %6758 = vmatpush3.bf16.msra.mxu0 %v8009_v20 }
0x35ab   :  { %6774 = vmatprep.subr.bf16.mxu0 %v7440_v63 }
0x3678   :  { %v3888_v50 = vpop.f32.mrb[92].mxu0 }
0x3679   :  { %v3889_v53 = vadd.f32 %v8038_v24, %v3888_v50  ;;  %v6742_v55 = vpop.f32.mrb[93].mxu0 }
0x367a   :  { %v3891_v56 = vpop.f32.mrb[94].mxu0 }
0x367b   :  { %3902 = vrot.lane.b32.xlu1 %v3889_v53, %s7442_s24  ;;  %v6743_v23 = vpop.f32.mrb[95].mxu0  ;;  %v3894_v60 = vadd.f32 %v3889_v53, %v3846_v58 }
0x367d   :  { %v5927_v2 = vmul.f32 -1.442695, %v3894_v60 }
0x367f   :  { %7351 = vpow2.f32 %v5927_v2 }
0x3689   :  { %v7352_v5 = vpop.eup %7351 }
0x368a   :  { %v3898_v22 = vadd.f32 1.0, %v7352_v5 }
0x368c   :  { %7353 = vrcp.f32 %v3898_v22 }
0x3696   :  { %v7354_v8 = vpop.eup %7353 }
0x3697   :  { %v3912_v13 = vsub.f32 1.0, %v7354_v8  ;;  %v3918_v31 = vmul.f32 %v7354_v8, %v8195_v39 }
0x36ed   :  { %v3903_v10 = vpop.permute.xlu1 %3902 }
0x36ee   :  { %v3905_v11 = vmul.f32 %v7354_v8, %v3903_v10 }
0x36f0   :  { %3907 = vrot.lane.b32.xlu0 %v3905_v11, %s7442_s24 }
0x3762   :  { %v3908_v12 = vpop.permute.xlu0 %3907 }
0x3763   :  { %v3910_v4 = vadd.f32 %v3908_v12, %v3846_v58 }
0x3765   :  { %7355 = vtanh.f32 %v3910_v4  ;;  %v744_v4 = vrot.slane %v8130_v62, %v7838_v54 }
0x376f   :  { %v7356_v25 = vpop.eup %7355 }
0x3770   :  { %3914 = vrot.lane.b32.xlu1 %v7356_v25, %s7443_s28 }
0x3774   :  { %739 = vbcast.lane.b32.xlu1 %v737_v27, 256 }
0x37e2   :  { %v3915_v30 = vpop.permute.xlu1 %3914 }
0x37e3   :  { %v3917_v32 = vmul.f32 %v3915_v30, %v3912_v13 }
0x37e5   :  { %v8217_v33 = vadd.f32 %v3918_v31, %v3917_v32 }
0x37e6   :  { %v740_v35 = vpop.permute.xlu1 %739 }
0x37e7   :  { %v3999_v36 = vpack.c.bf16 %v8217_v33, %v8217_v33  ;;  %v845_v41 = vmul.f32 %v8052_v40, %v740_v35 }
0x37e9   :  { %v884_v44 = vadd.f32 %v8060_v6, %v845_v41  ;;  %4001 = vrot.lane.b32.xlu0 %v3999_v36, %s7443_s28 }
0x37eb   :  { %917 = vst.msk [vmem:[#allocation2 + $0x28] sm:$0x3] %vm896_vm4, %v884_v44 }
0x37f2   :  { %v3998_v56 = vld [vmem:[#allocation2 + $0x28] sm:$0x3] }
0x385b   :  { %v4002_v46 = vpop.permute.xlu0 %4001 }
0x385c   :  { %6760 = vmatmul.mubr.msk.bf16.vlgmr.msra.gmra.mrb[96].mxu0 %vm492_vm3, %v4002_v46 }
0x385d   :  { %6775 = vmatpush3.bf16.msra.mxu0 %v8000_v17  ;;  %6778 = vmatprep.mubr.msk.bf16.mxu0 %vm7441_vm2, %v7440_v63 }
0x385e   :  { %6776 = vmatprep.subr.bf16.mxu0 %v7440_v63 }
0x3861   :  { %6777 = vmatpush3.bf16.msra.mxu0 %v8009_v20 }
0x3862   :  { %6793 = vmatprep.subr.bf16.mxu0 %v7440_v63 }
0x392f   :  { %v4040_v0 = vpop.f32.mrb[96].mxu0 }
0x3930   :  { %v4041_v49 = vadd.f32 %v8038_v24, %v4040_v0  ;;  %v6761_v50 = vpop.f32.mrb[97].mxu0 }
0x3931   :  { %v4043_v53 = vpop.f32.mrb[98].mxu0 }
0x3932   :  { %4054 = vrot.lane.b32.xlu0 %v4041_v49, %s7442_s24  ;;  %v6762_v55 = vpop.f32.mrb[99].mxu0  ;;  %v4046_v23 = vadd.f32 %v4041_v49, %v3998_v56 }
0x3934   :  { %v5931_v58 = vmul.f32 -1.442695, %v4046_v23 }
0x3936   :  { %7357 = vpow2.f32 %v5931_v58 }
0x3940   :  { %v7358_v60 = vpop.eup %7357 }
0x3941   :  { %v4050_v2 = vadd.f32 1.0, %v7358_v60 }
0x3943   :  { %7359 = vrcp.f32 %v4050_v2 }
0x394d   :  { %v7360_v5 = vpop.eup %7359 }
0x394e   :  { %v4064_v25 = vsub.f32 1.0, %v7360_v5  ;;  %v4070_v13 = vmul.f32 %v7360_v5, %v8217_v33 }
0x39a4   :  { %v4055_v22 = vpop.permute.xlu0 %4054 }
0x39a5   :  { %v4057_v8 = vmul.f32 %v7360_v5, %v4055_v22 }
0x39a7   :  { %4059 = vrot.lane.b32.xlu1 %v4057_v8, %s7442_s24 }
0x3a19   :  { %v4060_v10 = vpop.permute.xlu1 %4059 }
0x3a1a   :  { %v4062_v11 = vadd.f32 %v4060_v10, %v3998_v56 }
0x3a1c   :  { %7361 = vtanh.f32 %v4062_v11 }
0x3a26   :  { %v7362_v12 = vpop.eup %7361 }
0x3a27   :  { %4066 = vrot.lane.b32.xlu0 %v7362_v12, %s7443_s28  ;;  %v751_v12 = vrot.slane %v8130_v62, %v7863_v34 }
0x3a2b   :  { %746 = vbcast.lane.b32.xlu0 %v744_v4, 256 }
0x3a99   :  { %v4067_v27 = vpop.permute.xlu0 %4066 }
0x3a9a   :  { %v4069_v30 = vmul.f32 %v4067_v27, %v4064_v25 }
0x3a9c   :  { %v8239_v31 = vadd.f32 %v4070_v13, %v4069_v30 }
0x3a9d   :  { %v747_v32 = vpop.permute.xlu0 %746 }
0x3a9e   :  { %v4151_v35 = vpack.c.bf16 %v8239_v31, %v8239_v31  ;;  %v846_v36 = vmul.f32 %v8052_v40, %v747_v32 }
0x3aa0   :  { %v885_v41 = vadd.f32 %v8060_v6, %v846_v36  ;;  %4153 = vrot.lane.b32.xlu1 %v4151_v35, %s7443_s28 }
0x3aa2   :  { %918 = vst.msk [vmem:[#allocation2 + $0x2a] sm:$0x3] %vm896_vm4, %v885_v41 }
0x3aa9   :  { %v4150_v55 = vld [vmem:[#allocation2 + $0x2a] sm:$0x3] }
0x3b12   :  { %v4154_v44 = vpop.permute.xlu1 %4153 }
0x3b13   :  { %6779 = vmatmul.mubr.msk.bf16.vlgmr.msra.gmra.mrb[100].mxu0 %vm492_vm3, %v4154_v44 }
0x3b14   :  { %6794 = vmatpush3.bf16.msra.mxu0 %v8000_v17  ;;  %6797 = vmatprep.mubr.msk.bf16.mxu0 %vm7441_vm2, %v7440_v63 }
0x3b15   :  { %6795 = vmatprep.subr.bf16.mxu0 %v7440_v63 }
0x3b18   :  { %6796 = vmatpush3.bf16.msra.mxu0 %v8009_v20 }
0x3b19   :  { %6812 = vmatprep.subr.bf16.mxu0 %v7440_v63 }
0x3be6   :  { %v4192_v46 = vpop.f32.mrb[100].mxu0 }
0x3be7   :  { %v4193_v0 = vadd.f32 %v8038_v24, %v4192_v46  ;;  %v6780_v49 = vpop.f32.mrb[101].mxu0 }
0x3be8   :  { %v4195_v50 = vpop.f32.mrb[102].mxu0 }
0x3be9   :  { %4206 = vrot.lane.b32.xlu1 %v4193_v0, %s7442_s24  ;;  %v6781_v53 = vpop.f32.mrb[103].mxu0  ;;  %v4198_v56 = vadd.f32 %v4193_v0, %v4150_v55 }
0x3beb   :  { %v5935_v23 = vmul.f32 -1.442695, %v4198_v56 }
0x3bed   :  { %7363 = vpow2.f32 %v5935_v23 }
0x3bf7   :  { %v7364_v58 = vpop.eup %7363 }
0x3bf8   :  { %v4202_v60 = vadd.f32 1.0, %v7364_v58 }
0x3bfa   :  { %7365 = vrcp.f32 %v4202_v60 }
0x3c04   :  { %v7366_v2 = vpop.eup %7365 }
0x3c05   :  { %v4216_v4 = vsub.f32 1.0, %v7366_v2  ;;  %v4222_v27 = vmul.f32 %v7366_v2, %v8239_v31 }
0x3c5b   :  { %v4207_v5 = vpop.permute.xlu1 %4206 }
0x3c5c   :  { %v4209_v22 = vmul.f32 %v7366_v2, %v4207_v5 }
0x3c5e   :  { %4211 = vrot.lane.b32.xlu0 %v4209_v22, %s7442_s24 }
0x3cd0   :  { %v4212_v8 = vpop.permute.xlu0 %4211 }
0x3cd1   :  { %v4214_v10 = vadd.f32 %v4212_v8, %v4150_v55 }
0x3cd3   :  { %7367 = vtanh.f32 %v4214_v10 }
0x3cdd   :  { %v7368_v11 = vpop.eup %7367 }
0x3cde   :  { %4218 = vrot.lane.b32.xlu1 %v7368_v11, %s7443_s28 }
0x3ce2   :  { %753 = vbcast.lane.b32.xlu1 %v751_v12, 256  ;;  %v758_v12 = vrot.slane %v8130_v62, %v7888_v9 }
0x3d50   :  { %v4219_v25 = vpop.permute.xlu1 %4218 }
0x3d51   :  { %v4221_v13 = vmul.f32 %v4219_v25, %v4216_v4 }
0x3d53   :  { %v8261_v30 = vadd.f32 %v4222_v27, %v4221_v13 }
0x3d54   :  { %v754_v32 = vpop.permute.xlu1 %753 }
0x3d55   :  { %v4303_v35 = vpack.c.bf16 %v8261_v30, %v8261_v30  ;;  %v847_v36 = vmul.f32 %v8052_v40, %v754_v32 }
0x3d57   :  { %v886_v41 = vadd.f32 %v8060_v6, %v847_v36  ;;  %4305 = vrot.lane.b32.xlu0 %v4303_v35, %s7443_s28 }
0x3d59   :  { %919 = vst.msk [vmem:[#allocation2 + $0x2c] sm:$0x3] %vm896_vm4, %v886_v41 }
0x3d60   :  { %v4302_v55 = vld [vmem:[#allocation2 + $0x2c] sm:$0x3] }
0x3dc9   :  { %v4306_v44 = vpop.permute.xlu0 %4305 }
0x3dca   :  { %6798 = vmatmul.mubr.msk.bf16.vlgmr.msra.gmra.mrb[104].mxu0 %vm492_vm3, %v4306_v44 }
0x3dcb   :  { %6813 = vmatpush3.bf16.msra.mxu0 %v8000_v17  ;;  %6816 = vmatprep.mubr.msk.bf16.mxu0 %vm7441_vm2, %v7440_v63 }
0x3dcc   :  { %6814 = vmatprep.subr.bf16.mxu0 %v7440_v63 }
0x3dcf   :  { %6815 = vmatpush3.bf16.msra.mxu0 %v8009_v20 }
0x3dd0   :  { %6831 = vmatprep.subr.bf16.mxu0 %v7440_v63 }
0x3e9d   :  { %v4344_v46 = vpop.f32.mrb[104].mxu0 }
0x3e9e   :  { %v4345_v0 = vadd.f32 %v8038_v24, %v4344_v46  ;;  %v6799_v49 = vpop.f32.mrb[105].mxu0 }
0x3e9f   :  { %v4347_v50 = vpop.f32.mrb[106].mxu0 }
0x3ea0   :  { %4358 = vrot.lane.b32.xlu0 %v4345_v0, %s7442_s24  ;;  %v6800_v53 = vpop.f32.mrb[107].mxu0  ;;  %v4350_v56 = vadd.f32 %v4345_v0, %v4302_v55 }
0x3ea2   :  { %v5939_v23 = vmul.f32 -1.442695, %v4350_v56 }
0x3ea4   :  { %7369 = vpow2.f32 %v5939_v23 }
0x3eae   :  { %v7370_v58 = vpop.eup %7369 }
0x3eaf   :  { %v4354_v60 = vadd.f32 1.0, %v7370_v58 }
0x3eb1   :  { %7371 = vrcp.f32 %v4354_v60 }
0x3ebb   :  { %v7372_v2 = vpop.eup %7371 }
0x3ebc   :  { %v4368_v4 = vsub.f32 1.0, %v7372_v2  ;;  %v4374_v27 = vmul.f32 %v7372_v2, %v8261_v30 }
0x3f12   :  { %v4359_v5 = vpop.permute.xlu0 %4358 }
0x3f13   :  { %v4361_v22 = vmul.f32 %v7372_v2, %v4359_v5 }
0x3f15   :  { %4363 = vrot.lane.b32.xlu1 %v4361_v22, %s7442_s24 }
0x3f87   :  { %v4364_v8 = vpop.permute.xlu1 %4363 }
0x3f88   :  { %v4366_v10 = vadd.f32 %v4364_v8, %v4302_v55  ;;  %v471_v8 = vld [vmem:[%s8949_s5 + $0x18] sm:$0xff] }
0x3f8a   :  { %7373 = vtanh.f32 %v4366_v10 }
0x3f94   :  { %v7374_v11 = vpop.eup %7373 }
0x3f95   :  { %4370 = vrot.lane.b32.xlu0 %v7374_v11, %s7443_s28 }
0x3f99   :  { %760 = vbcast.lane.b32.xlu0 %v758_v12, 256 }
0x4007   :  { %v4371_v25 = vpop.permute.xlu0 %4370 }
0x4008   :  { %v4373_v13 = vmul.f32 %v4371_v25, %v4368_v4 }
0x400a   :  { %v8283_v32 = vadd.f32 %v4374_v27, %v4373_v13 }
0x400b   :  { %v761_v35 = vpop.permute.xlu0 %760 }
0x400c   :  { %v4455_v36 = vpack.c.bf16 %v8283_v32, %v8283_v32  ;;  %v848_v41 = vmul.f32 %v8052_v40, %v761_v35 }
0x400e   :  { %v887_v44 = vadd.f32 %v8060_v6, %v848_v41  ;;  %4457 = vrot.lane.b32.xlu1 %v4455_v36, %s7443_s28 }
0x4010   :  { %920 = vst.msk [vmem:[#allocation2 + $0x2e] sm:$0x3] %vm896_vm4, %v887_v44 }
0x4017   :  { %v4454_v55 = vld [vmem:[#allocation2 + $0x2e] sm:$0x3] }
0x4080   :  { %v4458_v62 = vpop.permute.xlu1 %4457 }
0x4081   :  { %6817 = vmatmul.mubr.msk.bf16.vlgmr.msra.gmra.mrb[108].mxu0 %vm492_vm3, %v4458_v62  ;;  %v8320_v62 = vld [vmem:[%s8952_s8] sm:$0xff]  }
0x4082   :  { %6832 = vmatpush3.bf16.msra.mxu0 %v8000_v17  ;;  %6835 = vmatprep.mubr.msk.bf16.mxu0 %vm7441_vm2, %v7440_v63 }
0x4083   :  { %6833 = vmatprep.subr.bf16.mxu0 %v7440_v63 }
0x4086   :  { %6834 = vmatpush3.bf16.msra.mxu0 %v8009_v20 }
0x4087   :  { %6850 = vmatprep.subr.bf16.mxu0 %v7440_v63 }
0x4154   :  { %v4496_v46 = vpop.f32.mrb[108].mxu0 }
0x4155   :  { %v4497_v0 = vadd.f32 %v8038_v24, %v4496_v46  ;;  %v6818_v49 = vpop.f32.mrb[109].mxu0 }
0x4156   :  { %v4499_v50 = vpop.f32.mrb[110].mxu0 }
0x4157   :  { %4510 = vrot.lane.b32.xlu1 %v4497_v0, %s7442_s24  ;;  %v6819_v53 = vpop.f32.mrb[111].mxu0  ;;  %v4502_v56 = vadd.f32 %v4497_v0, %v4454_v55  ;;  %v8339_v50 = vld [vmem:[%s8953_s9] ss:$0 sm:$0xff] }
0x4159   :  { %v5943_v17 = vmul.f32 -1.442695, %v4502_v56 }
0x415b   :  { %7375 = vpow2.f32 %v5943_v17 }
0x4165   :  { %v7376_v23 = vpop.eup %7375 }
0x4166   :  { %v4506_v58 = vadd.f32 1.0, %v7376_v23 }
0x4168   :  { %7377 = vrcp.f32 %v4506_v58 }
0x4172   :  { %v7378_v60 = vpop.eup %7377 }
0x4173   :  { %v4520_v10 = vsub.f32 1.0, %v7378_v60  ;;  %v4526_v12 = vmul.f32 %v7378_v60, %v8283_v32 }
0x41c9   :  { %v4511_v2 = vpop.permute.xlu1 %4510 }
0x41ca   :  { %v4513_v20 = vmul.f32 %v7378_v60, %v4511_v2 }
0x41cc   :  { %4515 = vrot.lane.b32.xlu0 %v4513_v20, %s7442_s24 }
0x423e   :  { %v4516_v5 = vpop.permute.xlu0 %4515 }
0x423f   :  { %v4518_v22 = vadd.f32 %v4516_v5, %v4454_v55 }
0x4241   :  { %7379 = vtanh.f32 %v4518_v22 }
0x424b   :  { %v7380_v24 = vpop.eup %7379 }
0x424c   :  { %4522 = vrot.lane.b32.xlu1 %v7380_v24, %s7443_s28 }
0x4250   :  { %489 = vperm.xlu1 %7234, %v471_v8  }
0x42be   :  { %v4523_v11 = vpop.permute.xlu1 %4522 }
0x42bf   :  { %v4525_v4 = vmul.f32 %v4523_v11, %v4520_v10 }
0x42c1   :  { %v8306_v25 = vadd.f32 %v4526_v12, %v4525_v4 }
0x42c3   :  { %v4607_v27 = vpack.c.bf16 %v8306_v25, %v8306_v25 }
0x42c5   :  { %4609 = vrot.lane.b32.xlu0 %v4607_v27, %s7443_s28 }
0x42cf   :  { %v490_v13 = vpop.permute.xlu1 %489 }
0x42d0   :  { %v587_v35 = vadd.f32 %v7720_v21, %v490_v13 }
0x42d2   :  { %v8312_v36 = vmax.f32 %v587_v35, 0.0 }
0x42d4   :  { %v765_v41 = vrot.slane %v8312_v36, %v7714_v18  ;;  %v8329_v18 = vld [vmem:[%s8952_s8 + $0x8] sm:$0xff]   ;;  %v772_v10 = vrot.slane %v8312_v36, %v7739_v38  ;;  %v8361_v38 = vld [vmem:[%s8955_s7] ss:$0 sm:$0xff] }
0x42d6   :  { %767 = vbcast.lane.b32.xlu0 %v765_v41, 256 }
0x4337   :  { %v4610_v44 = vpop.permute.xlu0 %4609 }
0x4338   :  { %6836 = vmatmul.mubr.msk.bf16.vlgmr.msra.gmra.mrb[112].mxu0 %vm492_vm3, %v4610_v44  ;;  %v8355_v44 = vld [vmem:[%s8954_s6] ss:$0 sm:$0xff] }
0x4339   :  { %6851 = vmatpush3.bf16.msra.mxu0 %v8320_v62  ;;  %6854 = vmatprep.mubr.msk.bf16.mxu0 %vm7441_vm2, %v7440_v63 }
0x433a   :  { %6852 = vmatprep.subr.bf16.mxu0 %v7440_v63 }
0x433d   :  { %6853 = vmatpush3.bf16.msra.mxu0 %v8329_v18 }
0x433e   :  { %6869 = vmatprep.subr.bf16.mxu0 %v7440_v63 }
0x4348   :  { %v768_v21 = vpop.permute.xlu0 %767 }
0x4349   :  { %v849_v46 = vmul.f32 %v8052_v40, %v768_v21 }
0x434b   :  { %v888_v0 = vadd.f32 %v8060_v6, %v849_v46 }
0x434d   :  { %921 = vst.msk [vmem:[#allocation2 + $0x30] sm:$0x3] %vm896_vm4, %v888_v0 }
0x4354   :  { %v4606_v23 = vld [vmem:[#allocation2 + $0x30] sm:$0x3] }
0x440b   :  { %v4648_v49 = vpop.f32.mrb[112].mxu0 }
0x440c   :  { %v4649_v53 = vadd.f32 %v8339_v50, %v4648_v49  ;;  %v6837_v55 = vpop.f32.mrb[113].mxu0 }
0x440d   :  { %v4651_v56 = vpop.f32.mrb[114].mxu0 }
0x440e   :  { %4662 = vrot.lane.b32.xlu1 %v4649_v53, %s7442_s24  ;;  %v6838_v17 = vpop.f32.mrb[115].mxu0  ;;  %v4654_v58 = vadd.f32 %v4649_v53, %v4606_v23 }
0x4410   :  { %v5947_v40 = vmul.f32 -1.442695, %v4654_v58 }
0x4412   :  { %7381 = vpow2.f32 %v5947_v40 }
0x441c   :  { %v7382_v6 = vpop.eup %7381 }
0x441d   :  { %v4658_v60 = vadd.f32 1.0, %v7382_v6 }
0x441f   :  { %7383 = vrcp.f32 %v4658_v60 }
0x4429   :  { %v7384_v2 = vpop.eup %7383 }
0x442a   :  { %v4672_v11 = vsub.f32 1.0, %v7384_v2  ;;  %v4678_v4 = vmul.f32 %v7384_v2, %v8306_v25 }
0x4480   :  { %v4663_v20 = vpop.permute.xlu1 %4662 }
0x4481   :  { %v4665_v5 = vmul.f32 %v7384_v2, %v4663_v20 }
0x4483   :  { %4667 = vrot.lane.b32.xlu0 %v4665_v5, %s7442_s24 }
0x44f5   :  { %v4668_v22 = vpop.permute.xlu0 %4667 }
0x44f6   :  { %v4670_v24 = vadd.f32 %v4668_v22, %v4606_v23 }
0x44f8   :  { %7385 = vtanh.f32 %v4670_v24 }
0x4502   :  { %v7386_v8 = vpop.eup %7385 }
0x4503   :  { %4674 = vrot.lane.b32.xlu1 %v7386_v8, %s7443_s28 }
0x4507   :  { %774 = vbcast.lane.b32.xlu1 %v772_v10, 256  ;;  %v779_v10 = vrot.slane %v8312_v36, %v7763_v3 }
0x4575   :  { %v4675_v12 = vpop.permute.xlu1 %4674 }
0x4576   :  { %v4677_v27 = vmul.f32 %v4675_v12, %v4672_v11 }
0x4578   :  { %v8348_v13 = vadd.f32 %v4678_v4, %v4677_v27 }
0x4579   :  { %v775_v35 = vpop.permute.xlu1 %774 }
0x457a   :  { %v4759_v41 = vpack.c.bf16 %v8348_v13, %v8348_v13  ;;  %v850_v21 = vmul.f32 %v8355_v44, %v775_v35 }
0x457c   :  { %v889_v46 = vadd.f32 %v8361_v38, %v850_v21  ;;  %4761 = vrot.lane.b32.xlu0 %v4759_v41, %s7443_s28 }
0x457e   :  { %922 = vst.msk [vmem:[#allocation2 + $0x32] sm:$0x3] %vm896_vm4, %v889_v46 }
0x4585   :  { %v4758_v23 = vld [vmem:[#allocation2 + $0x32] sm:$0x3] }
0x45ee   :  { %v4762_v0 = vpop.permute.xlu0 %4761 }
0x45ef   :  { %6855 = vmatmul.mubr.msk.bf16.vlgmr.msra.gmra.mrb[116].mxu0 %vm492_vm3, %v4762_v0 }
0x45f0   :  { %6870 = vmatpush3.bf16.msra.mxu0 %v8320_v62  ;;  %6873 = vmatprep.mubr.msk.bf16.mxu0 %vm7441_vm2, %v7440_v63 }
0x45f1   :  { %6871 = vmatprep.subr.bf16.mxu0 %v7440_v63 }
0x45f4   :  { %6872 = vmatpush3.bf16.msra.mxu0 %v8329_v18 }
0x45f5   :  { %6888 = vmatprep.subr.bf16.mxu0 %v7440_v63 }
0x46c2   :  { %v4800_v49 = vpop.f32.mrb[116].mxu0 }
0x46c3   :  { %v4801_v53 = vadd.f32 %v8339_v50, %v4800_v49  ;;  %v6856_v55 = vpop.f32.mrb[117].mxu0 }
0x46c4   :  { %v4803_v56 = vpop.f32.mrb[118].mxu0 }
0x46c5   :  { %4814 = vrot.lane.b32.xlu0 %v4801_v53, %s7442_s24  ;;  %v6857_v17 = vpop.f32.mrb[119].mxu0  ;;  %v4806_v58 = vadd.f32 %v4801_v53, %v4758_v23 }
0x46c7   :  { %v5951_v40 = vmul.f32 -1.442695, %v4806_v58 }
0x46c9   :  { %7387 = vpow2.f32 %v5951_v40 }
0x46d3   :  { %v7388_v6 = vpop.eup %7387 }
0x46d4   :  { %v4810_v60 = vadd.f32 1.0, %v7388_v6 }
0x46d6   :  { %7389 = vrcp.f32 %v4810_v60 }
0x46e0   :  { %v7390_v2 = vpop.eup %7389 }
0x46e1   :  { %v4824_v11 = vsub.f32 1.0, %v7390_v2  ;;  %v4830_v4 = vmul.f32 %v7390_v2, %v8348_v13 }
0x4737   :  { %v4815_v20 = vpop.permute.xlu0 %4814 }
0x4738   :  { %v4817_v5 = vmul.f32 %v7390_v2, %v4815_v20 }
0x473a   :  { %4819 = vrot.lane.b32.xlu1 %v4817_v5, %s7442_s24 }
0x47ac   :  { %v4820_v22 = vpop.permute.xlu1 %4819 }
0x47ad   :  { %v4822_v24 = vadd.f32 %v4820_v22, %v4758_v23 }
0x47af   :  { %7391 = vtanh.f32 %v4822_v24 }
0x47b9   :  { %v7392_v8 = vpop.eup %7391 }
0x47ba   :  { %4826 = vrot.lane.b32.xlu0 %v7392_v8, %s7443_s28 }
0x47be   :  { %781 = vbcast.lane.b32.xlu0 %v779_v10, 256  ;;  %v786_v10 = vrot.slane %v8312_v36, %v7788_v43 }
0x482c   :  { %v4827_v12 = vpop.permute.xlu0 %4826 }
0x482d   :  { %v4829_v27 = vmul.f32 %v4827_v12, %v4824_v11 }
0x482f   :  { %v8380_v35 = vadd.f32 %v4830_v4, %v4829_v27 }
0x4830   :  { %v782_v41 = vpop.permute.xlu0 %781 }
0x4831   :  { %v4911_v21 = vpack.c.bf16 %v8380_v35, %v8380_v35  ;;  %v851_v46 = vmul.f32 %v8355_v44, %v782_v41 }
0x4833   :  { %v890_v0 = vadd.f32 %v8361_v38, %v851_v46  ;;  %4913 = vrot.lane.b32.xlu1 %v4911_v21, %s7443_s28 }
0x4835   :  { %923 = vst.msk [vmem:[#allocation2 + $0x34] sm:$0x3] %vm896_vm4, %v890_v0 }
0x483c   :  { %v4910_v23 = vld [vmem:[#allocation2 + $0x34] sm:$0x3] }
0x48a5   :  { %v4914_v3 = vpop.permute.xlu1 %4913 }
0x48a6   :  { %6874 = vmatmul.mubr.msk.bf16.vlgmr.msra.gmra.mrb[120].mxu0 %vm492_vm3, %v4914_v3 }
0x48a7   :  { %6889 = vmatpush3.bf16.msra.mxu0 %v8320_v62  ;;  %6892 = vmatprep.mubr.msk.bf16.mxu0 %vm7441_vm2, %v7440_v63 }
0x48a8   :  { %6890 = vmatprep.subr.bf16.mxu0 %v7440_v63 }
0x48ab   :  { %6891 = vmatpush3.bf16.msra.mxu0 %v8329_v18 }
0x48ac   :  { %6907 = vmatprep.subr.bf16.mxu0 %v7440_v63 }
0x4979   :  { %v4952_v49 = vpop.f32.mrb[120].mxu0 }
0x497a   :  { %v4953_v53 = vadd.f32 %v8339_v50, %v4952_v49  ;;  %v6875_v55 = vpop.f32.mrb[121].mxu0 }
0x497b   :  { %v4955_v56 = vpop.f32.mrb[122].mxu0 }
0x497c   :  { %4966 = vrot.lane.b32.xlu1 %v4953_v53, %s7442_s24  ;;  %v6876_v17 = vpop.f32.mrb[123].mxu0  ;;  %v4958_v58 = vadd.f32 %v4953_v53, %v4910_v23 }
0x497e   :  { %v5955_v40 = vmul.f32 -1.442695, %v4958_v58 }
0x4980   :  { %7393 = vpow2.f32 %v5955_v40 }
0x498a   :  { %v7394_v6 = vpop.eup %7393 }
0x498b   :  { %v4962_v60 = vadd.f32 1.0, %v7394_v6 }
0x498d   :  { %7395 = vrcp.f32 %v4962_v60 }
0x4997   :  { %v7396_v2 = vpop.eup %7395 }
0x4998   :  { %v4976_v11 = vsub.f32 1.0, %v7396_v2  ;;  %v4982_v4 = vmul.f32 %v7396_v2, %v8380_v35 }
0x49ee   :  { %v4967_v20 = vpop.permute.xlu1 %4966 }
0x49ef   :  { %v4969_v5 = vmul.f32 %v7396_v2, %v4967_v20 }
0x49f1   :  { %4971 = vrot.lane.b32.xlu0 %v4969_v5, %s7442_s24 }
0x4a63   :  { %v4972_v22 = vpop.permute.xlu0 %4971 }
0x4a64   :  { %v4974_v24 = vadd.f32 %v4972_v22, %v4910_v23 }
0x4a66   :  { %7397 = vtanh.f32 %v4974_v24 }
0x4a70   :  { %v7398_v8 = vpop.eup %7397 }
0x4a71   :  { %4978 = vrot.lane.b32.xlu1 %v7398_v8, %s7443_s28 }
0x4a75   :  { %788 = vbcast.lane.b32.xlu1 %v786_v10, 256  ;;  %v793_v10 = vrot.slane %v8312_v36, %v7813_v16 }
0x4ae3   :  { %v4979_v12 = vpop.permute.xlu1 %4978 }
0x4ae4   :  { %v4981_v27 = vmul.f32 %v4979_v12, %v4976_v11 }
0x4ae6   :  { %v8402_v41 = vadd.f32 %v4982_v4, %v4981_v27 }
0x4ae7   :  { %v789_v21 = vpop.permute.xlu1 %788 }
0x4ae8   :  { %v5063_v46 = vpack.c.bf16 %v8402_v41, %v8402_v41  ;;  %v852_v0 = vmul.f32 %v8355_v44, %v789_v21 }
0x4aea   :  { %v891_v3 = vadd.f32 %v8361_v38, %v852_v0  ;;  %5065 = vrot.lane.b32.xlu0 %v5063_v46, %s7443_s28 }
0x4aec   :  { %924 = vst.msk [vmem:[#allocation2 + $0x36] sm:$0x3] %vm896_vm4, %v891_v3 }
0x4af3   :  { %v5062_v23 = vld [vmem:[#allocation2 + $0x36] sm:$0x3] }
0x4b5c   :  { %v5066_v43 = vpop.permute.xlu0 %5065 }
0x4b5d   :  { %6893 = vmatmul.mubr.msk.bf16.vlgmr.msra.gmra.mrb[124].mxu0 %vm492_vm3, %v5066_v43 }
0x4b5e   :  { %6908 = vmatpush3.bf16.msra.mxu0 %v8320_v62  ;;  %6911 = vmatprep.mubr.msk.bf16.mxu0 %vm7441_vm2, %v7440_v63 }
0x4b5f   :  { %6909 = vmatprep.subr.bf16.mxu0 %v7440_v63 }
0x4b62   :  { %6910 = vmatpush3.bf16.msra.mxu0 %v8329_v18 }
0x4b63   :  { %6926 = vmatprep.subr.bf16.mxu0 %v7440_v63 }
0x4c30   :  { %v5104_v49 = vpop.f32.mrb[124].mxu0 }
0x4c31   :  { %v5105_v53 = vadd.f32 %v8339_v50, %v5104_v49  ;;  %v6894_v55 = vpop.f32.mrb[125].mxu0 }
0x4c32   :  { %v5107_v56 = vpop.f32.mrb[126].mxu0 }
0x4c33   :  { %5118 = vrot.lane.b32.xlu0 %v5105_v53, %s7442_s24  ;;  %v6895_v17 = vpop.f32.mrb[127].mxu0  ;;  %v5110_v58 = vadd.f32 %v5105_v53, %v5062_v23 }
0x4c35   :  { %v5959_v40 = vmul.f32 -1.442695, %v5110_v58 }
0x4c37   :  { %7399 = vpow2.f32 %v5959_v40 }
0x4c41   :  { %v7400_v6 = vpop.eup %7399 }
0x4c42   :  { %v5114_v60 = vadd.f32 1.0, %v7400_v6 }
0x4c44   :  { %7401 = vrcp.f32 %v5114_v60 }
0x4c4e   :  { %v7402_v2 = vpop.eup %7401 }
0x4c4f   :  { %v5128_v11 = vsub.f32 1.0, %v7402_v2  ;;  %v5134_v4 = vmul.f32 %v7402_v2, %v8402_v41 }
0x4ca5   :  { %v5119_v20 = vpop.permute.xlu0 %5118 }
0x4ca6   :  { %v5121_v5 = vmul.f32 %v7402_v2, %v5119_v20 }
0x4ca8   :  { %5123 = vrot.lane.b32.xlu1 %v5121_v5, %s7442_s24 }
0x4d1a   :  { %v5124_v22 = vpop.permute.xlu1 %5123 }
0x4d1b   :  { %v5126_v24 = vadd.f32 %v5124_v22, %v5062_v23 }
0x4d1d   :  { %7403 = vtanh.f32 %v5126_v24 }
0x4d27   :  { %v7404_v8 = vpop.eup %7403 }
0x4d28   :  { %5130 = vrot.lane.b32.xlu0 %v7404_v8, %s7443_s28 }
0x4d2c   :  { %795 = vbcast.lane.b32.xlu0 %v793_v10, 256  ;;  %v800_v10 = vrot.slane %v8312_v36, %v7838_v54 }
0x4d9a   :  { %v5131_v12 = vpop.permute.xlu0 %5130 }
0x4d9b   :  { %v5133_v27 = vmul.f32 %v5131_v12, %v5128_v11 }
0x4d9d   :  { %v8424_v21 = vadd.f32 %v5134_v4, %v5133_v27 }
0x4d9e   :  { %v796_v46 = vpop.permute.xlu0 %795 }
0x4d9f   :  { %v5215_v0 = vpack.c.bf16 %v8424_v21, %v8424_v21  ;;  %v853_v3 = vmul.f32 %v8355_v44, %v796_v46 }
0x4da1   :  { %v892_v43 = vadd.f32 %v8361_v38, %v853_v3  ;;  %5217 = vrot.lane.b32.xlu1 %v5215_v0, %s7443_s28 }
0x4da3   :  { %925 = vst.msk [vmem:[#allocation2 + $0x38] sm:$0x3] %vm896_vm4, %v892_v43 }
0x4daa   :  { %v5214_v23 = vld [vmem:[#allocation2 + $0x38] sm:$0x3] }
0x4e13   :  { %v5218_v16 = vpop.permute.xlu1 %5217 }
0x4e14   :  { %6912 = vmatmul.mubr.msk.bf16.vlgmr.msra.gmra.mrb[128].mxu0 %vm492_vm3, %v5218_v16 }
0x4e15   :  { %6927 = vmatpush3.bf16.msra.mxu0 %v8320_v62  ;;  %6930 = vmatprep.mubr.msk.bf16.mxu0 %vm7441_vm2, %v7440_v63 }
0x4e16   :  { %6928 = vmatprep.subr.bf16.mxu0 %v7440_v63 }
0x4e19   :  { %6929 = vmatpush3.bf16.msra.mxu0 %v8329_v18 }
0x4e1a   :  { %6945 = vmatprep.subr.bf16.mxu0 %v7440_v63 }
0x4ee7   :  { %v5256_v49 = vpop.f32.mrb[128].mxu0 }
0x4ee8   :  { %v5257_v53 = vadd.f32 %v8339_v50, %v5256_v49  ;;  %v6913_v55 = vpop.f32.mrb[129].mxu0 }
0x4ee9   :  { %v5259_v56 = vpop.f32.mrb[130].mxu0 }
0x4eea   :  { %5270 = vrot.lane.b32.xlu1 %v5257_v53, %s7442_s24  ;;  %v6914_v17 = vpop.f32.mrb[131].mxu0  ;;  %v5262_v58 = vadd.f32 %v5257_v53, %v5214_v23 }
0x4eec   :  { %v5963_v40 = vmul.f32 -1.442695, %v5262_v58 }
0x4eee   :  { %7405 = vpow2.f32 %v5963_v40 }
0x4ef8   :  { %v7406_v6 = vpop.eup %7405 }
0x4ef9   :  { %v5266_v60 = vadd.f32 1.0, %v7406_v6 }
0x4efb   :  { %7407 = vrcp.f32 %v5266_v60 }
0x4f05   :  { %v7408_v2 = vpop.eup %7407 }
0x4f06   :  { %v5280_v11 = vsub.f32 1.0, %v7408_v2  ;;  %v5286_v4 = vmul.f32 %v7408_v2, %v8424_v21 }
0x4f5c   :  { %v5271_v20 = vpop.permute.xlu1 %5270 }
0x4f5d   :  { %v5273_v5 = vmul.f32 %v7408_v2, %v5271_v20 }
0x4f5f   :  { %5275 = vrot.lane.b32.xlu0 %v5273_v5, %s7442_s24 }
0x4fd1   :  { %v5276_v22 = vpop.permute.xlu0 %5275 }
0x4fd2   :  { %v5278_v24 = vadd.f32 %v5276_v22, %v5214_v23 }
0x4fd4   :  { %7409 = vtanh.f32 %v5278_v24 }
0x4fde   :  { %v7410_v8 = vpop.eup %7409 }
0x4fdf   :  { %5282 = vrot.lane.b32.xlu1 %v7410_v8, %s7443_s28 }
0x4fe3   :  { %802 = vbcast.lane.b32.xlu1 %v800_v10, 256  ;;  %v807_v10 = vrot.slane %v8312_v36, %v7863_v34 }
0x5051   :  { %v5283_v12 = vpop.permute.xlu1 %5282 }
0x5052   :  { %v5285_v27 = vmul.f32 %v5283_v12, %v5280_v11 }
0x5054   :  { %v8446_v46 = vadd.f32 %v5286_v4, %v5285_v27 }
0x5055   :  { %v803_v0 = vpop.permute.xlu1 %802 }
0x5056   :  { %v5367_v3 = vpack.c.bf16 %v8446_v46, %v8446_v46  ;;  %v854_v43 = vmul.f32 %v8355_v44, %v803_v0 }
0x5058   :  { %v893_v16 = vadd.f32 %v8361_v38, %v854_v43  ;;  %5369 = vrot.lane.b32.xlu0 %v5367_v3, %s7443_s28 }
0x505a   :  { %926 = vst.msk [vmem:[#allocation2 + $0x3a] sm:$0x3] %vm896_vm4, %v893_v16 }
0x5061   :  { %v5366_v23 = vld [vmem:[#allocation2 + $0x3a] sm:$0x3] }
0x50ca   :  { %v5370_v54 = vpop.permute.xlu0 %5369 }
0x50cb   :  { %6931 = vmatmul.mubr.msk.bf16.vlgmr.msra.gmra.mrb[132].mxu0 %vm492_vm3, %v5370_v54 }
0x50cc   :  { %6946 = vmatpush3.bf16.msra.mxu0 %v8320_v62  ;;  %6949 = vmatprep.mubr.msk.bf16.mxu0 %vm7441_vm2, %v7440_v63 }
0x50cd   :  { %6947 = vmatprep.subr.bf16.mxu0 %v7440_v63 }
0x50d0   :  { %6948 = vmatpush3.bf16.msra.mxu0 %v8329_v18 }
0x50d1   :  { %6964 = vmatprep.subr.bf16.mxu0 %v7440_v63 }
0x519e   :  { %v5408_v49 = vpop.f32.mrb[132].mxu0 }
0x519f   :  { %v5409_v53 = vadd.f32 %v8339_v50, %v5408_v49  ;;  %v6932_v55 = vpop.f32.mrb[133].mxu0 }
0x51a0   :  { %v5411_v56 = vpop.f32.mrb[134].mxu0 }
0x51a1   :  { %5422 = vrot.lane.b32.xlu0 %v5409_v53, %s7442_s24  ;;  %v6933_v17 = vpop.f32.mrb[135].mxu0  ;;  %v5414_v58 = vadd.f32 %v5409_v53, %v5366_v23 }
0x51a3   :  { %v5967_v40 = vmul.f32 -1.442695, %v5414_v58 }
0x51a5   :  { %7411 = vpow2.f32 %v5967_v40 }
0x51af   :  { %v7412_v6 = vpop.eup %7411 }
0x51b0   :  { %v5418_v60 = vadd.f32 1.0, %v7412_v6 }
0x51b2   :  { %7413 = vrcp.f32 %v5418_v60 }
0x51bc   :  { %v7414_v2 = vpop.eup %7413 }
0x51bd   :  { %v5432_v11 = vsub.f32 1.0, %v7414_v2  ;;  %v5438_v4 = vmul.f32 %v7414_v2, %v8446_v46 }
0x5213   :  { %v5423_v20 = vpop.permute.xlu0 %5422 }
0x5214   :  { %v5425_v5 = vmul.f32 %v7414_v2, %v5423_v20 }
0x5216   :  { %5427 = vrot.lane.b32.xlu1 %v5425_v5, %s7442_s24  ;;  %v934_v5 = vld [vmem:[%s8956_s10] sm:$0xff] }
0x5288   :  { %v5428_v22 = vpop.permute.xlu1 %5427 }
0x5289   :  { %v5430_v24 = vadd.f32 %v5428_v22, %v5366_v23  ;;  %v935_v22 = vld [vmem:[%s8956_s10 + $0x8] sm:$0xff] }
0x528b   :  { %7415 = vtanh.f32 %v5430_v24  ;;  %v8492_v24 = vpack.c.bf16 %v935_v22, %v934_v5 }
0x5295   :  { %v7416_v8 = vpop.eup %7415 }
0x5296   :  { %5434 = vrot.lane.b32.xlu0 %v7416_v8, %s7443_s28 }
0x529a   :  { %809 = vbcast.lane.b32.xlu0 %v807_v10, 256  ;;  %v936_v10 = vld [vmem:[%s8956_s10 + $0x10] sm:$0xff] }
0x5308   :  { %v5435_v12 = vpop.permute.xlu0 %5434 }
0x5309   :  { %v5437_v27 = vmul.f32 %v5435_v12, %v5432_v11  ;;  %v937_v11 = vld [vmem:[%s8956_s10 + $0x18] sm:$0xff] }
0x530b   :  { %v8468_v0 = vadd.f32 %v5438_v4, %v5437_v27  ;;  %v8502_v4 = vpack.c.bf16 %v937_v11, %v936_v10 }
0x530c   :  { %v810_v3 = vpop.permute.xlu0 %809 }
0x530d   :  { %v5519_v43 = vpack.c.bf16 %v8468_v0, %v8468_v0  ;;  %v855_v16 = vmul.f32 %v8355_v44, %v810_v3  ;;  %v814_v3 = vrot.slane %v8312_v36, %v7888_v9  ;;  %v8600_v36 = vld [vmem:[%s8957_s11] ss:$0 sm:$0xff] }
0x530f   :  { %v894_v54 = vadd.f32 %v8361_v38, %v855_v16  ;;  %5521 = vrot.lane.b32.xlu1 %v5519_v43, %s7443_s28 }
0x5311   :  { %927 = vst.msk [vmem:[#allocation2 + $0x3c] sm:$0x3] %vm896_vm4, %v894_v54 }
0x5318   :  { %v5518_v23 = vld [vmem:[#allocation2 + $0x3c] sm:$0x3] }
0x5381   :  { %v5522_v34 = vpop.permute.xlu1 %5521 }
0x5382   :  { %6950 = vmatmul.mubr.msk.bf16.vlgmr.msra.gmra.mrb[136].mxu0 %vm492_vm3, %v5522_v34 }
0x5383   :  { %6965 = vmatpush3.bf16.msra.mxu0 %v8320_v62  ;;  %6968 = vmatprep.mubr.msk.bf16.mxu0 %vm7441_vm2, %v7440_v63 }
0x5384   :  { %6966 = vmatprep.subr.bf16.mxu0 %v7440_v63 }
0x5387   :  { %6967 = vmatpush3.bf16.msra.mxu0 %v8329_v18  ;;  %v7444_v18 = vmov 0.0|0.0  }
0x5388   :  { %7035 = vmatprep.subr.bf16.mxu1 %v7444_v18 }
0x5389   :  { %7037 = vmatpush3.bf16.msra.mxu1 %v8492_v24 }
0x538a   :  { %7038 = vmatprep.subr.bf16.mxu1 %v7444_v18 }
0x538d   :  { %7040 = vmatpush3.bf16.msra.mxu1 %v8502_v4 }
0x538e   :  { %7041 = vmatprep.subr.bf16.mxu1 %v7444_v18 }
0x5455   :  { %v5560_v49 = vpop.f32.mrb[136].mxu0 }
0x5456   :  { %v5561_v53 = vadd.f32 %v8339_v50, %v5560_v49  ;;  %v6951_v55 = vpop.f32.mrb[137].mxu0 }
0x5457   :  { %v5563_v56 = vpop.f32.mrb[138].mxu0 }
0x5458   :  { %5574 = vrot.lane.b32.xlu1 %v5561_v53, %s7442_s24  ;;  %v6952_v17 = vpop.f32.mrb[139].mxu0  ;;  %v5566_v58 = vadd.f32 %v5561_v53, %v5518_v23 }
0x545a   :  { %v5971_v40 = vmul.f32 -1.442695, %v5566_v58 }
0x545c   :  { %7417 = vpow2.f32 %v5971_v40 }
0x5466   :  { %v7418_v62 = vpop.eup %7417 }
0x5467   :  { %v5570_v6 = vadd.f32 1.0, %v7418_v62 }
0x5469   :  { %7419 = vrcp.f32 %v5570_v6 }
0x5473   :  { %v7420_v60 = vpop.eup %7419 }
0x5474   :  { %v5584_v43 = vsub.f32 1.0, %v7420_v60  ;;  %v5590_v54 = vmul.f32 %v7420_v60, %v8468_v0 }
0x54ca   :  { %v5575_v2 = vpop.permute.xlu1 %5574 }
0x54cb   :  { %v5577_v20 = vmul.f32 %v7420_v60, %v5575_v2 }
0x54cd   :  { %5579 = vrot.lane.b32.xlu0 %v5577_v20, %s7442_s24 }
0x553f   :  { %v5580_v8 = vpop.permute.xlu0 %5579 }
0x5540   :  { %v5582_v12 = vadd.f32 %v5580_v8, %v5518_v23 }
0x5542   :  { %7421 = vtanh.f32 %v5582_v12 }
0x554c   :  { %v7422_v27 = vpop.eup %7421 }
0x554d   :  { %5586 = vrot.lane.b32.xlu1 %v7422_v27, %s7443_s28 }
0x5551   :  { %1034 = vrot.lane.b32.xlu1 %v7744_v45, %s7443_s28 }
0x5555   :  { %816 = vbcast.lane.b32.xlu1 %v814_v3, 256 }
0x5559   :  { %1489 = vrot.lane.b32.xlu1 %v7819_v29, %s7443_s28 }
0x555d   :  { %1793 = vrot.lane.b32.xlu1 %v7869_v42, %s7443_s28 }
0x55bf   :  { %v5587_v16 = vpop.permute.xlu1 %5586 }
0x55c0   :  { %v5589_v34 = vmul.f32 %v5587_v16, %v5584_v43 }
0x55c2   :  { %v8516_v49 = vadd.f32 %v5590_v54, %v5589_v34 }
0x55c3   :  { %v1035_v53 = vpop.permute.xlu1 %1034 }
0x55c4   :  { %v5671_v45 = vpack.c.bf16 %v8516_v49, %v8516_v49  ;;  %6392 = vmatmul.mubr.msk.f32.vlgmr.msra.gmra.mrb[8].mxu1 %vm492_vm3, %v1035_v53 }
0x55c5   :  { %7043 = vmatpush3.bf16.msra.mxu1 %v8492_v24  ;;  %6410 = vmatprep.mubr.msk.f32.mxu1 %vm7441_vm2, %v7440_v63 }
0x55c6   :  { %5673 = vrot.lane.b32.xlu0 %v5671_v45, %s7443_s28  ;;  %7044 = vmatprep.subr.bf16.mxu1 %v7444_v18 }
0x55c7   :  { %v817_v29 = vpop.permute.xlu1 %816 }
0x55c8   :  { %v856_v42 = vmul.f32 %v8355_v44, %v817_v29 }
0x55c9   :  { %7046 = vmatpush3.bf16.msra.mxu1 %v8502_v4 }
0x55ca   :  { %v895_v9 = vadd.f32 %v8361_v38, %v856_v42  ;;  %1185 = vrot.lane.b32.xlu0 %v7769_v15, %s7443_s28  ;;  %7047 = vmatprep.subr.bf16.mxu1 %v7444_v18 }
0x55cc   :  { %928 = vst.msk [vmem:[#allocation2 + $0x3e] sm:$0x3] %vm896_vm4, %v895_v9 }
0x55ce   :  { %1337 = vrot.lane.b32.xlu0 %v7794_v51, %s7443_s28 }
0x55d2   :  { %1641 = vrot.lane.b32.xlu0 %v7844_v61, %s7443_s28 }
0x55d6   :  { %1945 = vrot.lane.b32.xlu0 %v7894_v26, %s7443_s28  ;;  %v1490_v26 = vpop.permute.xlu1 %1489 }
0x55da   :  { %2097 = vrot.lane.b32.xlu0 %v7917_v59, %s7443_s28 }
0x55de   :  { %2401 = vrot.lane.b32.xlu0 %v7966_v19, %s7443_s28  ;;  %v1794_v19 = vpop.permute.xlu1 %1793 }
0x55e2   :  { %2705 = vrot.lane.b32.xlu0 %v8020_v52, %s7443_s28 }
0x55e6   :  { %3009 = vrot.lane.b32.xlu0 %v8079_v28, %s7443_s28 }
0x5638   :  { %v5674_v15 = vpop.permute.xlu0 %5673 }
0x5639   :  { %6969 = vmatmul.mubr.msk.bf16.vlgmr.msra.gmra.mrb[140].mxu0 %vm492_vm3, %v5674_v15 }
0x563c   :  { %v1186_v51 = vpop.permute.xlu0 %1185 }
0x563d   :  { %6411 = vmatmul.mubr.msk.f32.vlgmr.msra.gmra.mrb[10].mxu1 %vm492_vm3, %v1186_v51 }
0x563e   :  { %7049 = vmatpush3.bf16.msra.mxu1 %v8492_v24  ;;  %6429 = vmatprep.mubr.msk.f32.mxu1 %vm7441_vm2, %v7440_v63 }
0x563f   :  { %7050 = vmatprep.subr.bf16.mxu1 %v7444_v18 }
0x5640   :  { %v1338_v61 = vpop.permute.xlu0 %1337 }
0x5642   :  { %7052 = vmatpush3.bf16.msra.mxu1 %v8502_v4 }
0x5643   :  { %7053 = vmatprep.subr.bf16.mxu1 %v7444_v18 }
0x5644   :  { %v1642_v59 = vpop.permute.xlu0 %1641 }
0x5645   :  { %6430 = vmatmul.mubr.msk.f32.vlgmr.msra.gmra.mrb[12].mxu1 %vm492_vm3, %v1338_v61 }
0x5646   :  { %7055 = vmatpush3.bf16.msra.mxu1 %v8492_v24  ;;  %6448 = vmatprep.mubr.msk.f32.mxu1 %vm7441_vm2, %v7440_v63 }
0x5647   :  { %7056 = vmatprep.subr.bf16.mxu1 %v7444_v18 }
0x5648   :  { %v1946_v52 = vpop.permute.xlu0 %1945 }
0x564a   :  { %7058 = vmatpush3.bf16.msra.mxu1 %v8502_v4 }
0x564b   :  { %7059 = vmatprep.subr.bf16.mxu1 %v7444_v18 }
0x564c   :  { %v2098_v28 = vpop.permute.xlu0 %2097 }
0x564d   :  { %6449 = vmatmul.mubr.msk.f32.vlgmr.msra.gmra.mrb[14].mxu1 %vm492_vm3, %v1490_v26 }
0x564e   :  { %7061 = vmatpush3.bf16.msra.mxu1 %v8492_v24  ;;  %6467 = vmatprep.mubr.msk.f32.mxu1 %vm7441_vm2, %v7440_v63 }
0x564f   :  { %7062 = vmatprep.subr.bf16.mxu1 %v7444_v18 }
0x5650   :  { %v2402_v53 = vpop.permute.xlu0 %2401 }
0x5652   :  { %7064 = vmatpush3.bf16.msra.mxu1 %v8502_v4 }
0x5653   :  { %7065 = vmatprep.subr.bf16.mxu1 %v7444_v18 }
0x5655   :  { %6468 = vmatmul.mubr.msk.f32.vlgmr.msra.gmra.mrb[16].mxu1 %vm492_vm3, %v1642_v59 }
0x5656   :  { %7067 = vmatpush3.bf16.msra.mxu1 %v8492_v24  ;;  %6486 = vmatprep.mubr.msk.f32.mxu1 %vm7441_vm2, %v7440_v63 }
0x5657   :  { %7068 = vmatprep.subr.bf16.mxu1 %v7444_v18 }
0x565a   :  { %7070 = vmatpush3.bf16.msra.mxu1 %v8502_v4 }
0x565b   :  { %7071 = vmatprep.subr.bf16.mxu1 %v7444_v18 }
0x565d   :  { %6487 = vmatmul.mubr.msk.f32.vlgmr.msra.gmra.mrb[18].mxu1 %vm492_vm3, %v1794_v19 }
0x565e   :  { %7073 = vmatpush3.bf16.msra.mxu1 %v8492_v24  ;;  %6505 = vmatprep.mubr.msk.f32.mxu1 %vm7441_vm2, %v7440_v63 }
0x565f   :  { %7074 = vmatprep.subr.bf16.mxu1 %v7444_v18 }
0x5662   :  { %7076 = vmatpush3.bf16.msra.mxu1 %v8502_v4 }
0x5663   :  { %7077 = vmatprep.subr.bf16.mxu1 %v7444_v18 }
0x5665   :  { %6506 = vmatmul.mubr.msk.f32.vlgmr.msra.gmra.mrb[20].mxu1 %vm492_vm3, %v1946_v52 }
0x5666   :  { %7079 = vmatpush3.bf16.msra.mxu1 %v8492_v24  ;;  %6524 = vmatprep.mubr.msk.f32.mxu1 %vm7441_vm2, %v7440_v63 }
0x5667   :  { %7080 = vmatprep.subr.bf16.mxu1 %v7444_v18 }
0x566a   :  { %7082 = vmatpush3.bf16.msra.mxu1 %v8502_v4 }
0x566b   :  { %7083 = vmatprep.subr.bf16.mxu1 %v7444_v18 }
0x566d   :  { %6525 = vmatmul.mubr.msk.f32.vlgmr.msra.gmra.mrb[22].mxu1 %vm492_vm3, %v2098_v28 }
0x566e   :  { %7085 = vmatpush3.bf16.msra.mxu1 %v8492_v24  ;;  %6543 = vmatprep.mubr.msk.f32.mxu1 %vm7441_vm2, %v7440_v63 }
0x566f   :  { %7086 = vmatprep.subr.bf16.mxu1 %v7444_v18 }
0x5672   :  { %7088 = vmatpush3.bf16.msra.mxu1 %v8502_v4 }
0x5673   :  { %7089 = vmatprep.subr.bf16.mxu1 %v7444_v18 }
0x5697   :  { %v1104_v44 = vpop.f32.mrb[8].mxu1 }
0x5698   :  { %v1105_v38 = vadd.f32 %v8600_v36, %v1104_v44  ;;  %v6393_v55 = vpop.f32.mrb[9].mxu1 }
0x569a   :  { %1108 = vst [vmem:[%s8958_s12] sm:$0x3] %v1105_v38 }
0x570c   :  { %v5712_v56 = vpop.f32.mrb[140].mxu0 }
0x570d   :  { %v5713_v17 = vadd.f32 %v8339_v50, %v5712_v56  ;;  %v6970_v23 = vpop.f32.mrb[141].mxu0 }
0x570e   :  { %v5715_v58 = vpop.f32.mrb[142].mxu0 }
0x570f   :  { %5726 = vrot.lane.b32.xlu1 %v5713_v17, %s7442_s24  ;;  %v6971_v40 = vpop.f32.mrb[143].mxu0 }
0x5710   :  { %v1255_v62 = vpop.f32.mrb[10].mxu1 }
0x5711   :  { %v1256_v6 = vadd.f32 %v8600_v36, %v1255_v62  ;;  %v6412_v60 = vpop.f32.mrb[11].mxu1 }
0x5713   :  { %5857 = vst [vmem:[%s8958_s12 + $0x2] sm:$0x3] %v1256_v6  ;;  %2249 = vrot.lane.b32.xlu1 %v7944_v47, %s7443_s28 }
0x5717   :  { %2553 = vrot.lane.b32.xlu1 %v7988_v7, %s7443_s28 }
0x5718   :  { %v1407_v50 = vpop.f32.mrb[12].mxu1 }
0x5719   :  { %v1408_v2 = vadd.f32 %v8600_v36, %v1407_v50  ;;  %v6431_v20 = vpop.f32.mrb[13].mxu1 }
0x571b   :  { %5861 = vst [vmem:[%s8958_s12 + $0x4] sm:$0x3] %v1408_v2  ;;  %2857 = vrot.lane.b32.xlu1 %v8047_v37, %s7443_s28 }
0x571f   :  { %3161 = vrot.lane.b32.xlu1 %v8101_v14, %s7443_s28 }
0x5720   :  { %v1559_v5 = vpop.f32.mrb[14].mxu1 }
0x5721   :  { %v1560_v47 = vadd.f32 %v8600_v36, %v1559_v5  ;;  %v6450_v22 = vpop.f32.mrb[15].mxu1 }
0x5723   :  { %5865 = vst [vmem:[%s8958_s12 + $0x6] sm:$0x3] %v1560_v47  ;;  %3313 = vrot.lane.b32.xlu1 %v8124_v57, %s7443_s28 }
0x5727   :  { %3617 = vrot.lane.b32.xlu1 %v8173_v48, %s7443_s28 }
0x5728   :  { %v1711_v7 = vpop.f32.mrb[16].mxu1 }
0x5729   :  { %v1712_v37 = vadd.f32 %v8600_v36, %v1711_v7  ;;  %v6469_v8 = vpop.f32.mrb[17].mxu1 }
0x572b   :  { %5869 = vst [vmem:[%s8958_s12 + $0x8] sm:$0x3] %v1712_v37  ;;  %3921 = vrot.lane.b32.xlu1 %v8217_v33, %s7443_s28 }
0x572f   :  { %4225 = vrot.lane.b32.xlu1 %v8261_v30, %s7443_s28 }
0x5730   :  { %v1863_v14 = vpop.f32.mrb[18].mxu1 }
0x5731   :  { %v1864_v57 = vadd.f32 %v8600_v36, %v1863_v14  ;;  %v6488_v10 = vpop.f32.mrb[19].mxu1 }
0x5733   :  { %5873 = vst [vmem:[%s8958_s12 + $0xa] sm:$0x3] %v1864_v57  ;;  %4529 = vrot.lane.b32.xlu1 %v8306_v25, %s7443_s28 }
0x5737   :  { %4681 = vrot.lane.b32.xlu1 %v8348_v13, %s7443_s28  ;;  %v8662_v13 = vld [vmem:[#allocation2 + $0x3e] sm:$0x3] }
0x5738   :  { %v2015_v48 = vpop.f32.mrb[20].mxu1  ;;  %v5718_v27 = vadd.f32 %v5713_v17, %v8662_v13 }
0x5739   :  { %v2016_v33 = vadd.f32 %v8600_v36, %v2015_v48  ;;  %v6507_v11 = vpop.f32.mrb[21].mxu1 }
0x573a   :  { %v5975_v3 = vmul.f32 -1.442695, %v5718_v27 }
0x573b   :  { %5877 = vst [vmem:[%s8958_s12 + $0xc] sm:$0x3] %v2016_v33  ;;  %4985 = vrot.lane.b32.xlu1 %v8402_v41, %s7443_s28 }
0x573c   :  { %7423 = vpow2.f32 %v5975_v3 }
0x573f   :  { %5289 = vrot.lane.b32.xlu1 %v8446_v46, %s7443_s28 }
0x5740   :  { %v2167_v30 = vpop.f32.mrb[22].mxu1 }
0x5741   :  { %v2168_v25 = vadd.f32 %v8600_v36, %v2167_v30  ;;  %v6526_v12 = vpop.f32.mrb[23].mxu1 }
0x5743   :  { %5881 = vst [vmem:[%s8958_s12 + $0xe] sm:$0x3] %v2168_v25  ;;  %5593 = vrot.lane.b32.xlu1 %v8516_v49, %s7443_s28 }
0x5746   :  { %v7424_v41 = vpop.eup %7423 }
0x5747   :  { %v5722_v43 = vadd.f32 1.0, %v7424_v41 }
0x5749   :  { %7425 = vrcp.f32 %v5722_v43 }
0x5753   :  { %v8665_v46 = vpop.eup %7425 }
0x5754   :  { %v5736_v50 = vsub.f32 1.0, %v8665_v46  ;;  %v5742_v20 = vmul.f32 %v8665_v46, %v8516_v49 }
0x5781   :  { %v5727_v16 = vpop.permute.xlu1 %5726 }
0x5782   :  { %v5729_v54 = vmul.f32 %v8665_v46, %v5727_v16 }
0x5784   :  { %5731 = vrot.lane.b32.xlu0 %v5729_v54, %s7442_s24 }
0x5785   :  { %v2250_v34 = vpop.permute.xlu1 %2249 }
0x5786   :  { %6544 = vmatmul.mubr.msk.f32.vlgmr.msra.gmra.mrb[24].mxu1 %vm492_vm3, %v2250_v34 }
0x5787   :  { %7091 = vmatpush3.bf16.msra.mxu1 %v8492_v24  ;;  %6562 = vmatprep.mubr.msk.f32.mxu1 %vm7441_vm2, %v7440_v63 }
0x5788   :  { %3465 = vrot.lane.b32.xlu0 %v8151_v1, %s7443_s28  ;;  %7092 = vmatprep.subr.bf16.mxu1 %v7444_v18 }
0x5789   :  { %v2554_v1 = vpop.permute.xlu1 %2553 }
0x578b   :  { %7094 = vmatpush3.bf16.msra.mxu1 %v8502_v4 }
0x578c   :  { %3769 = vrot.lane.b32.xlu0 %v8195_v39, %s7443_s28  ;;  %7095 = vmatprep.subr.bf16.mxu1 %v7444_v18  ;;  %v2706_v39 = vpop.permute.xlu0 %2705 }
0x578e   :  { %6563 = vmatmul.mubr.msk.f32.vlgmr.msra.gmra.mrb[26].mxu1 %vm492_vm3, %v2402_v53 }
0x578f   :  { %7097 = vmatpush3.bf16.msra.mxu1 %v8492_v24  ;;  %6581 = vmatprep.mubr.msk.f32.mxu1 %vm7441_vm2, %v7440_v63 }
0x5790   :  { %4073 = vrot.lane.b32.xlu0 %v8239_v31, %s7443_s28  ;;  %7098 = vmatprep.subr.bf16.mxu1 %v7444_v18  ;;  %v2858_v31 = vpop.permute.xlu1 %2857 }
0x5793   :  { %7100 = vmatpush3.bf16.msra.mxu1 %v8502_v4 }
0x5794   :  { %4377 = vrot.lane.b32.xlu0 %v8283_v32, %s7443_s28  ;;  %7101 = vmatprep.subr.bf16.mxu1 %v7444_v18  ;;  %v3010_v32 = vpop.permute.xlu0 %3009  ;;  %v3162_v45 = vpop.permute.xlu1 %3161 }
0x5796   :  { %6582 = vmatmul.mubr.msk.f32.vlgmr.msra.gmra.mrb[28].mxu1 %vm492_vm3, %v2554_v1 }
0x5797   :  { %7103 = vmatpush3.bf16.msra.mxu1 %v8492_v24  ;;  %6600 = vmatprep.mubr.msk.f32.mxu1 %vm7441_vm2, %v7440_v63 }
0x5798   :  { %7104 = vmatprep.subr.bf16.mxu1 %v7444_v18  ;;  %v3314_v29 = vpop.permute.xlu1 %3313 }
0x579b   :  { %7106 = vmatpush3.bf16.msra.mxu1 %v8502_v4 }
0x579c   :  { %7107 = vmatprep.subr.bf16.mxu1 %v7444_v18  ;;  %v3618_v51 = vpop.permute.xlu1 %3617 }
0x579e   :  { %6601 = vmatmul.mubr.msk.f32.vlgmr.msra.gmra.mrb[30].mxu1 %vm492_vm3, %v2706_v39 }
0x579f   :  { %7109 = vmatpush3.bf16.msra.mxu1 %v8492_v24  ;;  %6619 = vmatprep.mubr.msk.f32.mxu1 %vm7441_vm2, %v7440_v63 }
0x57a0   :  { %7110 = vmatprep.subr.bf16.mxu1 %v7444_v18 }
0x57a3   :  { %7112 = vmatpush3.bf16.msra.mxu1 %v8502_v4 }
0x57a4   :  { %7113 = vmatprep.subr.bf16.mxu1 %v7444_v18 }
0x57a6   :  { %6620 = vmatmul.mubr.msk.f32.vlgmr.msra.gmra.mrb[32].mxu1 %vm492_vm3, %v2858_v31 }
0x57a7   :  { %7115 = vmatpush3.bf16.msra.mxu1 %v8492_v24  ;;  %6638 = vmatprep.mubr.msk.f32.mxu1 %vm7441_vm2, %v7440_v63 }
0x57a8   :  { %7116 = vmatprep.subr.bf16.mxu1 %v7444_v18 }
0x57ab   :  { %7118 = vmatpush3.bf16.msra.mxu1 %v8502_v4 }
0x57ac   :  { %7119 = vmatprep.subr.bf16.mxu1 %v7444_v18 }
0x57ae   :  { %6639 = vmatmul.mubr.msk.f32.vlgmr.msra.gmra.mrb[34].mxu1 %vm492_vm3, %v3010_v32 }
0x57af   :  { %7121 = vmatpush3.bf16.msra.mxu1 %v8492_v24  ;;  %6657 = vmatprep.mubr.msk.f32.mxu1 %vm7441_vm2, %v7440_v63 }
0x57b0   :  { %7122 = vmatprep.subr.bf16.mxu1 %v7444_v18 }
0x57b3   :  { %7124 = vmatpush3.bf16.msra.mxu1 %v8502_v4 }
0x57b4   :  { %7125 = vmatprep.subr.bf16.mxu1 %v7444_v18 }
0x57b6   :  { %6658 = vmatmul.mubr.msk.f32.vlgmr.msra.gmra.mrb[36].mxu1 %vm492_vm3, %v3162_v45 }
0x57b7   :  { %7127 = vmatpush3.bf16.msra.mxu1 %v8492_v24  ;;  %6676 = vmatprep.mubr.msk.f32.mxu1 %vm7441_vm2, %v7440_v63 }
0x57b8   :  { %7128 = vmatprep.subr.bf16.mxu1 %v7444_v18 }
0x57bb   :  { %7130 = vmatpush3.bf16.msra.mxu1 %v8502_v4 }
0x57bc   :  { %7131 = vmatprep.subr.bf16.mxu1 %v7444_v18 }
0x57be   :  { %6677 = vmatmul.mubr.msk.f32.vlgmr.msra.gmra.mrb[38].mxu1 %vm492_vm3, %v3314_v29 }
0x57bf   :  { %7133 = vmatpush3.bf16.msra.mxu1 %v8492_v24  ;;  %6695 = vmatprep.mubr.msk.f32.mxu1 %vm7441_vm2, %v7440_v63 }
0x57c0   :  { %7134 = vmatprep.subr.bf16.mxu1 %v7444_v18 }
0x57c3   :  { %7136 = vmatpush3.bf16.msra.mxu1 %v8502_v4 }
0x57c4   :  { %7137 = vmatprep.subr.bf16.mxu1 %v7444_v18 }
0x57f6   :  { %v5732_v42 = vpop.permute.xlu0 %5731 }
0x57f7   :  { %v5734_v9 = vadd.f32 %v5732_v42, %v8662_v13 }
0x57f9   :  { %7427 = vtanh.f32 %v5734_v9 }
0x57fa   :  { %v3466_v15 = vpop.permute.xlu0 %3465 }
0x57fb   :  { %6696 = vmatmul.mubr.msk.f32.vlgmr.msra.gmra.mrb[40].mxu1 %vm492_vm3, %v3466_v15 }
0x57fc   :  { %7139 = vmatpush3.bf16.msra.mxu1 %v8492_v24  ;;  %6714 = vmatprep.mubr.msk.f32.mxu1 %vm7441_vm2, %v7440_v63 }
0x57fd   :  { %7140 = vmatprep.subr.bf16.mxu1 %v7444_v18 }
0x57fe   :  { %v3770_v26 = vpop.permute.xlu0 %3769 }
0x5800   :  { %7142 = vmatpush3.bf16.msra.mxu1 %v8502_v4 }
0x5801   :  { %7143 = vmatprep.subr.bf16.mxu1 %v7444_v18 }
0x5803   :  { %v7428_v61 = vpop.eup %7427  ;;  %6715 = vmatmul.mubr.msk.f32.vlgmr.msra.gmra.mrb[42].mxu1 %vm492_vm3, %v3618_v51 }
0x5804   :  { %7145 = vmatpush3.bf16.msra.mxu1 %v8492_v24  ;;  %5738 = vrot.lane.b32.xlu0 %v7428_v61, %s7443_s28 }
0x5805   :  { %7146 = vmatprep.subr.bf16.mxu1 %v7444_v18  ;;  %6733 = vmatprep.mubr.msk.f32.mxu1 %vm7441_vm2, %v7440_v63 }
0x5808   :  { %7148 = vmatpush3.bf16.msra.mxu1 %v8502_v4  ;;  %4833 = vrot.lane.b32.xlu0 %v8380_v35, %s7443_s28  ;;  %v3922_v35 = vpop.permute.xlu1 %3921 }
0x5809   :  { %7149 = vmatprep.subr.bf16.mxu1 %v7444_v18 }
0x580b   :  { %6734 = vmatmul.mubr.msk.f32.vlgmr.msra.gmra.mrb[44].mxu1 %vm492_vm3, %v3770_v26 }
0x580c   :  { %7151 = vmatpush3.bf16.msra.mxu1 %v8492_v24  ;;  %5137 = vrot.lane.b32.xlu0 %v8424_v21, %s7443_s28  ;;  %v4074_v21 = vpop.permute.xlu0 %4073 }
0x580d   :  { %7152 = vmatprep.subr.bf16.mxu1 %v7444_v18  ;;  %6752 = vmatprep.mubr.msk.f32.mxu1 %vm7441_vm2, %v7440_v63 }
0x5810   :  { %7154 = vmatpush3.bf16.msra.mxu1 %v8502_v4  ;;  %5441 = vrot.lane.b32.xlu0 %v8468_v0, %s7443_s28  ;;  %v4226_v0 = vpop.permute.xlu1 %4225  ;;  %v4378_v59 = vpop.permute.xlu0 %4377 }
0x5811   :  { %7155 = vmatprep.subr.bf16.mxu1 %v7444_v18 }
0x5813   :  { %6753 = vmatmul.mubr.msk.f32.vlgmr.msra.gmra.mrb[46].mxu1 %vm492_vm3, %v3922_v35 }
0x5814   :  { %7157 = vmatpush3.bf16.msra.mxu1 %v8492_v24  ;;  %6771 = vmatprep.mubr.msk.f32.mxu1 %vm7441_vm2, %v7440_v63  ;;  %v4530_v19 = vpop.permute.xlu1 %4529 }
0x5815   :  { %7158 = vmatprep.subr.bf16.mxu1 %v7444_v18 }
0x5818   :  { %7160 = vmatpush3.bf16.msra.mxu1 %v8502_v4  ;;  %v4682_v52 = vpop.permute.xlu1 %4681 }
0x5819   :  { %7161 = vmatprep.subr.bf16.mxu1 %v7444_v18 }
0x581b   :  { %6772 = vmatmul.mubr.msk.f32.vlgmr.msra.gmra.mrb[48].mxu1 %vm492_vm3, %v4074_v21 }
0x581c   :  { %7163 = vmatpush3.bf16.msra.mxu1 %v8492_v24  ;;  %6790 = vmatprep.mubr.msk.f32.mxu1 %vm7441_vm2, %v7440_v63  ;;  %v4986_v14 = vpop.permute.xlu1 %4985 }
0x581d   :  { %7164 = vmatprep.subr.bf16.mxu1 %v7444_v18 }
0x5820   :  { %7166 = vmatpush3.bf16.msra.mxu1 %v8502_v4  ;;  %v5290_v12 = vpop.permute.xlu1 %5289 }
0x5821   :  { %7167 = vmatprep.subr.bf16.mxu1 %v7444_v18 }
0x5823   :  { %6791 = vmatmul.mubr.msk.f32.vlgmr.msra.gmra.mrb[50].mxu1 %vm492_vm3, %v4226_v0 }
0x5824   :  { %7169 = vmatpush3.bf16.msra.mxu1 %v8492_v24  ;;  %6809 = vmatprep.mubr.msk.f32.mxu1 %vm7441_vm2, %v7440_v63  ;;  %v5594_v41 = vpop.permute.xlu1 %5593 }
0x5825   :  { %7170 = vmatprep.subr.bf16.mxu1 %v7444_v18 }
0x5828   :  { %7172 = vmatpush3.bf16.msra.mxu1 %v8502_v4 }
0x5829   :  { %7173 = vmatprep.subr.bf16.mxu1 %v7444_v18 }
0x582b   :  { %6810 = vmatmul.mubr.msk.f32.vlgmr.msra.gmra.mrb[52].mxu1 %vm492_vm3, %v4378_v59 }
0x582c   :  { %7175 = vmatpush3.bf16.msra.mxu1 %v8492_v24  ;;  %6828 = vmatprep.mubr.msk.f32.mxu1 %vm7441_vm2, %v7440_v63 }
0x582d   :  { %7176 = vmatprep.subr.bf16.mxu1 %v7444_v18 }
0x5830   :  { %7178 = vmatpush3.bf16.msra.mxu1 %v8502_v4 }
0x5831   :  { %7179 = vmatprep.subr.bf16.mxu1 %v7444_v18 }
0x5833   :  { %6829 = vmatmul.mubr.msk.f32.vlgmr.msra.gmra.mrb[54].mxu1 %vm492_vm3, %v4530_v19 }
0x5834   :  { %7181 = vmatpush3.bf16.msra.mxu1 %v8492_v24  ;;  %6847 = vmatprep.mubr.msk.f32.mxu1 %vm7441_vm2, %v7440_v63 }
0x5835   :  { %7182 = vmatprep.subr.bf16.mxu1 %v7444_v18 }
0x5838   :  { %7184 = vmatpush3.bf16.msra.mxu1 %v8502_v4 }
0x5839   :  { %7185 = vmatprep.subr.bf16.mxu1 %v7444_v18 }
0x583b   :  { %6848 = vmatmul.mubr.msk.f32.vlgmr.msra.gmra.mrb[56].mxu1 %vm492_vm3, %v4682_v52 }
0x583c   :  { %7187 = vmatpush3.bf16.msra.mxu1 %v8492_v24  ;;  %6866 = vmatprep.mubr.msk.f32.mxu1 %vm7441_vm2, %v7440_v63 }
0x583d   :  { %7188 = vmatprep.subr.bf16.mxu1 %v7444_v18 }
0x5840   :  { %7190 = vmatpush3.bf16.msra.mxu1 %v8502_v4 }
0x5841   :  { %7191 = vmatprep.subr.bf16.mxu1 %v7444_v18 }
0x5859   :  { %v2319_v28 = vpop.f32.mrb[24].mxu1 }
0x585a   :  { %v2320_v44 = vadd.f32 %v8600_v36, %v2319_v28  ;;  %v6545_v38 = vpop.f32.mrb[25].mxu1 }
0x585c   :  { %5885 = vst [vmem:[%s8958_s12 + $0x10] sm:$0x3] %v2320_v44 }
0x5861   :  { %v2471_v55 = vpop.f32.mrb[26].mxu1 }
0x5862   :  { %v2472_v56 = vadd.f32 %v8600_v36, %v2471_v55  ;;  %v6564_v17 = vpop.f32.mrb[27].mxu1 }
0x5864   :  { %5889 = vst [vmem:[%s8958_s12 + $0x12] sm:$0x3] %v2472_v56 }
0x5869   :  { %v2623_v23 = vpop.f32.mrb[28].mxu1 }
0x586a   :  { %v2624_v58 = vadd.f32 %v8600_v36, %v2623_v23  ;;  %v6583_v40 = vpop.f32.mrb[29].mxu1 }
0x586c   :  { %5893 = vst [vmem:[%s8958_s12 + $0x14] sm:$0x3] %v2624_v58 }
0x5871   :  { %v2775_v62 = vpop.f32.mrb[30].mxu1 }
0x5872   :  { %v2776_v6 = vadd.f32 %v8600_v36, %v2775_v62  ;;  %v6602_v60 = vpop.f32.mrb[31].mxu1 }
0x5874   :  { %5897 = vst [vmem:[%s8958_s12 + $0x16] sm:$0x3] %v2776_v6 }
0x5876   :  { %v5739_v2 = vpop.permute.xlu0 %5738 }
0x5877   :  { %v5741_v5 = vmul.f32 %v5739_v2, %v5736_v50 }
0x5879   :  { %v5743_v47 = vadd.f32 %v5742_v20, %v5741_v5  ;;  %v2927_v22 = vpop.f32.mrb[32].mxu1 }
0x587a   :  { %v2928_v7 = vadd.f32 %v8600_v36, %v2927_v22  ;;  %v6621_v37 = vpop.f32.mrb[33].mxu1  ;;  %v4834_v8 = vpop.permute.xlu0 %4833 }
0x587b   :  { %5745 = vrot.lane.b32.xlu0 %v5743_v47, %s7443_s28  ;;  %6867 = vmatmul.mubr.msk.f32.vlgmr.msra.gmra.mrb[58].mxu1 %vm492_vm3, %v4834_v8 }
0x587c   :  { %5901 = vst [vmem:[%s8958_s12 + $0x18] sm:$0x3] %v2928_v7  ;;  %7193 = vmatpush3.bf16.msra.mxu1 %v8492_v24  ;;  %6885 = vmatprep.mubr.msk.f32.mxu1 %vm7441_vm2, %v7440_v63 }
0x587d   :  { %7194 = vmatprep.subr.bf16.mxu1 %v7444_v18 }
0x587e   :  { %v5138_v33 = vpop.permute.xlu0 %5137 }
0x5880   :  { %7196 = vmatpush3.bf16.msra.mxu1 %v8502_v4 }
0x5881   :  { %v3079_v49 = vpop.f32.mrb[34].mxu1  ;;  %7197 = vmatprep.subr.bf16.mxu1 %v7444_v18 }
0x5882   :  { %v3080_v57 = vadd.f32 %v8600_v36, %v3079_v49  ;;  %v6640_v10 = vpop.f32.mrb[35].mxu1  ;;  %v5442_v3 = vpop.permute.xlu0 %5441 }
0x5883   :  { %6886 = vmatmul.mubr.msk.f32.vlgmr.msra.gmra.mrb[60].mxu1 %vm492_vm3, %v4986_v14 }
0x5884   :  { %5905 = vst [vmem:[%s8958_s12 + $0x1a] sm:$0x3] %v3080_v57  ;;  %7199 = vmatpush3.bf16.msra.mxu1 %v8492_v24  ;;  %6904 = vmatprep.mubr.msk.f32.mxu1 %vm7441_vm2, %v7440_v63 }
0x5885   :  { %7200 = vmatprep.subr.bf16.mxu1 %v7444_v18 }
0x5888   :  { %7202 = vmatpush3.bf16.msra.mxu1 %v8502_v4 }
0x5889   :  { %v3231_v48 = vpop.f32.mrb[36].mxu1  ;;  %7203 = vmatprep.subr.bf16.mxu1 %v7444_v18 }
0x588a   :  { %v3232_v11 = vadd.f32 %v8600_v36, %v3231_v48  ;;  %v6659_v30 = vpop.f32.mrb[37].mxu1 }
0x588b   :  { %6905 = vmatmul.mubr.msk.f32.vlgmr.msra.gmra.mrb[62].mxu1 %vm492_vm3, %v5138_v33 }
0x588c   :  { %5909 = vst [vmem:[%s8958_s12 + $0x1c] sm:$0x3] %v3232_v11  ;;  %7205 = vmatpush3.bf16.msra.mxu1 %v8492_v24  ;;  %6923 = vmatprep.mubr.msk.f32.mxu1 %vm7441_vm2, %v7440_v63 }
0x588d   :  { %7206 = vmatprep.subr.bf16.mxu1 %v7444_v18 }
0x5890   :  { %7208 = vmatpush3.bf16.msra.mxu1 %v8502_v4 }
0x5891   :  { %v3383_v25 = vpop.f32.mrb[38].mxu1  ;;  %7209 = vmatprep.subr.bf16.mxu1 %v7444_v18 }
0x5892   :  { %v3384_v13 = vadd.f32 %v8600_v36, %v3383_v25  ;;  %v6678_v27 = vpop.f32.mrb[39].mxu1 }
0x5893   :  { %6924 = vmatmul.mubr.msk.f32.vlgmr.msra.gmra.mrb[64].mxu1 %vm492_vm3, %v5290_v12 }
0x5894   :  { %5913 = vst [vmem:[%s8958_s12 + $0x1e] sm:$0x3] %v3384_v13  ;;  %7211 = vmatpush3.bf16.msra.mxu1 %v8492_v24  ;;  %6942 = vmatprep.mubr.msk.f32.mxu1 %vm7441_vm2, %v7440_v63 }
0x5895   :  { %7212 = vmatprep.subr.bf16.mxu1 %v7444_v18 }
0x5898   :  { %7214 = vmatpush3.bf16.msra.mxu1 %v8502_v4 }
0x5899   :  { %7215 = vmatprep.subr.bf16.mxu1 %v7444_v18 }
0x589b   :  { %6943 = vmatmul.mubr.msk.f32.vlgmr.msra.gmra.mrb[66].mxu1 %vm492_vm3, %v5442_v3 }
0x589c   :  { %7217 = vmatpush3.bf16.msra.mxu1 %v8492_v24  ;;  %6961 = vmatprep.mubr.msk.f32.mxu1 %vm7441_vm2, %v7440_v63 }
0x589d   :  { %7218 = vmatprep.subr.bf16.mxu1 %v7444_v18 }
0x58a0   :  { %7220 = vmatpush3.bf16.msra.mxu1 %v8502_v4 }
0x58a1   :  { %7221 = vmatprep.subr.bf16.mxu1 %v7444_v18 }
0x58a3   :  { %6962 = vmatmul.mubr.msk.f32.vlgmr.msra.gmra.mrb[68].mxu1 %vm492_vm3, %v5594_v41 }
0x58a4   :  { %7223 = vmatpush3.bf16.msra.mxu1 %v8492_v24  ;;  %6980 = vmatprep.mubr.msk.f32.mxu1 %vm7441_vm2, %v7440_v63 }
0x58a5   :  { %7224 = vmatprep.subr.bf16.mxu1 %v7444_v18 }
0x58a8   :  { %7226 = vmatpush3.bf16.msra.mxu1 %v8502_v4 }
0x58ce   :  { %v3535_v43 = vpop.f32.mrb[40].mxu1 }
0x58cf   :  { %v3536_v46 = vadd.f32 %v8600_v36, %v3535_v43  ;;  %v6697_v16 = vpop.f32.mrb[41].mxu1 }
0x58d1   :  { %5917 = vst [vmem:[%s8958_s12 + $0x20] sm:$0x3] %v3536_v46 }
0x58d6   :  { %v3687_v54 = vpop.f32.mrb[42].mxu1 }
0x58d7   :  { %v3688_v34 = vadd.f32 %v8600_v36, %v3687_v54  ;;  %v6716_v53 = vpop.f32.mrb[43].mxu1 }
0x58d9   :  { %5921 = vst [vmem:[%s8958_s12 + $0x22] sm:$0x3] %v3688_v34 }
0x58de   :  { %v3839_v63 = vpop.f32.mrb[44].mxu1 }
0x58df   :  { %v3840_v18 = vadd.f32 %v8600_v36, %v3839_v63  ;;  %v6735_v24 = vpop.f32.mrb[45].mxu1 }
0x58e1   :  { %5925 = vst [vmem:[%s8958_s12 + $0x24] sm:$0x3] %v3840_v18 }
0x58e6   :  { %v3991_v4 = vpop.f32.mrb[46].mxu1 }
0x58e7   :  { %v3992_v1 = vadd.f32 %v8600_v36, %v3991_v4  ;;  %v6754_v39 = vpop.f32.mrb[47].mxu1 }
0x58e9   :  { %5929 = vst [vmem:[%s8958_s12 + $0x26] sm:$0x3] %v3992_v1 }
0x58ed   :  { %v5746_v31 = vpop.permute.xlu0 %5745 }
0x58ee   :  { %v4143_v32 = vpop.f32.mrb[48].mxu1  ;;  %6981 = vmatmul.mubr.msk.f32.vlgmr.msra.gmra.mrb[70].mxu1 %vm492_vm3, %v5746_v31 }
0x58ef   :  { %v4144_v45 = vadd.f32 %v8600_v36, %v4143_v32  ;;  %v6773_v29 = vpop.f32.mrb[49].mxu1 }
0x58f1   :  { %5933 = vst [vmem:[%s8958_s12 + $0x28] sm:$0x3] %v4144_v45 }
0x58f6   :  { %v4295_v42 = vpop.f32.mrb[50].mxu1 }
0x58f7   :  { %v4296_v9 = vadd.f32 %v8600_v36, %v4295_v42  ;;  %v6792_v15 = vpop.f32.mrb[51].mxu1 }
0x58f9   :  { %5937 = vst [vmem:[%s8958_s12 + $0x2a] sm:$0x3] %v4296_v9 }
0x58fe   :  { %v4447_v51 = vpop.f32.mrb[52].mxu1 }
0x58ff   :  { %v4448_v61 = vadd.f32 %v8600_v36, %v4447_v51  ;;  %v6811_v26 = vpop.f32.mrb[53].mxu1 }
0x5901   :  { %5941 = vst [vmem:[%s8958_s12 + $0x2c] sm:$0x3] %v4448_v61 }
0x5906   :  { %v4599_v35 = vpop.f32.mrb[54].mxu1 }
0x5907   :  { %v4600_v21 = vadd.f32 %v8600_v36, %v4599_v35  ;;  %v6830_v0 = vpop.f32.mrb[55].mxu1 }
0x5909   :  { %5945 = vst [vmem:[%s8958_s12 + $0x2e] sm:$0x3] %v4600_v21 }
0x590e   :  { %v4751_v59 = vpop.f32.mrb[56].mxu1 }
0x590f   :  { %v4752_v19 = vadd.f32 %v8600_v36, %v4751_v59  ;;  %v6849_v52 = vpop.f32.mrb[57].mxu1 }
0x5911   :  { %5949 = vst [vmem:[%s8958_s12 + $0x30] sm:$0x3] %v4752_v19 }
0x594e   :  { %v4903_v28 = vpop.f32.mrb[58].mxu1 }
0x594f   :  { %v4904_v44 = vadd.f32 %v8600_v36, %v4903_v28  ;;  %v6868_v38 = vpop.f32.mrb[59].mxu1 }
0x5951   :  { %5953 = vst [vmem:[%s8958_s12 + $0x32] sm:$0x3] %v4904_v44 }
0x5956   :  { %v5055_v55 = vpop.f32.mrb[60].mxu1 }
0x5957   :  { %v5056_v56 = vadd.f32 %v8600_v36, %v5055_v55  ;;  %v6887_v17 = vpop.f32.mrb[61].mxu1 }
0x5959   :  { %5957 = vst [vmem:[%s8958_s12 + $0x34] sm:$0x3] %v5056_v56 }
0x595e   :  { %v5207_v23 = vpop.f32.mrb[62].mxu1 }
0x595f   :  { %v5208_v58 = vadd.f32 %v8600_v36, %v5207_v23  ;;  %v6906_v40 = vpop.f32.mrb[63].mxu1 }
0x5961   :  { %5961 = vst [vmem:[%s8958_s12 + $0x36] sm:$0x3] %v5208_v58 }
0x5966   :  { %v5359_v62 = vpop.f32.mrb[64].mxu1 }
0x5967   :  { %v5360_v6 = vadd.f32 %v8600_v36, %v5359_v62  ;;  %v6925_v60 = vpop.f32.mrb[65].mxu1 }
0x5969   :  { %5965 = vst [vmem:[%s8958_s12 + $0x38] sm:$0x3] %v5360_v6 }
0x596e   :  { %v5511_v50 = vpop.f32.mrb[66].mxu1 }
0x596f   :  { %v5512_v2 = vadd.f32 %v8600_v36, %v5511_v50  ;;  %v6944_v20 = vpop.f32.mrb[67].mxu1 }
0x5971   :  { %5969 = vst [vmem:[%s8958_s12 + $0x3a] sm:$0x3] %v5512_v2 }
0x5976   :  { %v5663_v5 = vpop.f32.mrb[68].mxu1 }
0x5977   :  { %v5664_v47 = vadd.f32 %v8600_v36, %v5663_v5  ;;  %v6963_v22 = vpop.f32.mrb[69].mxu1 }
0x5979   :  { %5973 = vst [vmem:[%s8958_s12 + $0x3c] sm:$0x3] %v5664_v47 }
0x59c1   :  { %v5815_v7 = vpop.f32.mrb[70].mxu1 }
0x59c2   :  { %v5816_v37 = vadd.f32 %v8600_v36, %v5815_v7  ;;  %v6982_v8 = vpop.f32.mrb[71].mxu1 }
0x59c4   :  { %5977 = vst [vmem:[%s8958_s12 + $0x3e] sm:$0x3] %v5816_v37 }

</bundles_post_ra>
